<compile_context>
chip_gen: v7x
topology: tpu7x:2x2x1
jax: 0.10.0
libtpu: 0.0.40
codegen_flags: <defaults>
</compile_context>

<pallas_src>
import functools

import jax
import jax.numpy as jnp
from jax import lax
from jax.experimental import pallas as pl
from jax.experimental.pallas import tpu as pltpu

CP = 128              # lane-dense (padded) channel width used inside the kernels
NUM_CHANNELS = 32     # self.num_channels of the wrapped backbone


# ----------------------------------------------------------------------------
# helpers
# ----------------------------------------------------------------------------
def _largest_divisor_le(n, cap):
    cap = max(1, min(n, cap))
    for d in range(cap, 0, -1):
        if n % d == 0:
            return d
    return 1


def _pad_channels_to(a, cp=CP):
    pad = cp - a.shape[-1]
    if pad == 0:
        return a
    return jnp.pad(a, [(0, 0)] * (a.ndim - 1) + [(0, pad)])


def _prep_conv_params(w_hwio, b, cp=CP):
    """Pad (2,2,cin,cout) -> (2,2,CP,CP); split per dy and flatten rows as (dx, cin)."""
    _, kw, cin, cout = w_hwio.shape
    wp = jnp.zeros((2, 2, cp, cp), jnp.float32).at[:, :, :cin, :cout].set(w_hwio)
    w0 = wp[0].reshape(kw * cp, cp).astype(jnp.bfloat16)   # dy = 0
    w1 = wp[1].reshape(kw * cp, cp).astype(jnp.bfloat16)   # dy = 1
    bp = jnp.zeros((1, cp), jnp.float32).at[0, :cout].set(b)
    return w0, w1, bp


def _prep_1x1_params(w_io, b, cp=CP):
    cin, cout = w_io.shape
    wp = jnp.zeros((cp, cp), jnp.float32).at[:cin, :cout].set(w_io).astype(jnp.bfloat16)
    bp = jnp.zeros((1, cp), jnp.float32).at[0, :cout].set(b)
    return wp, bp


# ----------------------------------------------------------------------------
# Pallas kernel 1: fused patchify + 2x2/stride-2 conv + bias + ReLU
#                  (optionally fused with the 1x1 layer4 conv as an epilogue)
# ----------------------------------------------------------------------------
def _conv2x2_bias_relu_kernel(x_ref, w0_ref, w1_ref, b_ref, o_ref, *, tr):
    """One grid step = `tr` output (n, ho) rows.

    x_ref : (2*tr, Wo, 2*CP) bf16  rows 2k / 2k+1 are the dy=0 / dy=1 source
                                   rows; the lane axis packs (dx, cin).
    w*_ref: (2*CP, CP)       bf16  per-dy weights, rows packed as (dx, cin).
    b_ref : (1, CP)          f32
    o_ref : (tr, Wo, CP)
    """
    for k in range(tr):                                    # short static unroll
        acc = jnp.dot(x_ref[2 * k], w0_ref[...], preferred_element_type=jnp.float32)
        acc += jnp.dot(x_ref[2 * k + 1], w1_ref[...], preferred_element_type=jnp.float32)
        acc = jnp.maximum(acc + b_ref[...], 0.0)           # f32 epilogue
        o_ref[k] = acc.astype(o_ref.dtype)


def _conv2x2_then_1x1_kernel(x_ref, w0_ref, w1_ref, b_ref, w4_ref, b4_ref, o_ref, *, tr):
    """Same as above, with the 1x1 conv + bias + ReLU (layer4) fused on the VMEM tile."""
    for k in range(tr):
        acc = jnp.dot(x_ref[2 * k], w0_ref[...], preferred_element_type=jnp.float32)
        acc += jnp.dot(x_ref[2 * k + 1], w1_ref[...], preferred_element_type=jnp.float32)
        a3 = jnp.maximum(acc + b_ref[...], 0.0)
        acc4 = jnp.dot(a3.astype(jnp.bfloat16), w4_ref[...],
                       preferred_element_type=jnp.float32)
        a4 = jnp.maximum(acc4 + b4_ref[...], 0.0)
        o_ref[k] = a4.astype(o_ref.dtype)


def conv_stage(x_nhwc, w0, w1, b, *, w4=None, b4=None, out_dtype=jnp.bfloat16):
    """2x2 stride-2 conv (+ optional fused 1x1 conv), bias + ReLU.

    x_nhwc: (N, H, W, CP) bf16, channels already zero-padded to CP=128.
    """
    N, H, W, cp = x_nhwc.shape
    Ho, Wo = H // 2, W // 2
    x_nhwc = x_nhwc[:, : 2 * Ho, : 2 * Wo, :]          # tolerate odd H/W (floor)
    xv = x_nhwc.reshape(N * 2 * Ho, Wo, 2 * cp)        # contiguous view: no im2col copy

    n_rows = N * Ho                                    # output (n, ho) rows
    tr = _largest_divisor_le(n_rows, max(1, 512 // max(Wo, 1)))  # ~512 out rows / step
    grid = (n_rows // tr,)

    fused = w4 is not None
    kernel = functools.partial(
        _conv2x2_then_1x1_kernel if fused else _conv2x2_bias_relu_kernel, tr=tr)

    in_specs = [
        pl.BlockSpec((2 * tr, Wo, 2 * cp), lambda i: (i, 0, 0)),
        pl.BlockSpec((2 * cp, cp), lambda i: (0, 0)),
        pl.BlockSpec((2 * cp, cp), lambda i: (0, 0)),
        pl.BlockSpec((1, cp), lambda i: (0, 0)),
    ]
    args = [xv, w0, w1, b]
    flops = 2 * n_rows * Wo * (4 * cp) * cp
    if fused:
        in_specs += [pl.BlockSpec((cp, cp), lambda i: (0, 0)),
                     pl.BlockSpec((1, cp), lambda i: (0, 0))]
        args += [w4, b4]
        flops += 2 * n_rows * Wo * cp * cp
    bytes_accessed = sum(int(a.size) * a.dtype.itemsize for a in args)
    bytes_accessed += n_rows * Wo * cp * jnp.dtype(out_dtype).itemsize

    out = pl.pallas_call(
        kernel,
        out_shape=jax.ShapeDtypeStruct((n_rows, Wo, cp), out_dtype),
        grid=grid,
        in_specs=in_specs,
        out_specs=pl.BlockSpec((tr, Wo, cp), lambda i: (i, 0, 0)),
        compiler_params=pltpu.CompilerParams(dimension_semantics=("parallel",)),
        cost_estimate=pl.CostEstimate(flops=flops, transcendentals=0,
                                      bytes_accessed=bytes_accessed),
    )(*args)
    return out.reshape(N, Ho, Wo, cp)


# ----------------------------------------------------------------------------
# Pallas kernel 2: nearest-neighbour mask resize (F.interpolate, mode='nearest')
# ----------------------------------------------------------------------------
def _mask_resize_kernel(m_ref, sel_ref, o_ref, *, rows):
    # m_ref: (1, H, W) f32 (one image); sel_ref: (W, wo) one-hot column picks;
    # o_ref: (1, ho, wo) f32.  `rows` are static nearest source-row indices.
    for i, r in enumerate(rows):
        o_ref[:, i, :] = jnp.dot(m_ref[:, r, :], sel_ref[...],
                                 preferred_element_type=jnp.float32)


def interpolate_mask_nearest(mask_bool, out_hw):
    """Matches F.interpolate(m[None].float(), size=out_hw).to(torch.bool)[0]."""
    N, H, W = mask_bool.shape
    ho, wo = out_hw
    # PyTorch 'nearest': src = floor(dst * in / out) — static at trace time.
    rows = tuple((i * H) // ho for i in range(ho))
    cols = [(j * W) // wo for j in range(wo)]
    sel = jnp.zeros((W, wo), jnp.float32).at[jnp.array(cols), jnp.arange(wo)].set(1.0)
    out_f = pl.pallas_call(
        functools.partial(_mask_resize_kernel, rows=rows),
        out_shape=jax.ShapeDtypeStruct((N, ho, wo), jnp.float32),
        grid=(N,),
        in_specs=[pl.BlockSpec((1, H, W), lambda n: (n, 0, 0)),
                  pl.BlockSpec((W, wo), lambda n: (0, 0))],
        out_specs=pl.BlockSpec((1, ho, wo), lambda n: (n, 0, 0)),
        compiler_params=pltpu.CompilerParams(dimension_semantics=("parallel",)),
    )(mask_bool.astype(jnp.float32), sel)
    # TODO(synk): for production-size masks, gather only the needed source rows via a
    # scalar-prefetch index_map and keep the mask in int8 to cut HBM bytes further.
    return out_f > 0.5


# ----------------------------------------------------------------------------
# Synthetic backbone (layer1..layer4) + BackboneBase.forward
# ----------------------------------------------------------------------------
def init_params(key, c_in=4, num_channels=NUM_CHANNELS):
    # TODO(synk): the real DETR backbone is a torchvision ResNet wrapped by
    # IntermediateLayerGetter; this synthetic 4-stage conv body only mirrors the
    # forward contract (return layer4 output + resized mask).
    ks = jax.random.split(key, 8)

    def conv_w(k, shape):
        fan_in = 1
        for d in shape[:-1]:
            fan_in *= d
        return jax.random.normal(k, shape, jnp.float32) * (2.0 / fan_in) ** 0.5

    def bias(k, n):
        return 0.1 * jax.random.normal(k, (n,), jnp.float32)

    return {
        "layer1": {"w": conv_w(ks[0], (2, 2, c_in, 8)), "b": bias(ks[1], 8)},
        "layer2": {"w": conv_w(ks[2], (2, 2, 8, 16)), "b": bias(ks[3], 16)},
        "layer3": {"w": conv_w(ks[4], (2, 2, 16, 32)), "b": bias(ks[5], 32)},
        "layer4": {"w": conv_w(ks[6], (32, num_channels)),
                   "b": bias(ks[7], num_channels)},
    }


def backbone_base_forward(params, tensors_nchw, mask):
    """Equivalent of BackboneBase.forward with return_interm_layers=False."""
    num_channels = params["layer4"]["w"].shape[-1]
    x = jnp.transpose(tensors_nchw, (0, 2, 3, 1))              # NCHW -> NHWC
    x = _pad_channels_to(x).astype(jnp.bfloat16)               # lane-dense channels

    w0a, w1a, ba = _prep_conv_params(params["layer1"]["w"], params["layer1"]["b"])
    w0b, w1b, bb = _prep_conv_params(params["layer2"]["w"], params["layer2"]["b"])
    w0c, w1c, bc = _prep_conv_params(params["layer3"]["w"], params["layer3"]["b"])
    w4, b4 = _prep_1x1_params(params["layer4"]["w"], params["layer4"]["b"])

    x = conv_stage(x, w0a, w1a, ba)                            # /2
    x = conv_stage(x, w0b, w1b, bb)                            # /4
    x = conv_stage(x, w0c, w1c, bc, w4=w4, b4=b4,              # /8 + fused 1x1 layer4
                   out_dtype=jnp.float32)

    feat = jnp.transpose(x[..., :num_channels], (0, 3, 1, 2))  # back to NCHW
    m = interpolate_mask_nearest(mask, feat.shape[-2:])
    return {"0": (feat, m)}                                    # NestedTensor(x, mask)


# ----------------------------------------------------------------------------
# Plain-JAX reference (emulates the kernels' bf16 operand rounding)
# ----------------------------------------------------------------------------
def _ref_forward(params, tensors_nchw, mask):
    def q(a):  # emulate bf16 MXU operands with f32 accumulation
        return a.astype(jnp.bfloat16).astype(jnp.float32)

    x = jnp.transpose(tensors_nchw, (0, 2, 3, 1))
    dn = ("NHWC", "HWIO", "NHWC")
    for name in ("layer1", "layer2", "layer3"):
        w, b = params[name]["w"], params[name]["b"]
        x = lax.conv_general_dilated(q(x), q(w), (2, 2), "VALID", dimension_numbers=dn)
        x = jnp.maximum(x + b, 0.0)
    w4, b4 = params["layer4"]["w"], params["layer4"]["b"]
    x = jnp.maximum(jnp.einsum("nhwc,cd->nhwd", q(x), q(w4)) + b4, 0.0)
    x_nchw = jnp.transpose(x, (0, 3, 1, 2))

    N, H, W = mask.shape
    ho, wo = x_nchw.shape[-2:]
    rows = jnp.array([(i * H) // ho for i in range(ho)])
    cols = jnp.array([(j * W) // wo for j in range(wo)])
    m = mask[:, rows, :][:, :, cols]
    return x_nchw, m


if __name__ == "__main__":
    key = jax.random.PRNGKey(0)
    k_x, k_p = jax.random.split(key)

    N, C, H, W = 2, 4, 16, 16
    tensors = jax.random.normal(k_x, (N, C, H, W), jnp.float32)
    # Deterministic padding mask: True on right-side padding columns.
    pad_start = jnp.array([6, 12])[:, None, None]
    mask = jnp.broadcast_to(jnp.arange(W)[None, None, :], (N, H, W)) >= pad_start

    params = init_params(k_p, c_in=C)

    fwd = jax.jit(backbone_base_forward)
    out = fwd(params, tensors, mask)
    feat, out_mask = out["0"]
    jax.block_until_ready(feat)
    jax.block_until_ready(out_mask)

    # sanity check against the plain-JAX reference
    ref_feat, ref_mask = _ref_forward(params, tensors, mask)
    assert feat.shape == (N, NUM_CHANNELS, 2, 2) and feat.dtype == jnp.float32
    assert out_mask.shape == (N, 2, 2) and out_mask.dtype == jnp.bool_
    assert jnp.allclose(feat, ref_feat, atol=2e-2, rtol=2e-2)
    assert bool(jnp.all(out_mask == ref_mask))

    print("KERNEL_OK")
</pallas_src>

<mosaic_0001>
module attributes {stable_mosaic.version = 11 : i64} {
  func.func @_conv2x2_bias_relu_kernel(%arg0: i32, %arg1: memref<32x8x256xbf16, #tpu.memory_space<vmem>>, %arg2: memref<256x128xbf16, #tpu.memory_space<vmem>>, %arg3: memref<256x128xbf16, #tpu.memory_space<vmem>>, %arg4: memref<1x128xf32, #tpu.memory_space<vmem>>, %arg5: memref<16x8x128xbf16, #tpu.memory_space<vmem>>) attributes {dimension_semantics = [#tpu.dimension_semantics<parallel>], iteration_bounds = array<i64: 1>, scalar_prefetch = 0 : i64, scratch_operands = 0 : i64, tpu.core_type = #tpu.core_type<tc>, window_params = [{transform_indices = @transform_0, window_bounds = array<i64: 32, 8, 256>}, {pipeline_mode = #tpu.pipeline_mode<synchronous>, transform_indices = @transform_1, window_bounds = array<i64: 256, 128>}, {pipeline_mode = #tpu.pipeline_mode<synchronous>, transform_indices = @transform_2, window_bounds = array<i64: 256, 128>}, {pipeline_mode = #tpu.pipeline_mode<synchronous>, transform_indices = @transform_3, window_bounds = array<i64: 1, 128>}, {transform_indices = @transform_4, window_bounds = array<i64: 16, 8, 128>}]} {
    %c0 = arith.constant 0 : index
    %c0_0 = arith.constant 0 : index
    %c0_1 = arith.constant 0 : index
    %0 = vector.load %arg1[%c0, %c0_0, %c0_1] : memref<32x8x256xbf16, #tpu.memory_space<vmem>>, vector<1x8x256xbf16>
    %1 = vector.shape_cast %0 : vector<1x8x256xbf16> to vector<8x256xbf16>
    %c0_2 = arith.constant 0 : index
    %c0_3 = arith.constant 0 : index
    %2 = vector.load %arg2[%c0_2, %c0_3] : memref<256x128xbf16, #tpu.memory_space<vmem>>, vector<256x128xbf16>
    %cst = arith.constant dense<0.000000e+00> : vector<8x128xf32>
    %3 = tpu.matmul %1, %2, %cst {dimension_numbers = #tpu.dot_dimension_numbers<[1], [0], [0], [1], [0, 0, 1, 1], [], []>} : vector<8x256xbf16>, vector<256x128xbf16>, vector<8x128xf32> -> vector<8x128xf32>
    %c1 = arith.constant 1 : index
    %c0_4 = arith.constant 0 : index
    %c0_5 = arith.constant 0 : index
    %4 = vector.load %arg1[%c1, %c0_4, %c0_5] : memref<32x8x256xbf16, #tpu.memory_space<vmem>>, vector<1x8x256xbf16>
    %5 = vector.shape_cast %4 : vector<1x8x256xbf16> to vector<8x256xbf16>
    %c0_6 = arith.constant 0 : index
    %c0_7 = arith.constant 0 : index
    %6 = vector.load %arg3[%c0_6, %c0_7] : memref<256x128xbf16, #tpu.memory_space<vmem>>, vector<256x128xbf16>
    %cst_8 = arith.constant dense<0.000000e+00> : vector<8x128xf32>
    %7 = tpu.matmul %5, %6, %cst_8 {dimension_numbers = #tpu.dot_dimension_numbers<[1], [0], [0], [1], [0, 0, 1, 1], [], []>} : vector<8x256xbf16>, vector<256x128xbf16>, vector<8x128xf32> -> vector<8x128xf32>
    %8 = arith.addf %3, %7 : vector<8x128xf32>
    %c0_9 = arith.constant 0 : index
    %c0_10 = arith.constant 0 : index
    %9 = vector.load %arg4[%c0_9, %c0_10] : memref<1x128xf32, #tpu.memory_space<vmem>>, vector<1x128xf32>
    %10 = vector.broadcast %9 : vector<1x128xf32> to vector<8x128xf32>
    %11 = arith.addf %8, %10 : vector<8x128xf32>
    %cst_11 = arith.constant 0.000000e+00 : f32
    %12 = vector.broadcast %cst_11 : f32 to vector<8x128xf32>
    %13 = arith.maximumf %11, %12 : vector<8x128xf32>
    %14 = arith.truncf %13 : vector<8x128xf32> to vector<8x128xbf16>
    %c0_12 = arith.constant 0 : index
    %c0_13 = arith.constant 0 : index
    %c0_14 = arith.constant 0 : index
    %15 = vector.load %arg5[%c0_12, %c0_13, %c0_14] : memref<16x8x128xbf16, #tpu.memory_space<vmem>>, vector<1x8x128xbf16>
    %16 = vector.shape_cast %15 : vector<1x8x128xbf16> to vector<8x128xbf16>
    %17 = vector.shape_cast %14 : vector<8x128xbf16> to vector<1x8x128xbf16>
    tpu.vector_store %arg5[%c0_12, %c0_13, %c0_14], %17 {strides = array<i32>} : memref<16x8x128xbf16, #tpu.memory_space<vmem>>, vector<1x8x128xbf16>,
    %c2 = arith.constant 2 : index
    %c0_15 = arith.constant 0 : index
    %c0_16 = arith.constant 0 : index
    %18 = vector.load %arg1[%c2, %c0_15, %c0_16] : memref<32x8x256xbf16, #tpu.memory_space<vmem>>, vector<1x8x256xbf16>
    %19 = vector.shape_cast %18 : vector<1x8x256xbf16> to vector<8x256xbf16>
    %c0_17 = arith.constant 0 : index
    %c0_18 = arith.constant 0 : index
    %20 = vector.load %arg2[%c0_17, %c0_18] : memref<256x128xbf16, #tpu.memory_space<vmem>>, vector<256x128xbf16>
    %cst_19 = arith.constant dense<0.000000e+00> : vector<8x128xf32>
    %21 = tpu.matmul %19, %20, %cst_19 {dimension_numbers = #tpu.dot_dimension_numbers<[1], [0], [0], [1], [0, 0, 1, 1], [], []>} : vector<8x256xbf16>, vector<256x128xbf16>, vector<8x128xf32> -> vector<8x128xf32>
    %c3 = arith.constant 3 : index
    %c0_20 = arith.constant 0 : index
    %c0_21 = arith.constant 0 : index
    %22 = vector.load %arg1[%c3, %c0_20, %c0_21] : memref<32x8x256xbf16, #tpu.memory_space<vmem>>, vector<1x8x256xbf16>
    %23 = vector.shape_cast %22 : vector<1x8x256xbf16> to vector<8x256xbf16>
    %c0_22 = arith.constant 0 : index
    %c0_23 = arith.constant 0 : index
    %24 = vector.load %arg3[%c0_22, %c0_23] : memref<256x128xbf16, #tpu.memory_space<vmem>>, vector<256x128xbf16>
    %cst_24 = arith.constant dense<0.000000e+00> : vector<8x128xf32>
    %25 = tpu.matmul %23, %24, %cst_24 {dimension_numbers = #tpu.dot_dimension_numbers<[1], [0], [0], [1], [0, 0, 1, 1], [], []>} : vector<8x256xbf16>, vector<256x128xbf16>, vector<8x128xf32> -> vector<8x128xf32>
    %26 = arith.addf %21, %25 : vector<8x128xf32>
    %c0_25 = arith.constant 0 : index
    %c0_26 = arith.constant 0 : index
    %27 = vector.load %arg4[%c0_25, %c0_26] : memref<1x128xf32, #tpu.memory_space<vmem>>, vector<1x128xf32>
    %28 = vector.broadcast %27 : vector<1x128xf32> to vector<8x128xf32>
    %29 = arith.addf %26, %28 : vector<8x128xf32>
    %cst_27 = arith.constant 0.000000e+00 : f32
    %30 = vector.broadcast %cst_27 : f32 to vector<8x128xf32>
    %31 = arith.maximumf %29, %30 : vector<8x128xf32>
    %32 = arith.truncf %31 : vector<8x128xf32> to vector<8x128xbf16>
    %c1_28 = arith.constant 1 : index
    %c0_29 = arith.constant 0 : index
    %c0_30 = arith.constant 0 : index
    %33 = vector.load %arg5[%c1_28, %c0_29, %c0_30] : memref<16x8x128xbf16, #tpu.memory_space<vmem>>, vector<1x8x128xbf16>
    %34 = vector.shape_cast %33 : vector<1x8x128xbf16> to vector<8x128xbf16>
    %35 = vector.shape_cast %32 : vector<8x128xbf16> to vector<1x8x128xbf16>
    tpu.vector_store %arg5[%c1_28, %c0_29, %c0_30], %35 {strides = array<i32>} : memref<16x8x128xbf16, #tpu.memory_space<vmem>>, vector<1x8x128xbf16>,
    %c4 = arith.constant 4 : index
    %c0_31 = arith.constant 0 : index
    %c0_32 = arith.constant 0 : index
    %36 = vector.load %arg1[%c4, %c0_31, %c0_32] : memref<32x8x256xbf16, #tpu.memory_space<vmem>>, vector<1x8x256xbf16>
    %37 = vector.shape_cast %36 : vector<1x8x256xbf16> to vector<8x256xbf16>
    %c0_33 = arith.constant 0 : index
    %c0_34 = arith.constant 0 : index
    %38 = vector.load %arg2[%c0_33, %c0_34] : memref<256x128xbf16, #tpu.memory_space<vmem>>, vector<256x128xbf16>
    %cst_35 = arith.constant dense<0.000000e+00> : vector<8x128xf32>
    %39 = tpu.matmul %37, %38, %cst_35 {dimension_numbers = #tpu.dot_dimension_numbers<[1], [0], [0], [1], [0, 0, 1, 1], [], []>} : vector<8x256xbf16>, vector<256x128xbf16>, vector<8x128xf32> -> vector<8x128xf32>
    %c5 = arith.constant 5 : index
    %c0_36 = arith.constant 0 : index
    %c0_37 = arith.constant 0 : index
    %40 = vector.load %arg1[%c5, %c0_36, %c0_37] : memref<32x8x256xbf16, #tpu.memory_space<vmem>>, vector<1x8x256xbf16>
    %41 = vector.shape_cast %40 : vector<1x8x256xbf16> to vector<8x256xbf16>
    %c0_38 = arith.constant 0 : index
    %c0_39 = arith.constant 0 : index
    %42 = vector.load %arg3[%c0_38, %c0_39] : memref<256x128xbf16, #tpu.memory_space<vmem>>, vector<256x128xbf16>
    %cst_40 = arith.constant dense<0.000000e+00> : vector<8x128xf32>
    %43 = tpu.matmul %41, %42, %cst_40 {dimension_numbers = #tpu.dot_dimension_numbers<[1], [0], [0], [1], [0, 0, 1, 1], [], []>} : vector<8x256xbf16>, vector<256x128xbf16>, vector<8x128xf32> -> vector<8x128xf32>
    %44 = arith.addf %39, %43 : vector<8x128xf32>
    %c0_41 = arith.constant 0 : index
    %c0_42 = arith.constant 0 : index
    %45 = vector.load %arg4[%c0_41, %c0_42] : memref<1x128xf32, #tpu.memory_space<vmem>>, vector<1x128xf32>
    %46 = vector.broadcast %45 : vector<1x128xf32> to vector<8x128xf32>
    %47 = arith.addf %44, %46 : vector<8x128xf32>
    %cst_43 = arith.constant 0.000000e+00 : f32
    %48 = vector.broadcast %cst_43 : f32 to vector<8x128xf32>
    %49 = arith.maximumf %47, %48 : vector<8x128xf32>
    %50 = arith.truncf %49 : vector<8x128xf32> to vector<8x128xbf16>
    %c2_44 = arith.constant 2 : index
    %c0_45 = arith.constant 0 : index
    %c0_46 = arith.constant 0 : index
    %51 = vector.load %arg5[%c2_44, %c0_45, %c0_46] : memref<16x8x128xbf16, #tpu.memory_space<vmem>>, vector<1x8x128xbf16>
    %52 = vector.shape_cast %51 : vector<1x8x128xbf16> to vector<8x128xbf16>
    %53 = vector.shape_cast %50 : vector<8x128xbf16> to vector<1x8x128xbf16>
    tpu.vector_store %arg5[%c2_44, %c0_45, %c0_46], %53 {strides = array<i32>} : memref<16x8x128xbf16, #tpu.memory_space<vmem>>, vector<1x8x128xbf16>,
    %c6 = arith.constant 6 : index
    %c0_47 = arith.constant 0 : index
    %c0_48 = arith.constant 0 : index
    %54 = vector.load %arg1[%c6, %c0_47, %c0_48] : memref<32x8x256xbf16, #tpu.memory_space<vmem>>, vector<1x8x256xbf16>
    %55 = vector.shape_cast %54 : vector<1x8x256xbf16> to vector<8x256xbf16>
    %c0_49 = arith.constant 0 : index
    %c0_50 = arith.constant 0 : index
    %56 = vector.load %arg2[%c0_49, %c0_50] : memref<256x128xbf16, #tpu.memory_space<vmem>>, vector<256x128xbf16>
    %cst_51 = arith.constant dense<0.000000e+00> : vector<8x128xf32>
    %57 = tpu.matmul %55, %56, %cst_51 {dimension_numbers = #tpu.dot_dimension_numbers<[1], [0], [0], [1], [0, 0, 1, 1], [], []>} : vector<8x256xbf16>, vector<256x128xbf16>, vector<8x128xf32> -> vector<8x128xf32>
    %c7 = arith.constant 7 : index
    %c0_52 = arith.constant 0 : index
    %c0_53 = arith.constant 0 : index
    %58 = vector.load %arg1[%c7, %c0_52, %c0_53] : memref<32x8x256xbf16, #tpu.memory_space<vmem>>, vector<1x8x256xbf16>
    %59 = vector.shape_cast %58 : vector<1x8x256xbf16> to vector<8x256xbf16>
    %c0_54 = arith.constant 0 : index
    %c0_55 = arith.constant 0 : index
    %60 = vector.load %arg3[%c0_54, %c0_55] : memref<256x128xbf16, #tpu.memory_space<vmem>>, vector<256x128xbf16>
    %cst_56 = arith.constant dense<0.000000e+00> : vector<8x128xf32>
    %61 = tpu.matmul %59, %60, %cst_56 {dimension_numbers = #tpu.dot_dimension_numbers<[1], [0], [0], [1], [0, 0, 1, 1], [], []>} : vector<8x256xbf16>, vector<256x128xbf16>, vector<8x128xf32> -> vector<8x128xf32>
    %62 = arith.addf %57, %61 : vector<8x128xf32>
    %c0_57 = arith.constant 0 : index
    %c0_58 = arith.constant 0 : index
    %63 = vector.load %arg4[%c0_57, %c0_58] : memref<1x128xf32, #tpu.memory_space<vmem>>, vector<1x128xf32>
    %64 = vector.broadcast %63 : vector<1x128xf32> to vector<8x128xf32>
    %65 = arith.addf %62, %64 : vector<8x128xf32>
    %cst_59 = arith.constant 0.000000e+00 : f32
    %66 = vector.broadcast %cst_59 : f32 to vector<8x128xf32>
    %67 = arith.maximumf %65, %66 : vector<8x128xf32>
    %68 = arith.truncf %67 : vector<8x128xf32> to vector<8x128xbf16>
    %c3_60 = arith.constant 3 : index
    %c0_61 = arith.constant 0 : index
    %c0_62 = arith.constant 0 : index
    %69 = vector.load %arg5[%c3_60, %c0_61, %c0_62] : memref<16x8x128xbf16, #tpu.memory_space<vmem>>, vector<1x8x128xbf16>
    %70 = vector.shape_cast %69 : vector<1x8x128xbf16> to vector<8x128xbf16>
    %71 = vector.shape_cast %68 : vector<8x128xbf16> to vector<1x8x128xbf16>
    tpu.vector_store %arg5[%c3_60, %c0_61, %c0_62], %71 {strides = array<i32>} : memref<16x8x128xbf16, #tpu.memory_space<vmem>>, vector<1x8x128xbf16>,
    %c8 = arith.constant 8 : index
    %c0_63 = arith.constant 0 : index
    %c0_64 = arith.constant 0 : index
    %72 = vector.load %arg1[%c8, %c0_63, %c0_64] : memref<32x8x256xbf16, #tpu.memory_space<vmem>>, vector<1x8x256xbf16>
    %73 = vector.shape_cast %72 : vector<1x8x256xbf16> to vector<8x256xbf16>
    %c0_65 = arith.constant 0 : index
    %c0_66 = arith.constant 0 : index
    %74 = vector.load %arg2[%c0_65, %c0_66] : memref<256x128xbf16, #tpu.memory_space<vmem>>, vector<256x128xbf16>
    %cst_67 = arith.constant dense<0.000000e+00> : vector<8x128xf32>
    %75 = tpu.matmul %73, %74, %cst_67 {dimension_numbers = #tpu.dot_dimension_numbers<[1], [0], [0], [1], [0, 0, 1, 1], [], []>} : vector<8x256xbf16>, vector<256x128xbf16>, vector<8x128xf32> -> vector<8x128xf32>
    %c9 = arith.constant 9 : index
    %c0_68 = arith.constant 0 : index
    %c0_69 = arith.constant 0 : index
    %76 = vector.load %arg1[%c9, %c0_68, %c0_69] : memref<32x8x256xbf16, #tpu.memory_space<vmem>>, vector<1x8x256xbf16>
    %77 = vector.shape_cast %76 : vector<1x8x256xbf16> to vector<8x256xbf16>
    %c0_70 = arith.constant 0 : index
    %c0_71 = arith.constant 0 : index
    %78 = vector.load %arg3[%c0_70, %c0_71] : memref<256x128xbf16, #tpu.memory_space<vmem>>, vector<256x128xbf16>
    %cst_72 = arith.constant dense<0.000000e+00> : vector<8x128xf32>
    %79 = tpu.matmul %77, %78, %cst_72 {dimension_numbers = #tpu.dot_dimension_numbers<[1], [0], [0], [1], [0, 0, 1, 1], [], []>} : vector<8x256xbf16>, vector<256x128xbf16>, vector<8x128xf32> -> vector<8x128xf32>
    %80 = arith.addf %75, %79 : vector<8x128xf32>
    %c0_73 = arith.constant 0 : index
    %c0_74 = arith.constant 0 : index
    %81 = vector.load %arg4[%c0_73, %c0_74] : memref<1x128xf32, #tpu.memory_space<vmem>>, vector<1x128xf32>
    %82 = vector.broadcast %81 : vector<1x128xf32> to vector<8x128xf32>
    %83 = arith.addf %80, %82 : vector<8x128xf32>
    %cst_75 = arith.constant 0.000000e+00 : f32
    %84 = vector.broadcast %cst_75 : f32 to vector<8x128xf32>
    %85 = arith.maximumf %83, %84 : vector<8x128xf32>
    %86 = arith.truncf %85 : vector<8x128xf32> to vector<8x128xbf16>
    %c4_76 = arith.constant 4 : index
    %c0_77 = arith.constant 0 : index
    %c0_78 = arith.constant 0 : index
    %87 = vector.load %arg5[%c4_76, %c0_77, %c0_78] : memref<16x8x128xbf16, #tpu.memory_space<vmem>>, vector<1x8x128xbf16>
    %88 = vector.shape_cast %87 : vector<1x8x128xbf16> to vector<8x128xbf16>
    %89 = vector.shape_cast %86 : vector<8x128xbf16> to vector<1x8x128xbf16>
    tpu.vector_store %arg5[%c4_76, %c0_77, %c0_78], %89 {strides = array<i32>} : memref<16x8x128xbf16, #tpu.memory_space<vmem>>, vector<1x8x128xbf16>,
    %c10 = arith.constant 10 : index
    %c0_79 = arith.constant 0 : index
    %c0_80 = arith.constant 0 : index
    %90 = vector.load %arg1[%c10, %c0_79, %c0_80] : memref<32x8x256xbf16, #tpu.memory_space<vmem>>, vector<1x8x256xbf16>
    %91 = vector.shape_cast %90 : vector<1x8x256xbf16> to vector<8x256xbf16>
    %c0_81 = arith.constant 0 : index
    %c0_82 = arith.constant 0 : index
    %92 = vector.load %arg2[%c0_81, %c0_82] : memref<256x128xbf16, #tpu.memory_space<vmem>>, vector<256x128xbf16>
    %cst_83 = arith.constant dense<0.000000e+00> : vector<8x128xf32>
    %93 = tpu.matmul %91, %92, %cst_83 {dimension_numbers = #tpu.dot_dimension_numbers<[1], [0], [0], [1], [0, 0, 1, 1], [], []>} : vector<8x256xbf16>, vector<256x128xbf16>, vector<8x128xf32> -> vector<8x128xf32>
    %c11 = arith.constant 11 : index
    %c0_84 = arith.constant 0 : index
    %c0_85 = arith.constant 0 : index
    %94 = vector.load %arg1[%c11, %c0_84, %c0_85] : memref<32x8x256xbf16, #tpu.memory_space<vmem>>, vector<1x8x256xbf16>
    %95 = vector.shape_cast %94 : vector<1x8x256xbf16> to vector<8x256xbf16>
    %c0_86 = arith.constant 0 : index
    %c0_87 = arith.constant 0 : index
    %96 = vector.load %arg3[%c0_86, %c0_87] : memref<256x128xbf16, #tpu.memory_space<vmem>>, vector<256x128xbf16>
    %cst_88 = arith.constant dense<0.000000e+00> : vector<8x128xf32>
    %97 = tpu.matmul %95, %96, %cst_88 {dimension_numbers = #tpu.dot_dimension_numbers<[1], [0], [0], [1], [0, 0, 1, 1], [], []>} : vector<8x256xbf16>, vector<256x128xbf16>, vector<8x128xf32> -> vector<8x128xf32>
    %98 = arith.addf %93, %97 : vector<8x128xf32>
    %c0_89 = arith.constant 0 : index
    %c0_90 = arith.constant 0 : index
    %99 = vector.load %arg4[%c0_89, %c0_90] : memref<1x128xf32, #tpu.memory_space<vmem>>, vector<1x128xf32>
    %100 = vector.broadcast %99 : vector<1x128xf32> to vector<8x128xf32>
    %101 = arith.addf %98, %100 : vector<8x128xf32>
    %cst_91 = arith.constant 0.000000e+00 : f32
    %102 = vector.broadcast %cst_91 : f32 to vector<8x128xf32>
    %103 = arith.maximumf %101, %102 : vector<8x128xf32>
    %104 = arith.truncf %103 : vector<8x128xf32> to vector<8x128xbf16>
    %c5_92 = arith.constant 5 : index
    %c0_93 = arith.constant 0 : index
    %c0_94 = arith.constant 0 : index
    %105 = vector.load %arg5[%c5_92, %c0_93, %c0_94] : memref<16x8x128xbf16, #tpu.memory_space<vmem>>, vector<1x8x128xbf16>
    %106 = vector.shape_cast %105 : vector<1x8x128xbf16> to vector<8x128xbf16>
    %107 = vector.shape_cast %104 : vector<8x128xbf16> to vector<1x8x128xbf16>
    tpu.vector_store %arg5[%c5_92, %c0_93, %c0_94], %107 {strides = array<i32>} : memref<16x8x128xbf16, #tpu.memory_space<vmem>>, vector<1x8x128xbf16>,
    %c12 = arith.constant 12 : index
    %c0_95 = arith.constant 0 : index
    %c0_96 = arith.constant 0 : index
    %108 = vector.load %arg1[%c12, %c0_95, %c0_96] : memref<32x8x256xbf16, #tpu.memory_space<vmem>>, vector<1x8x256xbf16>
    %109 = vector.shape_cast %108 : vector<1x8x256xbf16> to vector<8x256xbf16>
    %c0_97 = arith.constant 0 : index
    %c0_98 = arith.constant 0 : index
    %110 = vector.load %arg2[%c0_97, %c0_98] : memref<256x128xbf16, #tpu.memory_space<vmem>>, vector<256x128xbf16>
    %cst_99 = arith.constant dense<0.000000e+00> : vector<8x128xf32>
    %111 = tpu.matmul %109, %110, %cst_99 {dimension_numbers = #tpu.dot_dimension_numbers<[1], [0], [0], [1], [0, 0, 1, 1], [], []>} : vector<8x256xbf16>, vector<256x128xbf16>, vector<8x128xf32> -> vector<8x128xf32>
    %c13 = arith.constant 13 : index
    %c0_100 = arith.constant 0 : index
    %c0_101 = arith.constant 0 : index
    %112 = vector.load %arg1[%c13, %c0_100, %c0_101] : memref<32x8x256xbf16, #tpu.memory_space<vmem>>, vector<1x8x256xbf16>
    %113 = vector.shape_cast %112 : vector<1x8x256xbf16> to vector<8x256xbf16>
    %c0_102 = arith.constant 0 : index
    %c0_103 = arith.constant 0 : index
    %114 = vector.load %arg3[%c0_102, %c0_103] : memref<256x128xbf16, #tpu.memory_space<vmem>>, vector<256x128xbf16>
    %cst_104 = arith.constant dense<0.000000e+00> : vector<8x128xf32>
    %115 = tpu.matmul %113, %114, %cst_104 {dimension_numbers = #tpu.dot_dimension_numbers<[1], [0], [0], [1], [0, 0, 1, 1], [], []>} : vector<8x256xbf16>, vector<256x128xbf16>, vector<8x128xf32> -> vector<8x128xf32>
    %116 = arith.addf %111, %115 : vector<8x128xf32>
    %c0_105 = arith.constant 0 : index
    %c0_106 = arith.constant 0 : index
    %117 = vector.load %arg4[%c0_105, %c0_106] : memref<1x128xf32, #tpu.memory_space<vmem>>, vector<1x128xf32>
    %118 = vector.broadcast %117 : vector<1x128xf32> to vector<8x128xf32>
    %119 = arith.addf %116, %118 : vector<8x128xf32>
    %cst_107 = arith.constant 0.000000e+00 : f32
    %120 = vector.broadcast %cst_107 : f32 to vector<8x128xf32>
    %121 = arith.maximumf %119, %120 : vector<8x128xf32>
    %122 = arith.truncf %121 : vector<8x128xf32> to vector<8x128xbf16>
    %c6_108 = arith.constant 6 : index
    %c0_109 = arith.constant 0 : index
    %c0_110 = arith.constant 0 : index
    %123 = vector.load %arg5[%c6_108, %c0_109, %c0_110] : memref<16x8x128xbf16, #tpu.memory_space<vmem>>, vector<1x8x128xbf16>
    %124 = vector.shape_cast %123 : vector<1x8x128xbf16> to vector<8x128xbf16>
    %125 = vector.shape_cast %122 : vector<8x128xbf16> to vector<1x8x128xbf16>
    tpu.vector_store %arg5[%c6_108, %c0_109, %c0_110], %125 {strides = array<i32>} : memref<16x8x128xbf16, #tpu.memory_space<vmem>>, vector<1x8x128xbf16>,
    %c14 = arith.constant 14 : index
    %c0_111 = arith.constant 0 : index
    %c0_112 = arith.constant 0 : index
    %126 = vector.load %arg1[%c14, %c0_111, %c0_112] : memref<32x8x256xbf16, #tpu.memory_space<vmem>>, vector<1x8x256xbf16>
    %127 = vector.shape_cast %126 : vector<1x8x256xbf16> to vector<8x256xbf16>
    %c0_113 = arith.constant 0 : index
    %c0_114 = arith.constant 0 : index
    %128 = vector.load %arg2[%c0_113, %c0_114] : memref<256x128xbf16, #tpu.memory_space<vmem>>, vector<256x128xbf16>
    %cst_115 = arith.constant dense<0.000000e+00> : vector<8x128xf32>
    %129 = tpu.matmul %127, %128, %cst_115 {dimension_numbers = #tpu.dot_dimension_numbers<[1], [0], [0], [1], [0, 0, 1, 1], [], []>} : vector<8x256xbf16>, vector<256x128xbf16>, vector<8x128xf32> -> vector<8x128xf32>
    %c15 = arith.constant 15 : index
    %c0_116 = arith.constant 0 : index
    %c0_117 = arith.constant 0 : index
    %130 = vector.load %arg1[%c15, %c0_116, %c0_117] : memref<32x8x256xbf16, #tpu.memory_space<vmem>>, vector<1x8x256xbf16>
    %131 = vector.shape_cast %130 : vector<1x8x256xbf16> to vector<8x256xbf16>
    %c0_118 = arith.constant 0 : index
    %c0_119 = arith.constant 0 : index
    %132 = vector.load %arg3[%c0_118, %c0_119] : memref<256x128xbf16, #tpu.memory_space<vmem>>, vector<256x128xbf16>
    %cst_120 = arith.constant dense<0.000000e+00> : vector<8x128xf32>
    %133 = tpu.matmul %131, %132, %cst_120 {dimension_numbers = #tpu.dot_dimension_numbers<[1], [0], [0], [1], [0, 0, 1, 1], [], []>} : vector<8x256xbf16>, vector<256x128xbf16>, vector<8x128xf32> -> vector<8x128xf32>
    %134 = arith.addf %129, %133 : vector<8x128xf32>
    %c0_121 = arith.constant 0 : index
    %c0_122 = arith.constant 0 : index
    %135 = vector.load %arg4[%c0_121, %c0_122] : memref<1x128xf32, #tpu.memory_space<vmem>>, vector<1x128xf32>
    %136 = vector.broadcast %135 : vector<1x128xf32> to vector<8x128xf32>
    %137 = arith.addf %134, %136 : vector<8x128xf32>
    %cst_123 = arith.constant 0.000000e+00 : f32
    %138 = vector.broadcast %cst_123 : f32 to vector<8x128xf32>
    %139 = arith.maximumf %137, %138 : vector<8x128xf32>
    %140 = arith.truncf %139 : vector<8x128xf32> to vector<8x128xbf16>
    %c7_124 = arith.constant 7 : index
    %c0_125 = arith.constant 0 : index
    %c0_126 = arith.constant 0 : index
    %141 = vector.load %arg5[%c7_124, %c0_125, %c0_126] : memref<16x8x128xbf16, #tpu.memory_space<vmem>>, vector<1x8x128xbf16>
    %142 = vector.shape_cast %141 : vector<1x8x128xbf16> to vector<8x128xbf16>
    %143 = vector.shape_cast %140 : vector<8x128xbf16> to vector<1x8x128xbf16>
    tpu.vector_store %arg5[%c7_124, %c0_125, %c0_126], %143 {strides = array<i32>} : memref<16x8x128xbf16, #tpu.memory_space<vmem>>, vector<1x8x128xbf16>,
    %c16 = arith.constant 16 : index
    %c0_127 = arith.constant 0 : index
    %c0_128 = arith.constant 0 : index
    %144 = vector.load %arg1[%c16, %c0_127, %c0_128] : memref<32x8x256xbf16, #tpu.memory_space<vmem>>, vector<1x8x256xbf16>
    %145 = vector.shape_cast %144 : vector<1x8x256xbf16> to vector<8x256xbf16>
    %c0_129 = arith.constant 0 : index
    %c0_130 = arith.constant 0 : index
    %146 = vector.load %arg2[%c0_129, %c0_130] : memref<256x128xbf16, #tpu.memory_space<vmem>>, vector<256x128xbf16>
    %cst_131 = arith.constant dense<0.000000e+00> : vector<8x128xf32>
    %147 = tpu.matmul %145, %146, %cst_131 {dimension_numbers = #tpu.dot_dimension_numbers<[1], [0], [0], [1], [0, 0, 1, 1], [], []>} : vector<8x256xbf16>, vector<256x128xbf16>, vector<8x128xf32> -> vector<8x128xf32>
    %c17 = arith.constant 17 : index
    %c0_132 = arith.constant 0 : index
    %c0_133 = arith.constant 0 : index
    %148 = vector.load %arg1[%c17, %c0_132, %c0_133] : memref<32x8x256xbf16, #tpu.memory_space<vmem>>, vector<1x8x256xbf16>
    %149 = vector.shape_cast %148 : vector<1x8x256xbf16> to vector<8x256xbf16>
    %c0_134 = arith.constant 0 : index
    %c0_135 = arith.constant 0 : index
    %150 = vector.load %arg3[%c0_134, %c0_135] : memref<256x128xbf16, #tpu.memory_space<vmem>>, vector<256x128xbf16>
    %cst_136 = arith.constant dense<0.000000e+00> : vector<8x128xf32>
    %151 = tpu.matmul %149, %150, %cst_136 {dimension_numbers = #tpu.dot_dimension_numbers<[1], [0], [0], [1], [0, 0, 1, 1], [], []>} : vector<8x256xbf16>, vector<256x128xbf16>, vector<8x128xf32> -> vector<8x128xf32>
    %152 = arith.addf %147, %151 : vector<8x128xf32>
    %c0_137 = arith.constant 0 : index
    %c0_138 = arith.constant 0 : index
    %153 = vector.load %arg4[%c0_137, %c0_138] : memref<1x128xf32, #tpu.memory_space<vmem>>, vector<1x128xf32>
    %154 = vector.broadcast %153 : vector<1x128xf32> to vector<8x128xf32>
    %155 = arith.addf %152, %154 : vector<8x128xf32>
    %cst_139 = arith.constant 0.000000e+00 : f32
    %156 = vector.broadcast %cst_139 : f32 to vector<8x128xf32>
    %157 = arith.maximumf %155, %156 : vector<8x128xf32>
    %158 = arith.truncf %157 : vector<8x128xf32> to vector<8x128xbf16>
    %c8_140 = arith.constant 8 : index
    %c0_141 = arith.constant 0 : index
    %c0_142 = arith.constant 0 : index
    %159 = vector.load %arg5[%c8_140, %c0_141, %c0_142] : memref<16x8x128xbf16, #tpu.memory_space<vmem>>, vector<1x8x128xbf16>
    %160 = vector.shape_cast %159 : vector<1x8x128xbf16> to vector<8x128xbf16>
    %161 = vector.shape_cast %158 : vector<8x128xbf16> to vector<1x8x128xbf16>
    tpu.vector_store %arg5[%c8_140, %c0_141, %c0_142], %161 {strides = array<i32>} : memref<16x8x128xbf16, #tpu.memory_space<vmem>>, vector<1x8x128xbf16>,
    %c18 = arith.constant 18 : index
    %c0_143 = arith.constant 0 : index
    %c0_144 = arith.constant 0 : index
    %162 = vector.load %arg1[%c18, %c0_143, %c0_144] : memref<32x8x256xbf16, #tpu.memory_space<vmem>>, vector<1x8x256xbf16>
    %163 = vector.shape_cast %162 : vector<1x8x256xbf16> to vector<8x256xbf16>
    %c0_145 = arith.constant 0 : index
    %c0_146 = arith.constant 0 : index
    %164 = vector.load %arg2[%c0_145, %c0_146] : memref<256x128xbf16, #tpu.memory_space<vmem>>, vector<256x128xbf16>
    %cst_147 = arith.constant dense<0.000000e+00> : vector<8x128xf32>
    %165 = tpu.matmul %163, %164, %cst_147 {dimension_numbers = #tpu.dot_dimension_numbers<[1], [0], [0], [1], [0, 0, 1, 1], [], []>} : vector<8x256xbf16>, vector<256x128xbf16>, vector<8x128xf32> -> vector<8x128xf32>
    %c19 = arith.constant 19 : index
    %c0_148 = arith.constant 0 : index
    %c0_149 = arith.constant 0 : index
    %166 = vector.load %arg1[%c19, %c0_148, %c0_149] : memref<32x8x256xbf16, #tpu.memory_space<vmem>>, vector<1x8x256xbf16>
    %167 = vector.shape_cast %166 : vector<1x8x256xbf16> to vector<8x256xbf16>
    %c0_150 = arith.constant 0 : index
    %c0_151 = arith.constant 0 : index
    %168 = vector.load %arg3[%c0_150, %c0_151] : memref<256x128xbf16, #tpu.memory_space<vmem>>, vector<256x128xbf16>
    %cst_152 = arith.constant dense<0.000000e+00> : vector<8x128xf32>
    %169 = tpu.matmul %167, %168, %cst_152 {dimension_numbers = #tpu.dot_dimension_numbers<[1], [0], [0], [1], [0, 0, 1, 1], [], []>} : vector<8x256xbf16>, vector<256x128xbf16>, vector<8x128xf32> -> vector<8x128xf32>
    %170 = arith.addf %165, %169 : vector<8x128xf32>
    %c0_153 = arith.constant 0 : index
    %c0_154 = arith.constant 0 : index
    %171 = vector.load %arg4[%c0_153, %c0_154] : memref<1x128xf32, #tpu.memory_space<vmem>>, vector<1x128xf32>
    %172 = vector.broadcast %171 : vector<1x128xf32> to vector<8x128xf32>
    %173 = arith.addf %170, %172 : vector<8x128xf32>
    %cst_155 = arith.constant 0.000000e+00 : f32
    %174 = vector.broadcast %cst_155 : f32 to vector<8x128xf32>
    %175 = arith.maximumf %173, %174 : vector<8x128xf32>
    %176 = arith.truncf %175 : vector<8x128xf32> to vector<8x128xbf16>
    %c9_156 = arith.constant 9 : index
    %c0_157 = arith.constant 0 : index
    %c0_158 = arith.constant 0 : index
    %177 = vector.load %arg5[%c9_156, %c0_157, %c0_158] : memref<16x8x128xbf16, #tpu.memory_space<vmem>>, vector<1x8x128xbf16>
    %178 = vector.shape_cast %177 : vector<1x8x128xbf16> to vector<8x128xbf16>
    %179 = vector.shape_cast %176 : vector<8x128xbf16> to vector<1x8x128xbf16>
    tpu.vector_store %arg5[%c9_156, %c0_157, %c0_158], %179 {strides = array<i32>} : memref<16x8x128xbf16, #tpu.memory_space<vmem>>, vector<1x8x128xbf16>,
    %c20 = arith.constant 20 : index
    %c0_159 = arith.constant 0 : index
    %c0_160 = arith.constant 0 : index
    %180 = vector.load %arg1[%c20, %c0_159, %c0_160] : memref<32x8x256xbf16, #tpu.memory_space<vmem>>, vector<1x8x256xbf16>
    %181 = vector.shape_cast %180 : vector<1x8x256xbf16> to vector<8x256xbf16>
    %c0_161 = arith.constant 0 : index
    %c0_162 = arith.constant 0 : index
    %182 = vector.load %arg2[%c0_161, %c0_162] : memref<256x128xbf16, #tpu.memory_space<vmem>>, vector<256x128xbf16>
    %cst_163 = arith.constant dense<0.000000e+00> : vector<8x128xf32>
    %183 = tpu.matmul %181, %182, %cst_163 {dimension_numbers = #tpu.dot_dimension_numbers<[1], [0], [0], [1], [0, 0, 1, 1], [], []>} : vector<8x256xbf16>, vector<256x128xbf16>, vector<8x128xf32> -> vector<8x128xf32>
    %c21 = arith.constant 21 : index
    %c0_164 = arith.constant 0 : index
    %c0_165 = arith.constant 0 : index
    %184 = vector.load %arg1[%c21, %c0_164, %c0_165] : memref<32x8x256xbf16, #tpu.memory_space<vmem>>, vector<1x8x256xbf16>
    %185 = vector.shape_cast %184 : vector<1x8x256xbf16> to vector<8x256xbf16>
    %c0_166 = arith.constant 0 : index
    %c0_167 = arith.constant 0 : index
    %186 = vector.load %arg3[%c0_166, %c0_167] : memref<256x128xbf16, #tpu.memory_space<vmem>>, vector<256x128xbf16>
    %cst_168 = arith.constant dense<0.000000e+00> : vector<8x128xf32>
    %187 = tpu.matmul %185, %186, %cst_168 {dimension_numbers = #tpu.dot_dimension_numbers<[1], [0], [0], [1], [0, 0, 1, 1], [], []>} : vector<8x256xbf16>, vector<256x128xbf16>, vector<8x128xf32> -> vector<8x128xf32>
    %188 = arith.addf %183, %187 : vector<8x128xf32>
    %c0_169 = arith.constant 0 : index
    %c0_170 = arith.constant 0 : index
    %189 = vector.load %arg4[%c0_169, %c0_170] : memref<1x128xf32, #tpu.memory_space<vmem>>, vector<1x128xf32>
    %190 = vector.broadcast %189 : vector<1x128xf32> to vector<8x128xf32>
    %191 = arith.addf %188, %190 : vector<8x128xf32>
    %cst_171 = arith.constant 0.000000e+00 : f32
    %192 = vector.broadcast %cst_171 : f32 to vector<8x128xf32>
    %193 = arith.maximumf %191, %192 : vector<8x128xf32>
    %194 = arith.truncf %193 : vector<8x128xf32> to vector<8x128xbf16>
    %c10_172 = arith.constant 10 : index
    %c0_173 = arith.constant 0 : index
    %c0_174 = arith.constant 0 : index
    %195 = vector.load %arg5[%c10_172, %c0_173, %c0_174] : memref<16x8x128xbf16, #tpu.memory_space<vmem>>, vector<1x8x128xbf16>
    %196 = vector.shape_cast %195 : vector<1x8x128xbf16> to vector<8x128xbf16>
    %197 = vector.shape_cast %194 : vector<8x128xbf16> to vector<1x8x128xbf16>
    tpu.vector_store %arg5[%c10_172, %c0_173, %c0_174], %197 {strides = array<i32>} : memref<16x8x128xbf16, #tpu.memory_space<vmem>>, vector<1x8x128xbf16>,
    %c22 = arith.constant 22 : index
    %c0_175 = arith.constant 0 : index
    %c0_176 = arith.constant 0 : index
    %198 = vector.load %arg1[%c22, %c0_175, %c0_176] : memref<32x8x256xbf16, #tpu.memory_space<vmem>>, vector<1x8x256xbf16>
    %199 = vector.shape_cast %198 : vector<1x8x256xbf16> to vector<8x256xbf16>
    %c0_177 = arith.constant 0 : index
    %c0_178 = arith.constant 0 : index
    %200 = vector.load %arg2[%c0_177, %c0_178] : memref<256x128xbf16, #tpu.memory_space<vmem>>, vector<256x128xbf16>
    %cst_179 = arith.constant dense<0.000000e+00> : vector<8x128xf32>
    %201 = tpu.matmul %199, %200, %cst_179 {dimension_numbers = #tpu.dot_dimension_numbers<[1], [0], [0], [1], [0, 0, 1, 1], [], []>} : vector<8x256xbf16>, vector<256x128xbf16>, vector<8x128xf32> -> vector<8x128xf32>
    %c23 = arith.constant 23 : index
    %c0_180 = arith.constant 0 : index
    %c0_181 = arith.constant 0 : index
    %202 = vector.load %arg1[%c23, %c0_180, %c0_181] : memref<32x8x256xbf16, #tpu.memory_space<vmem>>, vector<1x8x256xbf16>
    %203 = vector.shape_cast %202 : vector<1x8x256xbf16> to vector<8x256xbf16>
    %c0_182 = arith.constant 0 : index
    %c0_183 = arith.constant 0 : index
    %204 = vector.load %arg3[%c0_182, %c0_183] : memref<256x128xbf16, #tpu.memory_space<vmem>>, vector<256x128xbf16>
    %cst_184 = arith.constant dense<0.000000e+00> : vector<8x128xf32>
    %205 = tpu.matmul %203, %204, %cst_184 {dimension_numbers = #tpu.dot_dimension_numbers<[1], [0], [0], [1], [0, 0, 1, 1], [], []>} : vector<8x256xbf16>, vector<256x128xbf16>, vector<8x128xf32> -> vector<8x128xf32>
    %206 = arith.addf %201, %205 : vector<8x128xf32>
    %c0_185 = arith.constant 0 : index
    %c0_186 = arith.constant 0 : index
    %207 = vector.load %arg4[%c0_185, %c0_186] : memref<1x128xf32, #tpu.memory_space<vmem>>, vector<1x128xf32>
    %208 = vector.broadcast %207 : vector<1x128xf32> to vector<8x128xf32>
    %209 = arith.addf %206, %208 : vector<8x128xf32>
    %cst_187 = arith.constant 0.000000e+00 : f32
    %210 = vector.broadcast %cst_187 : f32 to vector<8x128xf32>
    %211 = arith.maximumf %209, %210 : vector<8x128xf32>
    %212 = arith.truncf %211 : vector<8x128xf32> to vector<8x128xbf16>
    %c11_188 = arith.constant 11 : index
    %c0_189 = arith.constant 0 : index
    %c0_190 = arith.constant 0 : index
    %213 = vector.load %arg5[%c11_188, %c0_189, %c0_190] : memref<16x8x128xbf16, #tpu.memory_space<vmem>>, vector<1x8x128xbf16>
    %214 = vector.shape_cast %213 : vector<1x8x128xbf16> to vector<8x128xbf16>
    %215 = vector.shape_cast %212 : vector<8x128xbf16> to vector<1x8x128xbf16>
    tpu.vector_store %arg5[%c11_188, %c0_189, %c0_190], %215 {strides = array<i32>} : memref<16x8x128xbf16, #tpu.memory_space<vmem>>, vector<1x8x128xbf16>,
    %c24 = arith.constant 24 : index
    %c0_191 = arith.constant 0 : index
    %c0_192 = arith.constant 0 : index
    %216 = vector.load %arg1[%c24, %c0_191, %c0_192] : memref<32x8x256xbf16, #tpu.memory_space<vmem>>, vector<1x8x256xbf16>
    %217 = vector.shape_cast %216 : vector<1x8x256xbf16> to vector<8x256xbf16>
    %c0_193 = arith.constant 0 : index
    %c0_194 = arith.constant 0 : index
    %218 = vector.load %arg2[%c0_193, %c0_194] : memref<256x128xbf16, #tpu.memory_space<vmem>>, vector<256x128xbf16>
    %cst_195 = arith.constant dense<0.000000e+00> : vector<8x128xf32>
    %219 = tpu.matmul %217, %218, %cst_195 {dimension_numbers = #tpu.dot_dimension_numbers<[1], [0], [0], [1], [0, 0, 1, 1], [], []>} : vector<8x256xbf16>, vector<256x128xbf16>, vector<8x128xf32> -> vector<8x128xf32>
    %c25 = arith.constant 25 : index
    %c0_196 = arith.constant 0 : index
    %c0_197 = arith.constant 0 : index
    %220 = vector.load %arg1[%c25, %c0_196, %c0_197] : memref<32x8x256xbf16, #tpu.memory_space<vmem>>, vector<1x8x256xbf16>
    %221 = vector.shape_cast %220 : vector<1x8x256xbf16> to vector<8x256xbf16>
    %c0_198 = arith.constant 0 : index
    %c0_199 = arith.constant 0 : index
    %222 = vector.load %arg3[%c0_198, %c0_199] : memref<256x128xbf16, #tpu.memory_space<vmem>>, vector<256x128xbf16>
    %cst_200 = arith.constant dense<0.000000e+00> : vector<8x128xf32>
    %223 = tpu.matmul %221, %222, %cst_200 {dimension_numbers = #tpu.dot_dimension_numbers<[1], [0], [0], [1], [0, 0, 1, 1], [], []>} : vector<8x256xbf16>, vector<256x128xbf16>, vector<8x128xf32> -> vector<8x128xf32>
    %224 = arith.addf %219, %223 : vector<8x128xf32>
    %c0_201 = arith.constant 0 : index
    %c0_202 = arith.constant 0 : index
    %225 = vector.load %arg4[%c0_201, %c0_202] : memref<1x128xf32, #tpu.memory_space<vmem>>, vector<1x128xf32>
    %226 = vector.broadcast %225 : vector<1x128xf32> to vector<8x128xf32>
    %227 = arith.addf %224, %226 : vector<8x128xf32>
    %cst_203 = arith.constant 0.000000e+00 : f32
    %228 = vector.broadcast %cst_203 : f32 to vector<8x128xf32>
    %229 = arith.maximumf %227, %228 : vector<8x128xf32>
    %230 = arith.truncf %229 : vector<8x128xf32> to vector<8x128xbf16>
    %c12_204 = arith.constant 12 : index
    %c0_205 = arith.constant 0 : index
    %c0_206 = arith.constant 0 : index
    %231 = vector.load %arg5[%c12_204, %c0_205, %c0_206] : memref<16x8x128xbf16, #tpu.memory_space<vmem>>, vector<1x8x128xbf16>
    %232 = vector.shape_cast %231 : vector<1x8x128xbf16> to vector<8x128xbf16>
    %233 = vector.shape_cast %230 : vector<8x128xbf16> to vector<1x8x128xbf16>
    tpu.vector_store %arg5[%c12_204, %c0_205, %c0_206], %233 {strides = array<i32>} : memref<16x8x128xbf16, #tpu.memory_space<vmem>>, vector<1x8x128xbf16>,
    %c26 = arith.constant 26 : index
    %c0_207 = arith.constant 0 : index
    %c0_208 = arith.constant 0 : index
    %234 = vector.load %arg1[%c26, %c0_207, %c0_208] : memref<32x8x256xbf16, #tpu.memory_space<vmem>>, vector<1x8x256xbf16>
    %235 = vector.shape_cast %234 : vector<1x8x256xbf16> to vector<8x256xbf16>
    %c0_209 = arith.constant 0 : index
    %c0_210 = arith.constant 0 : index
    %236 = vector.load %arg2[%c0_209, %c0_210] : memref<256x128xbf16, #tpu.memory_space<vmem>>, vector<256x128xbf16>
    %cst_211 = arith.constant dense<0.000000e+00> : vector<8x128xf32>
    %237 = tpu.matmul %235, %236, %cst_211 {dimension_numbers = #tpu.dot_dimension_numbers<[1], [0], [0], [1], [0, 0, 1, 1], [], []>} : vector<8x256xbf16>, vector<256x128xbf16>, vector<8x128xf32> -> vector<8x128xf32>
    %c27 = arith.constant 27 : index
    %c0_212 = arith.constant 0 : index
    %c0_213 = arith.constant 0 : index
    %238 = vector.load %arg1[%c27, %c0_212, %c0_213] : memref<32x8x256xbf16, #tpu.memory_space<vmem>>, vector<1x8x256xbf16>
    %239 = vector.shape_cast %238 : vector<1x8x256xbf16> to vector<8x256xbf16>
    %c0_214 = arith.constant 0 : index
    %c0_215 = arith.constant 0 : index
    %240 = vector.load %arg3[%c0_214, %c0_215] : memref<256x128xbf16, #tpu.memory_space<vmem>>, vector<256x128xbf16>
    %cst_216 = arith.constant dense<0.000000e+00> : vector<8x128xf32>
    %241 = tpu.matmul %239, %240, %cst_216 {dimension_numbers = #tpu.dot_dimension_numbers<[1], [0], [0], [1], [0, 0, 1, 1], [], []>} : vector<8x256xbf16>, vector<256x128xbf16>, vector<8x128xf32> -> vector<8x128xf32>
    %242 = arith.addf %237, %241 : vector<8x128xf32>
    %c0_217 = arith.constant 0 : index
    %c0_218 = arith.constant 0 : index
    %243 = vector.load %arg4[%c0_217, %c0_218] : memref<1x128xf32, #tpu.memory_space<vmem>>, vector<1x128xf32>
    %244 = vector.broadcast %243 : vector<1x128xf32> to vector<8x128xf32>
    %245 = arith.addf %242, %244 : vector<8x128xf32>
    %cst_219 = arith.constant 0.000000e+00 : f32
    %246 = vector.broadcast %cst_219 : f32 to vector<8x128xf32>
    %247 = arith.maximumf %245, %246 : vector<8x128xf32>
    %248 = arith.truncf %247 : vector<8x128xf32> to vector<8x128xbf16>
    %c13_220 = arith.constant 13 : index
    %c0_221 = arith.constant 0 : index
    %c0_222 = arith.constant 0 : index
    %249 = vector.load %arg5[%c13_220, %c0_221, %c0_222] : memref<16x8x128xbf16, #tpu.memory_space<vmem>>, vector<1x8x128xbf16>
    %250 = vector.shape_cast %249 : vector<1x8x128xbf16> to vector<8x128xbf16>
    %251 = vector.shape_cast %248 : vector<8x128xbf16> to vector<1x8x128xbf16>
    tpu.vector_store %arg5[%c13_220, %c0_221, %c0_222], %251 {strides = array<i32>} : memref<16x8x128xbf16, #tpu.memory_space<vmem>>, vector<1x8x128xbf16>,
    %c28 = arith.constant 28 : index
    %c0_223 = arith.constant 0 : index
    %c0_224 = arith.constant 0 : index
    %252 = vector.load %arg1[%c28, %c0_223, %c0_224] : memref<32x8x256xbf16, #tpu.memory_space<vmem>>, vector<1x8x256xbf16>
    %253 = vector.shape_cast %252 : vector<1x8x256xbf16> to vector<8x256xbf16>
    %c0_225 = arith.constant 0 : index
    %c0_226 = arith.constant 0 : index
    %254 = vector.load %arg2[%c0_225, %c0_226] : memref<256x128xbf16, #tpu.memory_space<vmem>>, vector<256x128xbf16>
    %cst_227 = arith.constant dense<0.000000e+00> : vector<8x128xf32>
    %255 = tpu.matmul %253, %254, %cst_227 {dimension_numbers = #tpu.dot_dimension_numbers<[1], [0], [0], [1], [0, 0, 1, 1], [], []>} : vector<8x256xbf16>, vector<256x128xbf16>, vector<8x128xf32> -> vector<8x128xf32>
    %c29 = arith.constant 29 : index
    %c0_228 = arith.constant 0 : index
    %c0_229 = arith.constant 0 : index
    %256 = vector.load %arg1[%c29, %c0_228, %c0_229] : memref<32x8x256xbf16, #tpu.memory_space<vmem>>, vector<1x8x256xbf16>
    %257 = vector.shape_cast %256 : vector<1x8x256xbf16> to vector<8x256xbf16>
    %c0_230 = arith.constant 0 : index
    %c0_231 = arith.constant 0 : index
    %258 = vector.load %arg3[%c0_230, %c0_231] : memref<256x128xbf16, #tpu.memory_space<vmem>>, vector<256x128xbf16>
    %cst_232 = arith.constant dense<0.000000e+00> : vector<8x128xf32>
    %259 = tpu.matmul %257, %258, %cst_232 {dimension_numbers = #tpu.dot_dimension_numbers<[1], [0], [0], [1], [0, 0, 1, 1], [], []>} : vector<8x256xbf16>, vector<256x128xbf16>, vector<8x128xf32> -> vector<8x128xf32>
    %260 = arith.addf %255, %259 : vector<8x128xf32>
    %c0_233 = arith.constant 0 : index
    %c0_234 = arith.constant 0 : index
    %261 = vector.load %arg4[%c0_233, %c0_234] : memref<1x128xf32, #tpu.memory_space<vmem>>, vector<1x128xf32>
    %262 = vector.broadcast %261 : vector<1x128xf32> to vector<8x128xf32>
    %263 = arith.addf %260, %262 : vector<8x128xf32>
    %cst_235 = arith.constant 0.000000e+00 : f32
    %264 = vector.broadcast %cst_235 : f32 to vector<8x128xf32>
    %265 = arith.maximumf %263, %264 : vector<8x128xf32>
    %266 = arith.truncf %265 : vector<8x128xf32> to vector<8x128xbf16>
    %c14_236 = arith.constant 14 : index
    %c0_237 = arith.constant 0 : index
    %c0_238 = arith.constant 0 : index
    %267 = vector.load %arg5[%c14_236, %c0_237, %c0_238] : memref<16x8x128xbf16, #tpu.memory_space<vmem>>, vector<1x8x128xbf16>
    %268 = vector.shape_cast %267 : vector<1x8x128xbf16> to vector<8x128xbf16>
    %269 = vector.shape_cast %266 : vector<8x128xbf16> to vector<1x8x128xbf16>
    tpu.vector_store %arg5[%c14_236, %c0_237, %c0_238], %269 {strides = array<i32>} : memref<16x8x128xbf16, #tpu.memory_space<vmem>>, vector<1x8x128xbf16>,
    %c30 = arith.constant 30 : index
    %c0_239 = arith.constant 0 : index
    %c0_240 = arith.constant 0 : index
    %270 = vector.load %arg1[%c30, %c0_239, %c0_240] : memref<32x8x256xbf16, #tpu.memory_space<vmem>>, vector<1x8x256xbf16>
    %271 = vector.shape_cast %270 : vector<1x8x256xbf16> to vector<8x256xbf16>
    %c0_241 = arith.constant 0 : index
    %c0_242 = arith.constant 0 : index
    %272 = vector.load %arg2[%c0_241, %c0_242] : memref<256x128xbf16, #tpu.memory_space<vmem>>, vector<256x128xbf16>
    %cst_243 = arith.constant dense<0.000000e+00> : vector<8x128xf32>
    %273 = tpu.matmul %271, %272, %cst_243 {dimension_numbers = #tpu.dot_dimension_numbers<[1], [0], [0], [1], [0, 0, 1, 1], [], []>} : vector<8x256xbf16>, vector<256x128xbf16>, vector<8x128xf32> -> vector<8x128xf32>
    %c31 = arith.constant 31 : index
    %c0_244 = arith.constant 0 : index
    %c0_245 = arith.constant 0 : index
    %274 = vector.load %arg1[%c31, %c0_244, %c0_245] : memref<32x8x256xbf16, #tpu.memory_space<vmem>>, vector<1x8x256xbf16>
    %275 = vector.shape_cast %274 : vector<1x8x256xbf16> to vector<8x256xbf16>
    %c0_246 = arith.constant 0 : index
    %c0_247 = arith.constant 0 : index
    %276 = vector.load %arg3[%c0_246, %c0_247] : memref<256x128xbf16, #tpu.memory_space<vmem>>, vector<256x128xbf16>
    %cst_248 = arith.constant dense<0.000000e+00> : vector<8x128xf32>
    %277 = tpu.matmul %275, %276, %cst_248 {dimension_numbers = #tpu.dot_dimension_numbers<[1], [0], [0], [1], [0, 0, 1, 1], [], []>} : vector<8x256xbf16>, vector<256x128xbf16>, vector<8x128xf32> -> vector<8x128xf32>
    %278 = arith.addf %273, %277 : vector<8x128xf32>
    %c0_249 = arith.constant 0 : index
    %c0_250 = arith.constant 0 : index
    %279 = vector.load %arg4[%c0_249, %c0_250] : memref<1x128xf32, #tpu.memory_space<vmem>>, vector<1x128xf32>
    %280 = vector.broadcast %279 : vector<1x128xf32> to vector<8x128xf32>
    %281 = arith.addf %278, %280 : vector<8x128xf32>
    %cst_251 = arith.constant 0.000000e+00 : f32
    %282 = vector.broadcast %cst_251 : f32 to vector<8x128xf32>
    %283 = arith.maximumf %281, %282 : vector<8x128xf32>
    %284 = arith.truncf %283 : vector<8x128xf32> to vector<8x128xbf16>
    %c15_252 = arith.constant 15 : index
    %c0_253 = arith.constant 0 : index
    %c0_254 = arith.constant 0 : index
    %285 = vector.load %arg5[%c15_252, %c0_253, %c0_254] : memref<16x8x128xbf16, #tpu.memory_space<vmem>>, vector<1x8x128xbf16>
    %286 = vector.shape_cast %285 : vector<1x8x128xbf16> to vector<8x128xbf16>
    %287 = vector.shape_cast %284 : vector<8x128xbf16> to vector<1x8x128xbf16>
    tpu.vector_store %arg5[%c15_252, %c0_253, %c0_254], %287 {strides = array<i32>} : memref<16x8x128xbf16, #tpu.memory_space<vmem>>, vector<1x8x128xbf16>,
    return
  }
  func.func @transform_0(%arg0: i32) -> (i32, i32, i32) {
    %c0_i32 = arith.constant 0 : i32
    %c0_i32_0 = arith.constant 0 : i32
    %c0_i32_1 = arith.constant 0 : i32
    return %arg0, %c0_i32, %c0_i32_0 : i32, i32, i32
  }
  func.func @transform_1(%arg0: i32) -> (i32, i32) {
    %c0_i32 = arith.constant 0 : i32
    %c0_i32_0 = arith.constant 0 : i32
    %c0_i32_1 = arith.constant 0 : i32
    return %c0_i32, %c0_i32_0 : i32, i32
  }
  func.func @transform_2(%arg0: i32) -> (i32, i32) {
    %c0_i32 = arith.constant 0 : i32
    %c0_i32_0 = arith.constant 0 : i32
    %c0_i32_1 = arith.constant 0 : i32
    return %c0_i32, %c0_i32_0 : i32, i32
  }
  func.func @transform_3(%arg0: i32) -> (i32, i32) {
    %c0_i32 = arith.constant 0 : i32
    %c0_i32_0 = arith.constant 0 : i32
    %c0_i32_1 = arith.constant 0 : i32
    return %c0_i32, %c0_i32_0 : i32, i32
  }
  func.func @transform_4(%arg0: i32) -> (i32, i32, i32) {
    %c0_i32 = arith.constant 0 : i32
    %c0_i32_0 = arith.constant 0 : i32
    %c0_i32_1 = arith.constant 0 : i32
    return %arg0, %c0_i32, %c0_i32_0 : i32, i32, i32
  }
}

module attributes {stable_mosaic.version = 11 : i64} {
  func.func @_mask_resize_kernel(%arg0: i32, %arg1: memref<1x16x16xf32, #tpu.memory_space<vmem>>, %arg2: memref<16x2xf32, #tpu.memory_space<vmem>>, %arg3: memref<1x2x2xf32, #tpu.memory_space<vmem>>) attributes {dimension_semantics = [#tpu.dimension_semantics<parallel>], iteration_bounds = array<i64: 2>, scalar_prefetch = 0 : i64, scratch_operands = 0 : i64, tpu.core_type = #tpu.core_type<tc>, window_params = [{transform_indices = @transform_0, window_bounds = array<i64: 1, 16, 16>}, {pipeline_mode = #tpu.pipeline_mode<synchronous>, transform_indices = @transform_1, window_bounds = array<i64: 16, 2>}, {transform_indices = @transform_2, window_bounds = array<i64: 1, 2, 2>}]} {
    %c0 = arith.constant 0 : index
    %c0_0 = arith.constant 0 : index
    %c0_1 = arith.constant 0 : index
    %0 = vector.load %arg1[%c0, %c0_0, %c0_1] : memref<1x16x16xf32, #tpu.memory_space<vmem>>, vector<1x1x16xf32>
    %1 = vector.shape_cast %0 : vector<1x1x16xf32> to vector<1x16xf32>
    %c0_2 = arith.constant 0 : index
    %c0_3 = arith.constant 0 : index
    %2 = vector.load %arg2[%c0_2, %c0_3] : memref<16x2xf32, #tpu.memory_space<vmem>>, vector<16x2xf32>
    %cst = arith.constant dense<0.000000e+00> : vector<1x2xf32>
    %3 = tpu.matmul %1, %2, %cst {dimension_numbers = #tpu.dot_dimension_numbers<[1], [0], [0], [1], [0, 0, 1, 1], [], []>} : vector<1x16xf32>, vector<16x2xf32>, vector<1x2xf32> -> vector<1x2xf32>
    %c0_4 = arith.constant 0 : index
    %c0_5 = arith.constant 0 : index
    %c0_6 = arith.constant 0 : index
    %4 = vector.load %arg3[%c0_4, %c0_5, %c0_6] : memref<1x2x2xf32, #tpu.memory_space<vmem>>, vector<1x1x2xf32>
    %5 = vector.shape_cast %4 : vector<1x1x2xf32> to vector<1x2xf32>
    %6 = vector.shape_cast %3 : vector<1x2xf32> to vector<1x1x2xf32>
    tpu.vector_store %arg3[%c0_4, %c0_5, %c0_6], %6 {strides = array<i32>} : memref<1x2x2xf32, #tpu.memory_space<vmem>>, vector<1x1x2xf32>,
    %c0_7 = arith.constant 0 : index
    %c8 = arith.constant 8 : index
    %c0_8 = arith.constant 0 : index
    %7 = vector.load %arg1[%c0_7, %c8, %c0_8] : memref<1x16x16xf32, #tpu.memory_space<vmem>>, vector<1x1x16xf32>
    %8 = vector.shape_cast %7 : vector<1x1x16xf32> to vector<1x16xf32>
    %c0_9 = arith.constant 0 : index
    %c0_10 = arith.constant 0 : index
    %9 = vector.load %arg2[%c0_9, %c0_10] : memref<16x2xf32, #tpu.memory_space<vmem>>, vector<16x2xf32>
    %cst_11 = arith.constant dense<0.000000e+00> : vector<1x2xf32>
    %10 = tpu.matmul %8, %9, %cst_11 {dimension_numbers = #tpu.dot_dimension_numbers<[1], [0], [0], [1], [0, 0, 1, 1], [], []>} : vector<1x16xf32>, vector<16x2xf32>, vector<1x2xf32> -> vector<1x2xf32>
    %c0_12 = arith.constant 0 : index
    %c1 = arith.constant 1 : index
    %c0_13 = arith.constant 0 : index
    %11 = vector.load %arg3[%c0_12, %c1, %c0_13] : memref<1x2x2xf32, #tpu.memory_space<vmem>>, vector<1x1x2xf32>
    %12 = vector.shape_cast %11 : vector<1x1x2xf32> to vector<1x2xf32>
    %13 = vector.shape_cast %10 : vector<1x2xf32> to vector<1x1x2xf32>
    tpu.vector_store %arg3[%c0_12, %c1, %c0_13], %13 {strides = array<i32>} : memref<1x2x2xf32, #tpu.memory_space<vmem>>, vector<1x1x2xf32>,
    return
  }
  func.func @transform_0(%arg0: i32) -> (i32, i32, i32) {
    %c0_i32 = arith.constant 0 : i32
    %c0_i32_0 = arith.constant 0 : i32
    %c0_i32_1 = arith.constant 0 : i32
    return %arg0, %c0_i32, %c0_i32_0 : i32, i32, i32
  }
  func.func @transform_1(%arg0: i32) -> (i32, i32) {
    %c0_i32 = arith.constant 0 : i32
    %c0_i32_0 = arith.constant 0 : i32
    %c0_i32_1 = arith.constant 0 : i32
    return %c0_i32, %c0_i32_0 : i32, i32
  }
  func.func @transform_2(%arg0: i32) -> (i32, i32, i32) {
    %c0_i32 = arith.constant 0 : i32
    %c0_i32_0 = arith.constant 0 : i32
    %c0_i32_1 = arith.constant 0 : i32
    return %arg0, %c0_i32, %c0_i32_0 : i32, i32, i32
  }
}

module attributes {stable_mosaic.version = 11 : i64} {
  func.func @_conv2x2_bias_relu_kernel(%arg0: i32, %arg1: memref<16x4x256xbf16, #tpu.memory_space<vmem>>, %arg2: memref<256x128xbf16, #tpu.memory_space<vmem>>, %arg3: memref<256x128xbf16, #tpu.memory_space<vmem>>, %arg4: memref<1x128xf32, #tpu.memory_space<vmem>>, %arg5: memref<8x4x128xbf16, #tpu.memory_space<vmem>>) attributes {dimension_semantics = [#tpu.dimension_semantics<parallel>], iteration_bounds = array<i64: 1>, scalar_prefetch = 0 : i64, scratch_operands = 0 : i64, tpu.core_type = #tpu.core_type<tc>, window_params = [{transform_indices = @transform_0, window_bounds = array<i64: 16, 4, 256>}, {pipeline_mode = #tpu.pipeline_mode<synchronous>, transform_indices = @transform_1, window_bounds = array<i64: 256, 128>}, {pipeline_mode = #tpu.pipeline_mode<synchronous>, transform_indices = @transform_2, window_bounds = array<i64: 256, 128>}, {pipeline_mode = #tpu.pipeline_mode<synchronous>, transform_indices = @transform_3, window_bounds = array<i64: 1, 128>}, {transform_indices = @transform_4, window_bounds = array<i64: 8, 4, 128>}]} {
    %c0 = arith.constant 0 : index
    %c0_0 = arith.constant 0 : index
    %c0_1 = arith.constant 0 : index
    %0 = vector.load %arg1[%c0, %c0_0, %c0_1] : memref<16x4x256xbf16, #tpu.memory_space<vmem>>, vector<1x4x256xbf16>
    %1 = vector.shape_cast %0 : vector<1x4x256xbf16> to vector<4x256xbf16>
    %c0_2 = arith.constant 0 : index
    %c0_3 = arith.constant 0 : index
    %2 = vector.load %arg2[%c0_2, %c0_3] : memref<256x128xbf16, #tpu.memory_space<vmem>>, vector<256x128xbf16>
    %cst = arith.constant dense<0.000000e+00> : vector<4x128xf32>
    %3 = tpu.matmul %1, %2, %cst {dimension_numbers = #tpu.dot_dimension_numbers<[1], [0], [0], [1], [0, 0, 1, 1], [], []>} : vector<4x256xbf16>, vector<256x128xbf16>, vector<4x128xf32> -> vector<4x128xf32>
    %c1 = arith.constant 1 : index
    %c0_4 = arith.constant 0 : index
    %c0_5 = arith.constant 0 : index
    %4 = vector.load %arg1[%c1, %c0_4, %c0_5] : memref<16x4x256xbf16, #tpu.memory_space<vmem>>, vector<1x4x256xbf16>
    %5 = vector.shape_cast %4 : vector<1x4x256xbf16> to vector<4x256xbf16>
    %c0_6 = arith.constant 0 : index
    %c0_7 = arith.constant 0 : index
    %6 = vector.load %arg3[%c0_6, %c0_7] : memref<256x128xbf16, #tpu.memory_space<vmem>>, vector<256x128xbf16>
    %cst_8 = arith.constant dense<0.000000e+00> : vector<4x128xf32>
    %7 = tpu.matmul %5, %6, %cst_8 {dimension_numbers = #tpu.dot_dimension_numbers<[1], [0], [0], [1], [0, 0, 1, 1], [], []>} : vector<4x256xbf16>, vector<256x128xbf16>, vector<4x128xf32> -> vector<4x128xf32>
    %8 = arith.addf %3, %7 : vector<4x128xf32>
    %c0_9 = arith.constant 0 : index
    %c0_10 = arith.constant 0 : index
    %9 = vector.load %arg4[%c0_9, %c0_10] : memref<1x128xf32, #tpu.memory_space<vmem>>, vector<1x128xf32>
    %10 = vector.broadcast %9 : vector<1x128xf32> to vector<4x128xf32>
    %11 = arith.addf %8, %10 : vector<4x128xf32>
    %cst_11 = arith.constant 0.000000e+00 : f32
    %12 = vector.broadcast %cst_11 : f32 to vector<4x128xf32>
    %13 = arith.maximumf %11, %12 : vector<4x128xf32>
    %14 = arith.truncf %13 : vector<4x128xf32> to vector<4x128xbf16>
    %c0_12 = arith.constant 0 : index
    %c0_13 = arith.constant 0 : index
    %c0_14 = arith.constant 0 : index
    %15 = vector.load %arg5[%c0_12, %c0_13, %c0_14] : memref<8x4x128xbf16, #tpu.memory_space<vmem>>, vector<1x4x128xbf16>
    %16 = vector.shape_cast %15 : vector<1x4x128xbf16> to vector<4x128xbf16>
    %17 = vector.shape_cast %14 : vector<4x128xbf16> to vector<1x4x128xbf16>
    tpu.vector_store %arg5[%c0_12, %c0_13, %c0_14], %17 {strides = array<i32>} : memref<8x4x128xbf16, #tpu.memory_space<vmem>>, vector<1x4x128xbf16>,
    %c2 = arith.constant 2 : index
    %c0_15 = arith.constant 0 : index
    %c0_16 = arith.constant 0 : index
    %18 = vector.load %arg1[%c2, %c0_15, %c0_16] : memref<16x4x256xbf16, #tpu.memory_space<vmem>>, vector<1x4x256xbf16>
    %19 = vector.shape_cast %18 : vector<1x4x256xbf16> to vector<4x256xbf16>
    %c0_17 = arith.constant 0 : index
    %c0_18 = arith.constant 0 : index
    %20 = vector.load %arg2[%c0_17, %c0_18] : memref<256x128xbf16, #tpu.memory_space<vmem>>, vector<256x128xbf16>
    %cst_19 = arith.constant dense<0.000000e+00> : vector<4x128xf32>
    %21 = tpu.matmul %19, %20, %cst_19 {dimension_numbers = #tpu.dot_dimension_numbers<[1], [0], [0], [1], [0, 0, 1, 1], [], []>} : vector<4x256xbf16>, vector<256x128xbf16>, vector<4x128xf32> -> vector<4x128xf32>
    %c3 = arith.constant 3 : index
    %c0_20 = arith.constant 0 : index
    %c0_21 = arith.constant 0 : index
    %22 = vector.load %arg1[%c3, %c0_20, %c0_21] : memref<16x4x256xbf16, #tpu.memory_space<vmem>>, vector<1x4x256xbf16>
    %23 = vector.shape_cast %22 : vector<1x4x256xbf16> to vector<4x256xbf16>
    %c0_22 = arith.constant 0 : index
    %c0_23 = arith.constant 0 : index
    %24 = vector.load %arg3[%c0_22, %c0_23] : memref<256x128xbf16, #tpu.memory_space<vmem>>, vector<256x128xbf16>
    %cst_24 = arith.constant dense<0.000000e+00> : vector<4x128xf32>
    %25 = tpu.matmul %23, %24, %cst_24 {dimension_numbers = #tpu.dot_dimension_numbers<[1], [0], [0], [1], [0, 0, 1, 1], [], []>} : vector<4x256xbf16>, vector<256x128xbf16>, vector<4x128xf32> -> vector<4x128xf32>
    %26 = arith.addf %21, %25 : vector<4x128xf32>
    %c0_25 = arith.constant 0 : index
    %c0_26 = arith.constant 0 : index
    %27 = vector.load %arg4[%c0_25, %c0_26] : memref<1x128xf32, #tpu.memory_space<vmem>>, vector<1x128xf32>
    %28 = vector.broadcast %27 : vector<1x128xf32> to vector<4x128xf32>
    %29 = arith.addf %26, %28 : vector<4x128xf32>
    %cst_27 = arith.constant 0.000000e+00 : f32
    %30 = vector.broadcast %cst_27 : f32 to vector<4x128xf32>
    %31 = arith.maximumf %29, %30 : vector<4x128xf32>
    %32 = arith.truncf %31 : vector<4x128xf32> to vector<4x128xbf16>
    %c1_28 = arith.constant 1 : index
    %c0_29 = arith.constant 0 : index
    %c0_30 = arith.constant 0 : index
    %33 = vector.load %arg5[%c1_28, %c0_29, %c0_30] : memref<8x4x128xbf16, #tpu.memory_space<vmem>>, vector<1x4x128xbf16>
    %34 = vector.shape_cast %33 : vector<1x4x128xbf16> to vector<4x128xbf16>
    %35 = vector.shape_cast %32 : vector<4x128xbf16> to vector<1x4x128xbf16>
    tpu.vector_store %arg5[%c1_28, %c0_29, %c0_30], %35 {strides = array<i32>} : memref<8x4x128xbf16, #tpu.memory_space<vmem>>, vector<1x4x128xbf16>,
    %c4 = arith.constant 4 : index
    %c0_31 = arith.constant 0 : index
    %c0_32 = arith.constant 0 : index
    %36 = vector.load %arg1[%c4, %c0_31, %c0_32] : memref<16x4x256xbf16, #tpu.memory_space<vmem>>, vector<1x4x256xbf16>
    %37 = vector.shape_cast %36 : vector<1x4x256xbf16> to vector<4x256xbf16>
    %c0_33 = arith.constant 0 : index
    %c0_34 = arith.constant 0 : index
    %38 = vector.load %arg2[%c0_33, %c0_34] : memref<256x128xbf16, #tpu.memory_space<vmem>>, vector<256x128xbf16>
    %cst_35 = arith.constant dense<0.000000e+00> : vector<4x128xf32>
    %39 = tpu.matmul %37, %38, %cst_35 {dimension_numbers = #tpu.dot_dimension_numbers<[1], [0], [0], [1], [0, 0, 1, 1], [], []>} : vector<4x256xbf16>, vector<256x128xbf16>, vector<4x128xf32> -> vector<4x128xf32>
    %c5 = arith.constant 5 : index
    %c0_36 = arith.constant 0 : index
    %c0_37 = arith.constant 0 : index
    %40 = vector.load %arg1[%c5, %c0_36, %c0_37] : memref<16x4x256xbf16, #tpu.memory_space<vmem>>, vector<1x4x256xbf16>
    %41 = vector.shape_cast %40 : vector<1x4x256xbf16> to vector<4x256xbf16>
    %c0_38 = arith.constant 0 : index
    %c0_39 = arith.constant 0 : index
    %42 = vector.load %arg3[%c0_38, %c0_39] : memref<256x128xbf16, #tpu.memory_space<vmem>>, vector<256x128xbf16>
    %cst_40 = arith.constant dense<0.000000e+00> : vector<4x128xf32>
    %43 = tpu.matmul %41, %42, %cst_40 {dimension_numbers = #tpu.dot_dimension_numbers<[1], [0], [0], [1], [0, 0, 1, 1], [], []>} : vector<4x256xbf16>, vector<256x128xbf16>, vector<4x128xf32> -> vector<4x128xf32>
    %44 = arith.addf %39, %43 : vector<4x128xf32>
    %c0_41 = arith.constant 0 : index
    %c0_42 = arith.constant 0 : index
    %45 = vector.load %arg4[%c0_41, %c0_42] : memref<1x128xf32, #tpu.memory_space<vmem>>, vector<1x128xf32>
    %46 = vector.broadcast %45 : vector<1x128xf32> to vector<4x128xf32>
    %47 = arith.addf %44, %46 : vector<4x128xf32>
    %cst_43 = arith.constant 0.000000e+00 : f32
    %48 = vector.broadcast %cst_43 : f32 to vector<4x128xf32>
    %49 = arith.maximumf %47, %48 : vector<4x128xf32>
    %50 = arith.truncf %49 : vector<4x128xf32> to vector<4x128xbf16>
    %c2_44 = arith.constant 2 : index
    %c0_45 = arith.constant 0 : index
    %c0_46 = arith.constant 0 : index
    %51 = vector.load %arg5[%c2_44, %c0_45, %c0_46] : memref<8x4x128xbf16, #tpu.memory_space<vmem>>, vector<1x4x128xbf16>
    %52 = vector.shape_cast %51 : vector<1x4x128xbf16> to vector<4x128xbf16>
    %53 = vector.shape_cast %50 : vector<4x128xbf16> to vector<1x4x128xbf16>
    tpu.vector_store %arg5[%c2_44, %c0_45, %c0_46], %53 {strides = array<i32>} : memref<8x4x128xbf16, #tpu.memory_space<vmem>>, vector<1x4x128xbf16>,
    %c6 = arith.constant 6 : index
    %c0_47 = arith.constant 0 : index
    %c0_48 = arith.constant 0 : index
    %54 = vector.load %arg1[%c6, %c0_47, %c0_48] : memref<16x4x256xbf16, #tpu.memory_space<vmem>>, vector<1x4x256xbf16>
    %55 = vector.shape_cast %54 : vector<1x4x256xbf16> to vector<4x256xbf16>
    %c0_49 = arith.constant 0 : index
    %c0_50 = arith.constant 0 : index
    %56 = vector.load %arg2[%c0_49, %c0_50] : memref<256x128xbf16, #tpu.memory_space<vmem>>, vector<256x128xbf16>
    %cst_51 = arith.constant dense<0.000000e+00> : vector<4x128xf32>
    %57 = tpu.matmul %55, %56, %cst_51 {dimension_numbers = #tpu.dot_dimension_numbers<[1], [0], [0], [1], [0, 0, 1, 1], [], []>} : vector<4x256xbf16>, vector<256x128xbf16>, vector<4x128xf32> -> vector<4x128xf32>
    %c7 = arith.constant 7 : index
    %c0_52 = arith.constant 0 : index
    %c0_53 = arith.constant 0 : index
    %58 = vector.load %arg1[%c7, %c0_52, %c0_53] : memref<16x4x256xbf16, #tpu.memory_space<vmem>>, vector<1x4x256xbf16>
    %59 = vector.shape_cast %58 : vector<1x4x256xbf16> to vector<4x256xbf16>
    %c0_54 = arith.constant 0 : index
    %c0_55 = arith.constant 0 : index
    %60 = vector.load %arg3[%c0_54, %c0_55] : memref<256x128xbf16, #tpu.memory_space<vmem>>, vector<256x128xbf16>
    %cst_56 = arith.constant dense<0.000000e+00> : vector<4x128xf32>
    %61 = tpu.matmul %59, %60, %cst_56 {dimension_numbers = #tpu.dot_dimension_numbers<[1], [0], [0], [1], [0, 0, 1, 1], [], []>} : vector<4x256xbf16>, vector<256x128xbf16>, vector<4x128xf32> -> vector<4x128xf32>
    %62 = arith.addf %57, %61 : vector<4x128xf32>
    %c0_57 = arith.constant 0 : index
    %c0_58 = arith.constant 0 : index
    %63 = vector.load %arg4[%c0_57, %c0_58] : memref<1x128xf32, #tpu.memory_space<vmem>>, vector<1x128xf32>
    %64 = vector.broadcast %63 : vector<1x128xf32> to vector<4x128xf32>
    %65 = arith.addf %62, %64 : vector<4x128xf32>
    %cst_59 = arith.constant 0.000000e+00 : f32
    %66 = vector.broadcast %cst_59 : f32 to vector<4x128xf32>
    %67 = arith.maximumf %65, %66 : vector<4x128xf32>
    %68 = arith.truncf %67 : vector<4x128xf32> to vector<4x128xbf16>
    %c3_60 = arith.constant 3 : index
    %c0_61 = arith.constant 0 : index
    %c0_62 = arith.constant 0 : index
    %69 = vector.load %arg5[%c3_60, %c0_61, %c0_62] : memref<8x4x128xbf16, #tpu.memory_space<vmem>>, vector<1x4x128xbf16>
    %70 = vector.shape_cast %69 : vector<1x4x128xbf16> to vector<4x128xbf16>
    %71 = vector.shape_cast %68 : vector<4x128xbf16> to vector<1x4x128xbf16>
    tpu.vector_store %arg5[%c3_60, %c0_61, %c0_62], %71 {strides = array<i32>} : memref<8x4x128xbf16, #tpu.memory_space<vmem>>, vector<1x4x128xbf16>,
    %c8 = arith.constant 8 : index
    %c0_63 = arith.constant 0 : index
    %c0_64 = arith.constant 0 : index
    %72 = vector.load %arg1[%c8, %c0_63, %c0_64] : memref<16x4x256xbf16, #tpu.memory_space<vmem>>, vector<1x4x256xbf16>
    %73 = vector.shape_cast %72 : vector<1x4x256xbf16> to vector<4x256xbf16>
    %c0_65 = arith.constant 0 : index
    %c0_66 = arith.constant 0 : index
    %74 = vector.load %arg2[%c0_65, %c0_66] : memref<256x128xbf16, #tpu.memory_space<vmem>>, vector<256x128xbf16>
    %cst_67 = arith.constant dense<0.000000e+00> : vector<4x128xf32>
    %75 = tpu.matmul %73, %74, %cst_67 {dimension_numbers = #tpu.dot_dimension_numbers<[1], [0], [0], [1], [0, 0, 1, 1], [], []>} : vector<4x256xbf16>, vector<256x128xbf16>, vector<4x128xf32> -> vector<4x128xf32>
    %c9 = arith.constant 9 : index
    %c0_68 = arith.constant 0 : index
    %c0_69 = arith.constant 0 : index
    %76 = vector.load %arg1[%c9, %c0_68, %c0_69] : memref<16x4x256xbf16, #tpu.memory_space<vmem>>, vector<1x4x256xbf16>
    %77 = vector.shape_cast %76 : vector<1x4x256xbf16> to vector<4x256xbf16>
    %c0_70 = arith.constant 0 : index
    %c0_71 = arith.constant 0 : index
    %78 = vector.load %arg3[%c0_70, %c0_71] : memref<256x128xbf16, #tpu.memory_space<vmem>>, vector<256x128xbf16>
    %cst_72 = arith.constant dense<0.000000e+00> : vector<4x128xf32>
    %79 = tpu.matmul %77, %78, %cst_72 {dimension_numbers = #tpu.dot_dimension_numbers<[1], [0], [0], [1], [0, 0, 1, 1], [], []>} : vector<4x256xbf16>, vector<256x128xbf16>, vector<4x128xf32> -> vector<4x128xf32>
    %80 = arith.addf %75, %79 : vector<4x128xf32>
    %c0_73 = arith.constant 0 : index
    %c0_74 = arith.constant 0 : index
    %81 = vector.load %arg4[%c0_73, %c0_74] : memref<1x128xf32, #tpu.memory_space<vmem>>, vector<1x128xf32>
    %82 = vector.broadcast %81 : vector<1x128xf32> to vector<4x128xf32>
    %83 = arith.addf %80, %82 : vector<4x128xf32>
    %cst_75 = arith.constant 0.000000e+00 : f32
    %84 = vector.broadcast %cst_75 : f32 to vector<4x128xf32>
    %85 = arith.maximumf %83, %84 : vector<4x128xf32>
    %86 = arith.truncf %85 : vector<4x128xf32> to vector<4x128xbf16>
    %c4_76 = arith.constant 4 : index
    %c0_77 = arith.constant 0 : index
    %c0_78 = arith.constant 0 : index
    %87 = vector.load %arg5[%c4_76, %c0_77, %c0_78] : memref<8x4x128xbf16, #tpu.memory_space<vmem>>, vector<1x4x128xbf16>
    %88 = vector.shape_cast %87 : vector<1x4x128xbf16> to vector<4x128xbf16>
    %89 = vector.shape_cast %86 : vector<4x128xbf16> to vector<1x4x128xbf16>
    tpu.vector_store %arg5[%c4_76, %c0_77, %c0_78], %89 {strides = array<i32>} : memref<8x4x128xbf16, #tpu.memory_space<vmem>>, vector<1x4x128xbf16>,
    %c10 = arith.constant 10 : index
    %c0_79 = arith.constant 0 : index
    %c0_80 = arith.constant 0 : index
    %90 = vector.load %arg1[%c10, %c0_79, %c0_80] : memref<16x4x256xbf16, #tpu.memory_space<vmem>>, vector<1x4x256xbf16>
    %91 = vector.shape_cast %90 : vector<1x4x256xbf16> to vector<4x256xbf16>
    %c0_81 = arith.constant 0 : index
    %c0_82 = arith.constant 0 : index
    %92 = vector.load %arg2[%c0_81, %c0_82] : memref<256x128xbf16, #tpu.memory_space<vmem>>, vector<256x128xbf16>
    %cst_83 = arith.constant dense<0.000000e+00> : vector<4x128xf32>
    %93 = tpu.matmul %91, %92, %cst_83 {dimension_numbers = #tpu.dot_dimension_numbers<[1], [0], [0], [1], [0, 0, 1, 1], [], []>} : vector<4x256xbf16>, vector<256x128xbf16>, vector<4x128xf32> -> vector<4x128xf32>
    %c11 = arith.constant 11 : index
    %c0_84 = arith.constant 0 : index
    %c0_85 = arith.constant 0 : index
    %94 = vector.load %arg1[%c11, %c0_84, %c0_85] : memref<16x4x256xbf16, #tpu.memory_space<vmem>>, vector<1x4x256xbf16>
    %95 = vector.shape_cast %94 : vector<1x4x256xbf16> to vector<4x256xbf16>
    %c0_86 = arith.constant 0 : index
    %c0_87 = arith.constant 0 : index
    %96 = vector.load %arg3[%c0_86, %c0_87] : memref<256x128xbf16, #tpu.memory_space<vmem>>, vector<256x128xbf16>
    %cst_88 = arith.constant dense<0.000000e+00> : vector<4x128xf32>
    %97 = tpu.matmul %95, %96, %cst_88 {dimension_numbers = #tpu.dot_dimension_numbers<[1], [0], [0], [1], [0, 0, 1, 1], [], []>} : vector<4x256xbf16>, vector<256x128xbf16>, vector<4x128xf32> -> vector<4x128xf32>
    %98 = arith.addf %93, %97 : vector<4x128xf32>
    %c0_89 = arith.constant 0 : index
    %c0_90 = arith.constant 0 : index
    %99 = vector.load %arg4[%c0_89, %c0_90] : memref<1x128xf32, #tpu.memory_space<vmem>>, vector<1x128xf32>
    %100 = vector.broadcast %99 : vector<1x128xf32> to vector<4x128xf32>
    %101 = arith.addf %98, %100 : vector<4x128xf32>
    %cst_91 = arith.constant 0.000000e+00 : f32
    %102 = vector.broadcast %cst_91 : f32 to vector<4x128xf32>
    %103 = arith.maximumf %101, %102 : vector<4x128xf32>
    %104 = arith.truncf %103 : vector<4x128xf32> to vector<4x128xbf16>
    %c5_92 = arith.constant 5 : index
    %c0_93 = arith.constant 0 : index
    %c0_94 = arith.constant 0 : index
    %105 = vector.load %arg5[%c5_92, %c0_93, %c0_94] : memref<8x4x128xbf16, #tpu.memory_space<vmem>>, vector<1x4x128xbf16>
    %106 = vector.shape_cast %105 : vector<1x4x128xbf16> to vector<4x128xbf16>
    %107 = vector.shape_cast %104 : vector<4x128xbf16> to vector<1x4x128xbf16>
    tpu.vector_store %arg5[%c5_92, %c0_93, %c0_94], %107 {strides = array<i32>} : memref<8x4x128xbf16, #tpu.memory_space<vmem>>, vector<1x4x128xbf16>,
    %c12 = arith.constant 12 : index
    %c0_95 = arith.constant 0 : index
    %c0_96 = arith.constant 0 : index
    %108 = vector.load %arg1[%c12, %c0_95, %c0_96] : memref<16x4x256xbf16, #tpu.memory_space<vmem>>, vector<1x4x256xbf16>
    %109 = vector.shape_cast %108 : vector<1x4x256xbf16> to vector<4x256xbf16>
    %c0_97 = arith.constant 0 : index
    %c0_98 = arith.constant 0 : index
    %110 = vector.load %arg2[%c0_97, %c0_98] : memref<256x128xbf16, #tpu.memory_space<vmem>>, vector<256x128xbf16>
    %cst_99 = arith.constant dense<0.000000e+00> : vector<4x128xf32>
    %111 = tpu.matmul %109, %110, %cst_99 {dimension_numbers = #tpu.dot_dimension_numbers<[1], [0], [0], [1], [0, 0, 1, 1], [], []>} : vector<4x256xbf16>, vector<256x128xbf16>, vector<4x128xf32> -> vector<4x128xf32>
    %c13 = arith.constant 13 : index
    %c0_100 = arith.constant 0 : index
    %c0_101 = arith.constant 0 : index
    %112 = vector.load %arg1[%c13, %c0_100, %c0_101] : memref<16x4x256xbf16, #tpu.memory_space<vmem>>, vector<1x4x256xbf16>
    %113 = vector.shape_cast %112 : vector<1x4x256xbf16> to vector<4x256xbf16>
    %c0_102 = arith.constant 0 : index
    %c0_103 = arith.constant 0 : index
    %114 = vector.load %arg3[%c0_102, %c0_103] : memref<256x128xbf16, #tpu.memory_space<vmem>>, vector<256x128xbf16>
    %cst_104 = arith.constant dense<0.000000e+00> : vector<4x128xf32>
    %115 = tpu.matmul %113, %114, %cst_104 {dimension_numbers = #tpu.dot_dimension_numbers<[1], [0], [0], [1], [0, 0, 1, 1], [], []>} : vector<4x256xbf16>, vector<256x128xbf16>, vector<4x128xf32> -> vector<4x128xf32>
    %116 = arith.addf %111, %115 : vector<4x128xf32>
    %c0_105 = arith.constant 0 : index
    %c0_106 = arith.constant 0 : index
    %117 = vector.load %arg4[%c0_105, %c0_106] : memref<1x128xf32, #tpu.memory_space<vmem>>, vector<1x128xf32>
    %118 = vector.broadcast %117 : vector<1x128xf32> to vector<4x128xf32>
    %119 = arith.addf %116, %118 : vector<4x128xf32>
    %cst_107 = arith.constant 0.000000e+00 : f32
    %120 = vector.broadcast %cst_107 : f32 to vector<4x128xf32>
    %121 = arith.maximumf %119, %120 : vector<4x128xf32>
    %122 = arith.truncf %121 : vector<4x128xf32> to vector<4x128xbf16>
    %c6_108 = arith.constant 6 : index
    %c0_109 = arith.constant 0 : index
    %c0_110 = arith.constant 0 : index
    %123 = vector.load %arg5[%c6_108, %c0_109, %c0_110] : memref<8x4x128xbf16, #tpu.memory_space<vmem>>, vector<1x4x128xbf16>
    %124 = vector.shape_cast %123 : vector<1x4x128xbf16> to vector<4x128xbf16>
    %125 = vector.shape_cast %122 : vector<4x128xbf16> to vector<1x4x128xbf16>
    tpu.vector_store %arg5[%c6_108, %c0_109, %c0_110], %125 {strides = array<i32>} : memref<8x4x128xbf16, #tpu.memory_space<vmem>>, vector<1x4x128xbf16>,
    %c14 = arith.constant 14 : index
    %c0_111 = arith.constant 0 : index
    %c0_112 = arith.constant 0 : index
    %126 = vector.load %arg1[%c14, %c0_111, %c0_112] : memref<16x4x256xbf16, #tpu.memory_space<vmem>>, vector<1x4x256xbf16>
    %127 = vector.shape_cast %126 : vector<1x4x256xbf16> to vector<4x256xbf16>
    %c0_113 = arith.constant 0 : index
    %c0_114 = arith.constant 0 : index
    %128 = vector.load %arg2[%c0_113, %c0_114] : memref<256x128xbf16, #tpu.memory_space<vmem>>, vector<256x128xbf16>
    %cst_115 = arith.constant dense<0.000000e+00> : vector<4x128xf32>
    %129 = tpu.matmul %127, %128, %cst_115 {dimension_numbers = #tpu.dot_dimension_numbers<[1], [0], [0], [1], [0, 0, 1, 1], [], []>} : vector<4x256xbf16>, vector<256x128xbf16>, vector<4x128xf32> -> vector<4x128xf32>
    %c15 = arith.constant 15 : index
    %c0_116 = arith.constant 0 : index
    %c0_117 = arith.constant 0 : index
    %130 = vector.load %arg1[%c15, %c0_116, %c0_117] : memref<16x4x256xbf16, #tpu.memory_space<vmem>>, vector<1x4x256xbf16>
    %131 = vector.shape_cast %130 : vector<1x4x256xbf16> to vector<4x256xbf16>
    %c0_118 = arith.constant 0 : index
    %c0_119 = arith.constant 0 : index
    %132 = vector.load %arg3[%c0_118, %c0_119] : memref<256x128xbf16, #tpu.memory_space<vmem>>, vector<256x128xbf16>
    %cst_120 = arith.constant dense<0.000000e+00> : vector<4x128xf32>
    %133 = tpu.matmul %131, %132, %cst_120 {dimension_numbers = #tpu.dot_dimension_numbers<[1], [0], [0], [1], [0, 0, 1, 1], [], []>} : vector<4x256xbf16>, vector<256x128xbf16>, vector<4x128xf32> -> vector<4x128xf32>
    %134 = arith.addf %129, %133 : vector<4x128xf32>
    %c0_121 = arith.constant 0 : index
    %c0_122 = arith.constant 0 : index
    %135 = vector.load %arg4[%c0_121, %c0_122] : memref<1x128xf32, #tpu.memory_space<vmem>>, vector<1x128xf32>
    %136 = vector.broadcast %135 : vector<1x128xf32> to vector<4x128xf32>
    %137 = arith.addf %134, %136 : vector<4x128xf32>
    %cst_123 = arith.constant 0.000000e+00 : f32
    %138 = vector.broadcast %cst_123 : f32 to vector<4x128xf32>
    %139 = arith.maximumf %137, %138 : vector<4x128xf32>
    %140 = arith.truncf %139 : vector<4x128xf32> to vector<4x128xbf16>
    %c7_124 = arith.constant 7 : index
    %c0_125 = arith.constant 0 : index
    %c0_126 = arith.constant 0 : index
    %141 = vector.load %arg5[%c7_124, %c0_125, %c0_126] : memref<8x4x128xbf16, #tpu.memory_space<vmem>>, vector<1x4x128xbf16>
    %142 = vector.shape_cast %141 : vector<1x4x128xbf16> to vector<4x128xbf16>
    %143 = vector.shape_cast %140 : vector<4x128xbf16> to vector<1x4x128xbf16>
    tpu.vector_store %arg5[%c7_124, %c0_125, %c0_126], %143 {strides = array<i32>} : memref<8x4x128xbf16, #tpu.memory_space<vmem>>, vector<1x4x128xbf16>,
    return
  }
  func.func @transform_0(%arg0: i32) -> (i32, i32, i32) {
    %c0_i32 = arith.constant 0 : i32
    %c0_i32_0 = arith.constant 0 : i32
    %c0_i32_1 = arith.constant 0 : i32
    return %arg0, %c0_i32, %c0_i32_0 : i32, i32, i32
  }
  func.func @transform_1(%arg0: i32) -> (i32, i32) {
    %c0_i32 = arith.constant 0 : i32
    %c0_i32_0 = arith.constant 0 : i32
    %c0_i32_1 = arith.constant 0 : i32
    return %c0_i32, %c0_i32_0 : i32, i32
  }
  func.func @transform_2(%arg0: i32) -> (i32, i32) {
    %c0_i32 = arith.constant 0 : i32
    %c0_i32_0 = arith.constant 0 : i32
    %c0_i32_1 = arith.constant 0 : i32
    return %c0_i32, %c0_i32_0 : i32, i32
  }
  func.func @transform_3(%arg0: i32) -> (i32, i32) {
    %c0_i32 = arith.constant 0 : i32
    %c0_i32_0 = arith.constant 0 : i32
    %c0_i32_1 = arith.constant 0 : i32
    return %c0_i32, %c0_i32_0 : i32, i32
  }
  func.func @transform_4(%arg0: i32) -> (i32, i32, i32) {
    %c0_i32 = arith.constant 0 : i32
    %c0_i32_0 = arith.constant 0 : i32
    %c0_i32_1 = arith.constant 0 : i32
    return %arg0, %c0_i32, %c0_i32_0 : i32, i32, i32
  }
}

module attributes {stable_mosaic.version = 11 : i64} {
  func.func @_conv2x2_then_1x1_kernel(%arg0: i32, %arg1: memref<8x2x256xbf16, #tpu.memory_space<vmem>>, %arg2: memref<256x128xbf16, #tpu.memory_space<vmem>>, %arg3: memref<256x128xbf16, #tpu.memory_space<vmem>>, %arg4: memref<1x128xf32, #tpu.memory_space<vmem>>, %arg5: memref<128x128xbf16, #tpu.memory_space<vmem>>, %arg6: memref<1x128xf32, #tpu.memory_space<vmem>>, %arg7: memref<4x2x128xf32, #tpu.memory_space<vmem>>) attributes {dimension_semantics = [#tpu.dimension_semantics<parallel>], iteration_bounds = array<i64: 1>, scalar_prefetch = 0 : i64, scratch_operands = 0 : i64, tpu.core_type = #tpu.core_type<tc>, window_params = [{transform_indices = @transform_0, window_bounds = array<i64: 8, 2, 256>}, {pipeline_mode = #tpu.pipeline_mode<synchronous>, transform_indices = @transform_1, window_bounds = array<i64: 256, 128>}, {pipeline_mode = #tpu.pipeline_mode<synchronous>, transform_indices = @transform_2, window_bounds = array<i64: 256, 128>}, {pipeline_mode = #tpu.pipeline_mode<synchronous>, transform_indices = @transform_3, window_bounds = array<i64: 1, 128>}, {pipeline_mode = #tpu.pipeline_mode<synchronous>, transform_indices = @transform_4, window_bounds = array<i64: 128, 128>}, {pipeline_mode = #tpu.pipeline_mode<synchronous>, transform_indices = @transform_5, window_bounds = array<i64: 1, 128>}, {transform_indices = @transform_6, window_bounds = array<i64: 4, 2, 128>}]} {
    %c0 = arith.constant 0 : index
    %c0_0 = arith.constant 0 : index
    %c0_1 = arith.constant 0 : index
    %0 = vector.load %arg1[%c0, %c0_0, %c0_1] : memref<8x2x256xbf16, #tpu.memory_space<vmem>>, vector<1x2x256xbf16>
    %1 = vector.shape_cast %0 : vector<1x2x256xbf16> to vector<2x256xbf16>
    %c0_2 = arith.constant 0 : index
    %c0_3 = arith.constant 0 : index
    %2 = vector.load %arg2[%c0_2, %c0_3] : memref<256x128xbf16, #tpu.memory_space<vmem>>, vector<256x128xbf16>
    %cst = arith.constant dense<0.000000e+00> : vector<2x128xf32>
    %3 = tpu.matmul %1, %2, %cst {dimension_numbers = #tpu.dot_dimension_numbers<[1], [0], [0], [1], [0, 0, 1, 1], [], []>} : vector<2x256xbf16>, vector<256x128xbf16>, vector<2x128xf32> -> vector<2x128xf32>
    %c1 = arith.constant 1 : index
    %c0_4 = arith.constant 0 : index
    %c0_5 = arith.constant 0 : index
    %4 = vector.load %arg1[%c1, %c0_4, %c0_5] : memref<8x2x256xbf16, #tpu.memory_space<vmem>>, vector<1x2x256xbf16>
    %5 = vector.shape_cast %4 : vector<1x2x256xbf16> to vector<2x256xbf16>
    %c0_6 = arith.constant 0 : index
    %c0_7 = arith.constant 0 : index
    %6 = vector.load %arg3[%c0_6, %c0_7] : memref<256x128xbf16, #tpu.memory_space<vmem>>, vector<256x128xbf16>
    %cst_8 = arith.constant dense<0.000000e+00> : vector<2x128xf32>
    %7 = tpu.matmul %5, %6, %cst_8 {dimension_numbers = #tpu.dot_dimension_numbers<[1], [0], [0], [1], [0, 0, 1, 1], [], []>} : vector<2x256xbf16>, vector<256x128xbf16>, vector<2x128xf32> -> vector<2x128xf32>
    %8 = arith.addf %3, %7 : vector<2x128xf32>
    %c0_9 = arith.constant 0 : index
    %c0_10 = arith.constant 0 : index
    %9 = vector.load %arg4[%c0_9, %c0_10] : memref<1x128xf32, #tpu.memory_space<vmem>>, vector<1x128xf32>
    %10 = vector.broadcast %9 : vector<1x128xf32> to vector<2x128xf32>
    %11 = arith.addf %8, %10 : vector<2x128xf32>
    %cst_11 = arith.constant 0.000000e+00 : f32
    %12 = vector.broadcast %cst_11 : f32 to vector<2x128xf32>
    %13 = arith.maximumf %11, %12 : vector<2x128xf32>
    %14 = arith.truncf %13 : vector<2x128xf32> to vector<2x128xbf16>
    %c0_12 = arith.constant 0 : index
    %c0_13 = arith.constant 0 : index
    %15 = vector.load %arg5[%c0_12, %c0_13] : memref<128x128xbf16, #tpu.memory_space<vmem>>, vector<128x128xbf16>
    %cst_14 = arith.constant dense<0.000000e+00> : vector<2x128xf32>
    %16 = tpu.matmul %14, %15, %cst_14 {dimension_numbers = #tpu.dot_dimension_numbers<[1], [0], [0], [1], [0, 0, 1, 1], [], []>} : vector<2x128xbf16>, vector<128x128xbf16>, vector<2x128xf32> -> vector<2x128xf32>
    %c0_15 = arith.constant 0 : index
    %c0_16 = arith.constant 0 : index
    %17 = vector.load %arg6[%c0_15, %c0_16] : memref<1x128xf32, #tpu.memory_space<vmem>>, vector<1x128xf32>
    %18 = vector.broadcast %17 : vector<1x128xf32> to vector<2x128xf32>
    %19 = arith.addf %16, %18 : vector<2x128xf32>
    %cst_17 = arith.constant 0.000000e+00 : f32
    %20 = vector.broadcast %cst_17 : f32 to vector<2x128xf32>
    %21 = arith.maximumf %19, %20 : vector<2x128xf32>
    %c0_18 = arith.constant 0 : index
    %c0_19 = arith.constant 0 : index
    %c0_20 = arith.constant 0 : index
    %22 = vector.load %arg7[%c0_18, %c0_19, %c0_20] : memref<4x2x128xf32, #tpu.memory_space<vmem>>, vector<1x2x128xf32>
    %23 = vector.shape_cast %22 : vector<1x2x128xf32> to vector<2x128xf32>
    %24 = vector.shape_cast %21 : vector<2x128xf32> to vector<1x2x128xf32>
    tpu.vector_store %arg7[%c0_18, %c0_19, %c0_20], %24 {strides = array<i32>} : memref<4x2x128xf32, #tpu.memory_space<vmem>>, vector<1x2x128xf32>,
    %c2 = arith.constant 2 : index
    %c0_21 = arith.constant 0 : index
    %c0_22 = arith.constant 0 : index
    %25 = vector.load %arg1[%c2, %c0_21, %c0_22] : memref<8x2x256xbf16, #tpu.memory_space<vmem>>, vector<1x2x256xbf16>
    %26 = vector.shape_cast %25 : vector<1x2x256xbf16> to vector<2x256xbf16>
    %c0_23 = arith.constant 0 : index
    %c0_24 = arith.constant 0 : index
    %27 = vector.load %arg2[%c0_23, %c0_24] : memref<256x128xbf16, #tpu.memory_space<vmem>>, vector<256x128xbf16>
    %cst_25 = arith.constant dense<0.000000e+00> : vector<2x128xf32>
    %28 = tpu.matmul %26, %27, %cst_25 {dimension_numbers = #tpu.dot_dimension_numbers<[1], [0], [0], [1], [0, 0, 1, 1], [], []>} : vector<2x256xbf16>, vector<256x128xbf16>, vector<2x128xf32> -> vector<2x128xf32>
    %c3 = arith.constant 3 : index
    %c0_26 = arith.constant 0 : index
    %c0_27 = arith.constant 0 : index
    %29 = vector.load %arg1[%c3, %c0_26, %c0_27] : memref<8x2x256xbf16, #tpu.memory_space<vmem>>, vector<1x2x256xbf16>
    %30 = vector.shape_cast %29 : vector<1x2x256xbf16> to vector<2x256xbf16>
    %c0_28 = arith.constant 0 : index
    %c0_29 = arith.constant 0 : index
    %31 = vector.load %arg3[%c0_28, %c0_29] : memref<256x128xbf16, #tpu.memory_space<vmem>>, vector<256x128xbf16>
    %cst_30 = arith.constant dense<0.000000e+00> : vector<2x128xf32>
    %32 = tpu.matmul %30, %31, %cst_30 {dimension_numbers = #tpu.dot_dimension_numbers<[1], [0], [0], [1], [0, 0, 1, 1], [], []>} : vector<2x256xbf16>, vector<256x128xbf16>, vector<2x128xf32> -> vector<2x128xf32>
    %33 = arith.addf %28, %32 : vector<2x128xf32>
    %c0_31 = arith.constant 0 : index
    %c0_32 = arith.constant 0 : index
    %34 = vector.load %arg4[%c0_31, %c0_32] : memref<1x128xf32, #tpu.memory_space<vmem>>, vector<1x128xf32>
    %35 = vector.broadcast %34 : vector<1x128xf32> to vector<2x128xf32>
    %36 = arith.addf %33, %35 : vector<2x128xf32>
    %cst_33 = arith.constant 0.000000e+00 : f32
    %37 = vector.broadcast %cst_33 : f32 to vector<2x128xf32>
    %38 = arith.maximumf %36, %37 : vector<2x128xf32>
    %39 = arith.truncf %38 : vector<2x128xf32> to vector<2x128xbf16>
    %c0_34 = arith.constant 0 : index
    %c0_35 = arith.constant 0 : index
    %40 = vector.load %arg5[%c0_34, %c0_35] : memref<128x128xbf16, #tpu.memory_space<vmem>>, vector<128x128xbf16>
    %cst_36 = arith.constant dense<0.000000e+00> : vector<2x128xf32>
    %41 = tpu.matmul %39, %40, %cst_36 {dimension_numbers = #tpu.dot_dimension_numbers<[1], [0], [0], [1], [0, 0, 1, 1], [], []>} : vector<2x128xbf16>, vector<128x128xbf16>, vector<2x128xf32> -> vector<2x128xf32>
    %c0_37 = arith.constant 0 : index
    %c0_38 = arith.constant 0 : index
    %42 = vector.load %arg6[%c0_37, %c0_38] : memref<1x128xf32, #tpu.memory_space<vmem>>, vector<1x128xf32>
    %43 = vector.broadcast %42 : vector<1x128xf32> to vector<2x128xf32>
    %44 = arith.addf %41, %43 : vector<2x128xf32>
    %cst_39 = arith.constant 0.000000e+00 : f32
    %45 = vector.broadcast %cst_39 : f32 to vector<2x128xf32>
    %46 = arith.maximumf %44, %45 : vector<2x128xf32>
    %c1_40 = arith.constant 1 : index
    %c0_41 = arith.constant 0 : index
    %c0_42 = arith.constant 0 : index
    %47 = vector.load %arg7[%c1_40, %c0_41, %c0_42] : memref<4x2x128xf32, #tpu.memory_space<vmem>>, vector<1x2x128xf32>
    %48 = vector.shape_cast %47 : vector<1x2x128xf32> to vector<2x128xf32>
    %49 = vector.shape_cast %46 : vector<2x128xf32> to vector<1x2x128xf32>
    tpu.vector_store %arg7[%c1_40, %c0_41, %c0_42], %49 {strides = array<i32>} : memref<4x2x128xf32, #tpu.memory_space<vmem>>, vector<1x2x128xf32>,
    %c4 = arith.constant 4 : index
    %c0_43 = arith.constant 0 : index
    %c0_44 = arith.constant 0 : index
    %50 = vector.load %arg1[%c4, %c0_43, %c0_44] : memref<8x2x256xbf16, #tpu.memory_space<vmem>>, vector<1x2x256xbf16>
    %51 = vector.shape_cast %50 : vector<1x2x256xbf16> to vector<2x256xbf16>
    %c0_45 = arith.constant 0 : index
    %c0_46 = arith.constant 0 : index
    %52 = vector.load %arg2[%c0_45, %c0_46] : memref<256x128xbf16, #tpu.memory_space<vmem>>, vector<256x128xbf16>
    %cst_47 = arith.constant dense<0.000000e+00> : vector<2x128xf32>
    %53 = tpu.matmul %51, %52, %cst_47 {dimension_numbers = #tpu.dot_dimension_numbers<[1], [0], [0], [1], [0, 0, 1, 1], [], []>} : vector<2x256xbf16>, vector<256x128xbf16>, vector<2x128xf32> -> vector<2x128xf32>
    %c5 = arith.constant 5 : index
    %c0_48 = arith.constant 0 : index
    %c0_49 = arith.constant 0 : index
    %54 = vector.load %arg1[%c5, %c0_48, %c0_49] : memref<8x2x256xbf16, #tpu.memory_space<vmem>>, vector<1x2x256xbf16>
    %55 = vector.shape_cast %54 : vector<1x2x256xbf16> to vector<2x256xbf16>
    %c0_50 = arith.constant 0 : index
    %c0_51 = arith.constant 0 : index
    %56 = vector.load %arg3[%c0_50, %c0_51] : memref<256x128xbf16, #tpu.memory_space<vmem>>, vector<256x128xbf16>
    %cst_52 = arith.constant dense<0.000000e+00> : vector<2x128xf32>
    %57 = tpu.matmul %55, %56, %cst_52 {dimension_numbers = #tpu.dot_dimension_numbers<[1], [0], [0], [1], [0, 0, 1, 1], [], []>} : vector<2x256xbf16>, vector<256x128xbf16>, vector<2x128xf32> -> vector<2x128xf32>
    %58 = arith.addf %53, %57 : vector<2x128xf32>
    %c0_53 = arith.constant 0 : index
    %c0_54 = arith.constant 0 : index
    %59 = vector.load %arg4[%c0_53, %c0_54] : memref<1x128xf32, #tpu.memory_space<vmem>>, vector<1x128xf32>
    %60 = vector.broadcast %59 : vector<1x128xf32> to vector<2x128xf32>
    %61 = arith.addf %58, %60 : vector<2x128xf32>
    %cst_55 = arith.constant 0.000000e+00 : f32
    %62 = vector.broadcast %cst_55 : f32 to vector<2x128xf32>
    %63 = arith.maximumf %61, %62 : vector<2x128xf32>
    %64 = arith.truncf %63 : vector<2x128xf32> to vector<2x128xbf16>
    %c0_56 = arith.constant 0 : index
    %c0_57 = arith.constant 0 : index
    %65 = vector.load %arg5[%c0_56, %c0_57] : memref<128x128xbf16, #tpu.memory_space<vmem>>, vector<128x128xbf16>
    %cst_58 = arith.constant dense<0.000000e+00> : vector<2x128xf32>
    %66 = tpu.matmul %64, %65, %cst_58 {dimension_numbers = #tpu.dot_dimension_numbers<[1], [0], [0], [1], [0, 0, 1, 1], [], []>} : vector<2x128xbf16>, vector<128x128xbf16>, vector<2x128xf32> -> vector<2x128xf32>
    %c0_59 = arith.constant 0 : index
    %c0_60 = arith.constant 0 : index
    %67 = vector.load %arg6[%c0_59, %c0_60] : memref<1x128xf32, #tpu.memory_space<vmem>>, vector<1x128xf32>
    %68 = vector.broadcast %67 : vector<1x128xf32> to vector<2x128xf32>
    %69 = arith.addf %66, %68 : vector<2x128xf32>
    %cst_61 = arith.constant 0.000000e+00 : f32
    %70 = vector.broadcast %cst_61 : f32 to vector<2x128xf32>
    %71 = arith.maximumf %69, %70 : vector<2x128xf32>
    %c2_62 = arith.constant 2 : index
    %c0_63 = arith.constant 0 : index
    %c0_64 = arith.constant 0 : index
    %72 = vector.load %arg7[%c2_62, %c0_63, %c0_64] : memref<4x2x128xf32, #tpu.memory_space<vmem>>, vector<1x2x128xf32>
    %73 = vector.shape_cast %72 : vector<1x2x128xf32> to vector<2x128xf32>
    %74 = vector.shape_cast %71 : vector<2x128xf32> to vector<1x2x128xf32>
    tpu.vector_store %arg7[%c2_62, %c0_63, %c0_64], %74 {strides = array<i32>} : memref<4x2x128xf32, #tpu.memory_space<vmem>>, vector<1x2x128xf32>,
    %c6 = arith.constant 6 : index
    %c0_65 = arith.constant 0 : index
    %c0_66 = arith.constant 0 : index
    %75 = vector.load %arg1[%c6, %c0_65, %c0_66] : memref<8x2x256xbf16, #tpu.memory_space<vmem>>, vector<1x2x256xbf16>
    %76 = vector.shape_cast %75 : vector<1x2x256xbf16> to vector<2x256xbf16>
    %c0_67 = arith.constant 0 : index
    %c0_68 = arith.constant 0 : index
    %77 = vector.load %arg2[%c0_67, %c0_68] : memref<256x128xbf16, #tpu.memory_space<vmem>>, vector<256x128xbf16>
    %cst_69 = arith.constant dense<0.000000e+00> : vector<2x128xf32>
    %78 = tpu.matmul %76, %77, %cst_69 {dimension_numbers = #tpu.dot_dimension_numbers<[1], [0], [0], [1], [0, 0, 1, 1], [], []>} : vector<2x256xbf16>, vector<256x128xbf16>, vector<2x128xf32> -> vector<2x128xf32>
    %c7 = arith.constant 7 : index
    %c0_70 = arith.constant 0 : index
    %c0_71 = arith.constant 0 : index
    %79 = vector.load %arg1[%c7, %c0_70, %c0_71] : memref<8x2x256xbf16, #tpu.memory_space<vmem>>, vector<1x2x256xbf16>
    %80 = vector.shape_cast %79 : vector<1x2x256xbf16> to vector<2x256xbf16>
    %c0_72 = arith.constant 0 : index
    %c0_73 = arith.constant 0 : index
    %81 = vector.load %arg3[%c0_72, %c0_73] : memref<256x128xbf16, #tpu.memory_space<vmem>>, vector<256x128xbf16>
    %cst_74 = arith.constant dense<0.000000e+00> : vector<2x128xf32>
    %82 = tpu.matmul %80, %81, %cst_74 {dimension_numbers = #tpu.dot_dimension_numbers<[1], [0], [0], [1], [0, 0, 1, 1], [], []>} : vector<2x256xbf16>, vector<256x128xbf16>, vector<2x128xf32> -> vector<2x128xf32>
    %83 = arith.addf %78, %82 : vector<2x128xf32>
    %c0_75 = arith.constant 0 : index
    %c0_76 = arith.constant 0 : index
    %84 = vector.load %arg4[%c0_75, %c0_76] : memref<1x128xf32, #tpu.memory_space<vmem>>, vector<1x128xf32>
    %85 = vector.broadcast %84 : vector<1x128xf32> to vector<2x128xf32>
    %86 = arith.addf %83, %85 : vector<2x128xf32>
    %cst_77 = arith.constant 0.000000e+00 : f32
    %87 = vector.broadcast %cst_77 : f32 to vector<2x128xf32>
    %88 = arith.maximumf %86, %87 : vector<2x128xf32>
    %89 = arith.truncf %88 : vector<2x128xf32> to vector<2x128xbf16>
    %c0_78 = arith.constant 0 : index
    %c0_79 = arith.constant 0 : index
    %90 = vector.load %arg5[%c0_78, %c0_79] : memref<128x128xbf16, #tpu.memory_space<vmem>>, vector<128x128xbf16>
    %cst_80 = arith.constant dense<0.000000e+00> : vector<2x128xf32>
    %91 = tpu.matmul %89, %90, %cst_80 {dimension_numbers = #tpu.dot_dimension_numbers<[1], [0], [0], [1], [0, 0, 1, 1], [], []>} : vector<2x128xbf16>, vector<128x128xbf16>, vector<2x128xf32> -> vector<2x128xf32>
    %c0_81 = arith.constant 0 : index
    %c0_82 = arith.constant 0 : index
    %92 = vector.load %arg6[%c0_81, %c0_82] : memref<1x128xf32, #tpu.memory_space<vmem>>, vector<1x128xf32>
    %93 = vector.broadcast %92 : vector<1x128xf32> to vector<2x128xf32>
    %94 = arith.addf %91, %93 : vector<2x128xf32>
    %cst_83 = arith.constant 0.000000e+00 : f32
    %95 = vector.broadcast %cst_83 : f32 to vector<2x128xf32>
    %96 = arith.maximumf %94, %95 : vector<2x128xf32>
    %c3_84 = arith.constant 3 : index
    %c0_85 = arith.constant 0 : index
    %c0_86 = arith.constant 0 : index
    %97 = vector.load %arg7[%c3_84, %c0_85, %c0_86] : memref<4x2x128xf32, #tpu.memory_space<vmem>>, vector<1x2x128xf32>
    %98 = vector.shape_cast %97 : vector<1x2x128xf32> to vector<2x128xf32>
    %99 = vector.shape_cast %96 : vector<2x128xf32> to vector<1x2x128xf32>
    tpu.vector_store %arg7[%c3_84, %c0_85, %c0_86], %99 {strides = array<i32>} : memref<4x2x128xf32, #tpu.memory_space<vmem>>, vector<1x2x128xf32>,
    return
  }
  func.func @transform_0(%arg0: i32) -> (i32, i32, i32) {
    %c0_i32 = arith.constant 0 : i32
    %c0_i32_0 = arith.constant 0 : i32
    %c0_i32_1 = arith.constant 0 : i32
    return %arg0, %c0_i32, %c0_i32_0 : i32, i32, i32
  }
  func.func @transform_1(%arg0: i32) -> (i32, i32) {
    %c0_i32 = arith.constant 0 : i32
    %c0_i32_0 = arith.constant 0 : i32
    %c0_i32_1 = arith.constant 0 : i32
    return %c0_i32, %c0_i32_0 : i32, i32
  }
  func.func @transform_2(%arg0: i32) -> (i32, i32) {
    %c0_i32 = arith.constant 0 : i32
    %c0_i32_0 = arith.constant 0 : i32
    %c0_i32_1 = arith.constant 0 : i32
    return %c0_i32, %c0_i32_0 : i32, i32
  }
  func.func @transform_3(%arg0: i32) -> (i32, i32) {
    %c0_i32 = arith.constant 0 : i32
    %c0_i32_0 = arith.constant 0 : i32
    %c0_i32_1 = arith.constant 0 : i32
    return %c0_i32, %c0_i32_0 : i32, i32
  }
  func.func @transform_4(%arg0: i32) -> (i32, i32) {
    %c0_i32 = arith.constant 0 : i32
    %c0_i32_0 = arith.constant 0 : i32
    %c0_i32_1 = arith.constant 0 : i32
    return %c0_i32, %c0_i32_0 : i32, i32
  }
  func.func @transform_5(%arg0: i32) -> (i32, i32) {
    %c0_i32 = arith.constant 0 : i32
    %c0_i32_0 = arith.constant 0 : i32
    %c0_i32_1 = arith.constant 0 : i32
    return %c0_i32, %c0_i32_0 : i32, i32
  }
  func.func @transform_6(%arg0: i32) -> (i32, i32, i32) {
    %c0_i32 = arith.constant 0 : i32
    %c0_i32_0 = arith.constant 0 : i32
    %c0_i32_1 = arith.constant 0 : i32
    return %arg0, %c0_i32, %c0_i32_0 : i32, i32, i32
  }
}

</mosaic_0001>

<bundles_post_ra>
// kernel: backbone_base_forward.7
= control target key start
LH: loop header
LB: loop body
LE: loop exit
PB: predicated region body
PF: predicated region fallthrough
CT: control target
= control target key end

     0   :  { %s427_s9 = smov 0   ;;  %s450_s0 = inlined_call_operand.vmem [shape: f32[2,16,16], index: 0, kind: input, shape index: {}]   ;;  %s451_s1 = inlined_call_operand.vmem [shape: f32[16,2], index: 1, kind: input, shape index: {}]   ;;  %s452_s2 = inlined_call_operand.vmem [shape: f32[2,2,2], index: 2, kind: output, shape index: {}]  }
   0x1 LB: > { %s351_s10 = sadd.s32 4294967295, %s407_s9   ;;  %p355_p0 = scmp.ge.s32.totalorder %s407_s9, 1  ;;  %s407_s9 = sphi %s427_s9, %s12_s9  }
   0x2   : > { %p112_p1 = scmp.lt.s32.totalorder %s407_s9, 3 }
   0x4   : > { %p113_p2 = pnand %p355_p0, %p112_p1 }
   0x5   : > { %v143_v0 = vld [vmem:[%s451_s1] sm:$0xff] (!%p113_p2)  ;;  %v144_v1 = vld [vmem:[%s451_s1 + $0x8] sm:$0xff] (!%p113_p2)  ;;  %p133_p3 = scmp.lt.s32.totalorder (!%p113_p2), %s351_s10, 1  ;;  %v409_v2 = vmov (!%p113_p2), 0.0|0.0   ;;  %vm410_vm0 = vmmov (!%p113_p2), 0   ;;  %v411_v4 = vmov (!%p113_p2), 0.0  }
   0x6   : > { %116 = sbr.rel (%p113_p2) target bundleno = 230 (0xe6), region = 28  ;;  %384 = vmatprep.subr.bf16.mxu0 (!%p113_p2), %v409_v2  ;;  %387 = vmatprep.subr.bf16.mxu1 (!%p113_p2), %v409_v2  ;;  %v385_v3 = vpack.c.bf16 (!%p113_p2), %v144_v1, %v143_v0  ;;  %vm145_vm1 = vcmask (!%p113_p2), 130048   ;;  %vm219_vm2 = vcmask (!%p113_p2), 8192  }
   0x7   : > { %374 = vmatprep.mubr.msk.f32.mxu0 (!%p113_p2), %vm410_vm0, %v411_v4  ;;  %381 = vmatprep.mubr.msk.f32.mxu1 (!%p113_p2), %vm410_vm0, %v411_v4 }
   0x8   : > { %386 = vmatpush3.bf16.msra.mxu0 (!%p113_p2), %v385_v3  ;;  %389 = vmatpush3.bf16.msra.mxu1 (!%p113_p2), %v385_v3 }
   0xd   : > { %s454_s10 = smov (!%p133_p3, %s351_s10), 1 }
   0xe   : > { %s363_s15 = sshll.u32 %s454_s10, 4  ;;  %s358_s19 = sshll.u32 %s454_s10, 1 }
   0xf   : > { %s137_s18 = scalar_lea.vmem %s450_s0, %s363_s15  ;;  %s141_s22 = scalar_lea.vmem %s452_s2, %s358_s19 }
  0x10   : > { %v142_v5 = vld [vmem:[%s137_s18] sm:$0x1]  ;;  %v221_v6 = vld [vmem:[%s137_s18 + $0x8] sm:$0x1] }
  0x11   : > { %375 = vmatmul.mubr.msk.f32.vlgmr.msra.gmra.mrb[0].mxu0 %vm145_vm1, %v142_v5  ;;  %382 = vmatmul.mubr.msk.f32.vlgmr.msra.gmra.mrb[0].mxu1 %vm145_vm1, %v221_v6 }
  0xe4   : > { %v215_v7 = vpop.f32.mrb[0].mxu0  ;;  %v293_v8 = vpop.f32.mrb[0].mxu1 }
  0xe5   : > { %220 = vst.msk [vmem:[%s141_s22] sm:$0x1] %vm219_vm2, %v215_v7  ;;  %297 = vst.msk [vmem:[%s141_s22 + $0x1] sm:$0x1] %vm219_vm2, %v293_v8  ;;  %v376_v9 = vpop.f32.mrb[1].mxu0  ;;  %v383_v10 = vpop.f32.mrb[1].mxu1 }
  0xe6 PF: > { %s12_s9 = sadd.s32 1, %s407_s9  }
  0xe7   : > { %p9_p4 = scmp.ge.s32.totalorder %s12_s9, 4  }
  0xe9   :  { %11 = sbr.rel (!%p9_p4) target bundleno = 1 (0x1), region = 58 }

// kernel: backbone_base_forward.6
= control target key start
LH: loop header
LB: loop body
LE: loop exit
PB: predicated region body
PF: predicated region fallthrough
CT: control target
= control target key end

     0   :  { %v2723_v23 = vmov 1966171168   ;;  %v103_v25 = vlaneseq  ;;  %v2724_v41 = vmov 0.0   ;;  %vm2725_vm0 = vmmov 0   ;;  %s3361_s2 = inlined_call_operand.vmem [shape: bf16[256,128], index: 2, kind: input, shape index: {}]   ;;  %s3362_s1 = inlined_call_operand.vmem [shape: bf16[256,128], index: 1, kind: input, shape index: {}]   ;;  %s3363_s0 = inlined_call_operand.vmem [shape: bf16[8,2,256], index: 0, kind: input, shape index: {}]   ;;  %s3364_s4 = inlined_call_operand.vmem [shape: bf16[128,128], index: 4, kind: input, shape index: {}]   ;;  %s3365_s3 = inlined_call_operand.vmem [shape: f32[1,128], index: 3, kind: input, shape index: {}]   ;;  %s3366_s5 = inlined_call_operand.vmem [shape: f32[1,128], index: 5, kind: input, shape index: {}]   ;;  %s3367_s6 = inlined_call_operand.vmem [shape: f32[4,2,128], index: 6, kind: output, shape index: {}]  }
   0x1   :  { %v2563_v0 = vld [vmem:[%s3361_s2 + $0x40] sm:$0xff]   ;;  %v2567_v4 = vld [vmem:[%s3361_s2 + $0x48] sm:$0xff]   ;;  %v2571_v8 = vld [vmem:[%s3361_s2 + $0x50] sm:$0xff]   ;;  %v101_v24 = vunpack.c.l.s4 %v2723_v23 }
   0x2   :  { %v2564_v1 = vld [vmem:[%s3362_s1 + $0x40] sm:$0xff]   ;;  %2268 = vmatprep.subr.bf16.mxu0 %v2563_v0  ;;  %v2568_v5 = vld [vmem:[%s3362_s1 + $0x48] sm:$0xff]   ;;  %v2572_v9 = vld [vmem:[%s3362_s1 + $0x50] sm:$0xff]   ;;  %v104_v31 = vshrl.u32 %v103_v25, 7 }
   0x3   :  { %v2565_v2 = vld [vmem:[%s3361_s2] sm:$0xff]   ;;  %2290 = vmatprep.subr.bf16.mxu1 %v2564_v1  ;;  %v2569_v6 = vld [vmem:[%s3361_s2 + $0x8] sm:$0xff]   ;;  %v2573_v10 = vld [vmem:[%s3361_s2 + $0x10] sm:$0xff]   ;;  %v102_v30 = vunpack.c.0.s8 %v101_v24 }
   0x4   :  { %v2566_v3 = vld [vmem:[%s3362_s1] sm:$0xff]   ;;  %2269 = vmatpush3.bf16.msra.mxu0 %v2565_v2  ;;  %v2570_v7 = vld [vmem:[%s3362_s1 + $0x8] sm:$0xff]   ;;  %v2574_v11 = vld [vmem:[%s3362_s1 + $0x10] sm:$0xff]  }
   0x5   :  { %2291 = vmatpush3.bf16.msra.mxu1 %v2566_v3  ;;  %2270 = vmatprep.subr.bf16.mxu0 %v2567_v4  ;;  %v2575_v12 = vld [vmem:[%s3361_s2 + $0x58] sm:$0xff]   ;;  %v2579_v16 = vld [vmem:[%s3361_s2 + $0x60] sm:$0xff]   ;;  %v2583_v20 = vld [vmem:[%s3361_s2 + $0x68] sm:$0xff]   ;;  %v2854_v36 = vsub.s32 %v102_v30, %v104_v31 }
   0x6   :  { %2292 = vmatprep.subr.bf16.mxu1 %v2568_v5  ;;  %v2576_v13 = vld [vmem:[%s3362_s1 + $0x58] sm:$0xff]   ;;  %v2580_v17 = vld [vmem:[%s3362_s1 + $0x60] sm:$0xff]   ;;  %v2584_v21 = vld [vmem:[%s3362_s1 + $0x68] sm:$0xff]  }
   0x7   :  { %v2577_v14 = vld [vmem:[%s3361_s2 + $0x18] sm:$0xff]   ;;  %v2581_v18 = vld [vmem:[%s3361_s2 + $0x20] sm:$0xff]   ;;  %v2585_v22 = vld [vmem:[%s3361_s2 + $0x28] sm:$0xff]  }
   0x8   :  { %2271 = vmatpush3.bf16.msra.mxu0 %v2569_v6  ;;  %v2578_v15 = vld [vmem:[%s3362_s1 + $0x18] sm:$0xff]   ;;  %v2582_v19 = vld [vmem:[%s3362_s1 + $0x20] sm:$0xff]   ;;  %v2586_v26 = vld [vmem:[%s3362_s1 + $0x28] sm:$0xff]  }
   0x9   :  { %2293 = vmatpush3.bf16.msra.mxu1 %v2570_v7  ;;  %2272 = vmatprep.subr.bf16.mxu0 %v2571_v8  ;;  %v2587_v27 = vld [vmem:[%s3361_s2 + $0x70] sm:$0xff]   ;;  %v2591_v33 = vld [vmem:[%s3361_s2 + $0x78] sm:$0xff]   ;;  %v2083_v38 = vld.sshfl [vmem:[%s3363_s0 + $0x2] sm:$0x11 pattern:$0x75316420] }
   0xa   :  { %2294 = vmatprep.subr.bf16.mxu1 %v2572_v9  ;;  %v2588_v28 = vld [vmem:[%s3362_s1 + $0x70] sm:$0xff]   ;;  %v2592_v34 = vld [vmem:[%s3362_s1 + $0x78] sm:$0xff]   ;;  %v99_v39 = vcombine.high %v2083_v38, %v2083_v38  ;;  %v2100_v40 = vld.sshfl [vmem:[%s3363_s0] sm:$0x11 pattern:$0x75316420]  ;;  %v106_v43 = vrot.slane %v2083_v38, %v2854_v36 }
   0xb   :  { %v2589_v29 = vld [vmem:[%s3361_s2 + $0x30] sm:$0xff]   ;;  %v2593_v35 = vld [vmem:[%s3361_s2 + $0x38] sm:$0xff]   ;;  %v260_v42 = vcombine.high %v2100_v40, %v2100_v40  ;;  %v267_v45 = vrot.slane %v2100_v40, %v2854_v36  ;;  %v2595_v46 = vld [vmem:[%s3364_s4] sm:$0xff]  }
   0xc   :  { %2273 = vmatpush3.bf16.msra.mxu0 %v2573_v10  ;;  %v2590_v32 = vld [vmem:[%s3362_s1 + $0x30] sm:$0xff]   ;;  %v2594_v37 = vld [vmem:[%s3362_s1 + $0x38] sm:$0xff]   ;;  %v113_v44 = vrot.slane %v99_v39, %v2854_v36  ;;  %v2596_v48 = vld [vmem:[%s3364_s4 + $0x8] sm:$0xff]  }
   0xd   :  { %2295 = vmatpush3.bf16.msra.mxu1 %v2574_v11  ;;  %2274 = vmatprep.subr.bf16.mxu0 %v2575_v12  ;;  %v274_v47 = vrot.slane %v260_v42, %v2854_v36  ;;  %v2597_v49 = vld [vmem:[%s3364_s4 + $0x10] sm:$0xff]   ;;  %v2598_v50 = vld [vmem:[%s3364_s4 + $0x18] sm:$0xff]   ;;  %v2599_v51 = vld [vmem:[%s3364_s4 + $0x20] sm:$0xff]  }
   0xe   :  { %2296 = vmatprep.subr.bf16.mxu1 %v2576_v13  ;;  %244 = vmatprep.mubr.bf16.mxu0 %v113_v44  ;;  %v2600_v52 = vld [vmem:[%s3364_s4 + $0x28] sm:$0xff]   ;;  %v2601_v53 = vld [vmem:[%s3364_s4 + $0x30] sm:$0xff]   ;;  %v2602_v54 = vld [vmem:[%s3364_s4 + $0x38] sm:$0xff]  }
   0xf   :  { %405 = vmatprep.mubr.bf16.mxu1 %v274_v47  ;;  %v2603_v55 = vld [vmem:[%s3361_s2 + $0x40] sm:$0xff]   ;;  %v2606_v58 = vld [vmem:[%s3361_s2 + $0x48] sm:$0xff]   ;;  %v2610_v60 = vld [vmem:[%s3361_s2 + $0x50] sm:$0xff]  }
  0x10   :  { %2275 = vmatpush3.bf16.msra.mxu0 %v2577_v14  ;;  %v2604_v56 = vld [vmem:[%s3361_s2] sm:$0xff]   ;;  %v2608_v59 = vld [vmem:[%s3361_s2 + $0x8] sm:$0xff]   ;;  %v2612_v61 = vld [vmem:[%s3361_s2 + $0x10] sm:$0xff]  }
  0x11   :  { %2297 = vmatpush3.bf16.msra.mxu1 %v2578_v15  ;;  %2276 = vmatprep.subr.bf16.mxu0 %v2579_v16  ;;  %v2605_v57 = vld [vmem:[%s3362_s1 + $0x40] sm:$0xff]   ;;  %v2614_v62 = vld [vmem:[%s3361_s2 + $0x58] sm:$0xff]   ;;  %v2622_v2 = vld [vmem:[%s3361_s2 + $0x68] sm:$0xff]  }
  0x12   :  { %2298 = vmatprep.subr.bf16.mxu1 %v2580_v17  ;;  %v2616_v63 = vld [vmem:[%s3361_s2 + $0x18] sm:$0xff]   ;;  %v2618_v0 = vld [vmem:[%s3361_s2 + $0x60] sm:$0xff]   ;;  %v2624_v3 = vld [vmem:[%s3361_s2 + $0x28] sm:$0xff]  }
  0x13   :  { %v2620_v1 = vld [vmem:[%s3361_s2 + $0x20] sm:$0xff]   ;;  %v2626_v4 = vld [vmem:[%s3361_s2 + $0x70] sm:$0xff]   ;;  %v2630_v6 = vld [vmem:[%s3361_s2 + $0x78] sm:$0xff]  }
  0x14   :  { %2277 = vmatpush3.bf16.msra.mxu0 %v2581_v18  ;;  %v2628_v5 = vld [vmem:[%s3361_s2 + $0x30] sm:$0xff]   ;;  %v2129_v7 = vld.sshfl [vmem:[%s3363_s0 + $0x6] sm:$0x11 pattern:$0x75316420]  ;;  %v2632_v8 = vld [vmem:[%s3361_s2 + $0x38] sm:$0xff]  }
  0x15   :  { %2299 = vmatpush3.bf16.msra.mxu1 %v2582_v19  ;;  %2278 = vmatprep.subr.bf16.mxu0 %v2583_v20  ;;  %v612_v9 = vcombine.high %v2129_v7, %v2129_v7  ;;  %v619_v11 = vrot.slane %v2129_v7, %v2854_v36  ;;  %v2609_v31 = vld [vmem:[%s3362_s1 + $0x48] sm:$0xff]   ;;  %v2621_v38 = vld [vmem:[%s3362_s1 + $0x60] sm:$0xff]   ;;  %v2631_v44 = vld [vmem:[%s3362_s1 + $0x30] sm:$0xff]  }
  0x16   :  { %2300 = vmatprep.subr.bf16.mxu1 %v2584_v21  ;;  %v2146_v21 = vld.sshfl [vmem:[%s3363_s0 + $0x4] sm:$0x11 pattern:$0x75316420]  ;;  %v2625_v40 = vld [vmem:[%s3362_s1 + $0x68] sm:$0xff]  }
  0x17   :  { %v626_v10 = vrot.slane %v612_v9, %v2854_v36  ;;  %v773_v25 = vcombine.high %v2146_v21, %v2146_v21  ;;  %v2623_v39 = vld [vmem:[%s3362_s1 + $0x20] sm:$0xff]   ;;  %v2627_v42 = vld [vmem:[%s3362_s1 + $0x28] sm:$0xff]   ;;  %v780_v47 = vrot.slane %v2146_v21, %v2854_v36 }
  0x18   :  { %2279 = vmatpush3.bf16.msra.mxu0 %v2585_v22  ;;  %v2968_v22 = vld [vmem:[%s3365_s3] ss:$0 sm:$0xff]  ;;  %v2664_v9 = vld [vmem:[%s3361_s2 + $0x28] sm:$0xff]  }
  0x19   :  { %2301 = vmatpush3.bf16.msra.mxu1 %v2586_v26  ;;  %2280 = vmatprep.subr.bf16.mxu0 %v2587_v27  ;;  %v2660_v7 = vld [vmem:[%s3361_s2 + $0x20] sm:$0xff]  }
  0x1a   :  { %2302 = vmatprep.subr.bf16.mxu1 %v2588_v28  ;;  %v2607_v28 = vld [vmem:[%s3362_s1] sm:$0xff]  }
  0x1c   :  { %2281 = vmatpush3.bf16.msra.mxu0 %v2589_v29  ;;  %v787_v29 = vrot.slane %v773_v25, %v2854_v36 }
  0x1d   :  { %2303 = vmatpush3.bf16.msra.mxu1 %v2590_v32  ;;  %2282 = vmatprep.subr.bf16.mxu0 %v2591_v33  ;;  %v2611_v32 = vld [vmem:[%s3362_s1 + $0x8] sm:$0xff]   ;;  %v2613_v33 = vld [vmem:[%s3362_s1 + $0x50] sm:$0xff]  }
  0x1e   :  { %2304 = vmatprep.subr.bf16.mxu1 %v2592_v34  ;;  %v2615_v34 = vld [vmem:[%s3362_s1 + $0x10] sm:$0xff]  }
  0x20   :  { %2283 = vmatpush3.bf16.msra.mxu0 %v2593_v35  ;;  %v2617_v35 = vld [vmem:[%s3362_s1 + $0x58] sm:$0xff]  }
  0x21   :  { %2305 = vmatpush3.bf16.msra.mxu1 %v2594_v37  ;;  %2480 = vmatprep.subr.bf16.mxu0 %v2724_v41  ;;  %v2619_v37 = vld [vmem:[%s3362_s1 + $0x18] sm:$0xff]  }
  0x22   :  { %2321 = vmatprep.subr.bf16.mxu1 %v2603_v55  ;;  %v2640_v55 = vld [vmem:[%s3364_s4 + $0x28] sm:$0xff]  }
  0x23   :  { %245 = vmatmul.mubr.bf16.vlgmr.msra.gmra.mrb[0].mxu0 %v106_v43  ;;  %v2629_v43 = vld [vmem:[%s3362_s1 + $0x70] sm:$0xff]  }
  0x24   :  { %406 = vmatmul.mubr.bf16.vlgmr.msra.gmra.mrb[0].mxu1 %v267_v45  ;;  %2481 = vmatpush3.bf16.msra.mxu0 %v2595_v46  ;;  %v2633_v45 = vld [vmem:[%s3362_s1 + $0x78] sm:$0xff]  }
  0x25   :  { %2482 = vmatprep.subr.bf16.mxu0 %v2724_v41  ;;  %2322 = vmatpush3.bf16.msra.mxu1 %v2604_v56  ;;  %v2634_v46 = vld [vmem:[%s3362_s1 + $0x38] sm:$0xff]  }
  0x26   :  { %2496 = vmatprep.mubr.msk.bf16.mxu0 %vm2725_vm0, %v2724_v41  ;;  %2323 = vmatprep.subr.bf16.mxu1 %v2606_v58 }
  0x27   :  { %757 = vmatprep.mubr.bf16.mxu1 %v626_v10  ;;  %v2666_v10 = vld [vmem:[%s3361_s2 + $0x70] sm:$0xff]  }
  0x28   :  { %2483 = vmatpush3.bf16.msra.mxu0 %v2596_v48  ;;  %v2635_v48 = vld [vmem:[%s3364_s4] sm:$0xff]  }
  0x29   :  { %2484 = vmatprep.subr.bf16.mxu0 %v2724_v41  ;;  %2324 = vmatpush3.bf16.msra.mxu1 %v2608_v59  ;;  %v2641_v59 = vld [vmem:[%s3364_s4 + $0x30] sm:$0xff]  }
  0x2a   :  { %2325 = vmatprep.subr.bf16.mxu1 %v2610_v60  ;;  %v2642_v60 = vld [vmem:[%s3364_s4 + $0x38] sm:$0xff]  }
  0x2c   :  { %2485 = vmatpush3.bf16.msra.mxu0 %v2597_v49  ;;  %v2636_v49 = vld [vmem:[%s3364_s4 + $0x8] sm:$0xff]  }
  0x2d   :  { %2486 = vmatprep.subr.bf16.mxu0 %v2724_v41  ;;  %2326 = vmatpush3.bf16.msra.mxu1 %v2612_v61  ;;  %v2643_v61 = vld [vmem:[%s3361_s2 + $0x40] sm:$0xff]  }
  0x2e   :  { %2327 = vmatprep.subr.bf16.mxu1 %v2614_v62  ;;  %v2644_v62 = vld [vmem:[%s3361_s2] sm:$0xff]  }
  0x30   :  { %2487 = vmatpush3.bf16.msra.mxu0 %v2598_v50  ;;  %v2637_v50 = vld [vmem:[%s3364_s4 + $0x10] sm:$0xff]  }
  0x31   :  { %2488 = vmatprep.subr.bf16.mxu0 %v2724_v41  ;;  %2328 = vmatpush3.bf16.msra.mxu1 %v2616_v63  ;;  %v2645_v63 = vld [vmem:[%s3362_s1 + $0x40] sm:$0xff]  }
  0x32   :  { %2329 = vmatprep.subr.bf16.mxu1 %v2618_v0  ;;  %v2646_v0 = vld [vmem:[%s3361_s2 + $0x48] sm:$0xff]  }
  0x34   :  { %2489 = vmatpush3.bf16.msra.mxu0 %v2599_v51  ;;  %v2638_v51 = vld [vmem:[%s3364_s4 + $0x18] sm:$0xff]  }
  0x35   :  { %2490 = vmatprep.subr.bf16.mxu0 %v2724_v41  ;;  %2330 = vmatpush3.bf16.msra.mxu1 %v2620_v1  ;;  %v2648_v1 = vld [vmem:[%s3361_s2 + $0x8] sm:$0xff]  }
  0x36   :  { %2331 = vmatprep.subr.bf16.mxu1 %v2622_v2  ;;  %v2650_v2 = vld [vmem:[%s3361_s2 + $0x50] sm:$0xff]  }
  0x38   :  { %2491 = vmatpush3.bf16.msra.mxu0 %v2600_v52  ;;  %v2639_v52 = vld [vmem:[%s3364_s4 + $0x20] sm:$0xff]  }
  0x39   :  { %2492 = vmatprep.subr.bf16.mxu0 %v2724_v41  ;;  %2332 = vmatpush3.bf16.msra.mxu1 %v2624_v3  ;;  %v2652_v3 = vld [vmem:[%s3361_s2 + $0x10] sm:$0xff]  }
  0x3a   :  { %2333 = vmatprep.subr.bf16.mxu1 %v2626_v4  ;;  %v2654_v4 = vld [vmem:[%s3361_s2 + $0x58] sm:$0xff]  }
  0x3c   :  { %2493 = vmatpush3.bf16.msra.mxu0 %v2601_v53 }
  0x3d   :  { %2494 = vmatprep.subr.bf16.mxu0 %v2724_v41  ;;  %2334 = vmatpush3.bf16.msra.mxu1 %v2628_v5  ;;  %v2656_v5 = vld [vmem:[%s3361_s2 + $0x18] sm:$0xff]  }
  0x3e   :  { %2335 = vmatprep.subr.bf16.mxu1 %v2630_v6  ;;  %v2658_v6 = vld [vmem:[%s3361_s2 + $0x60] sm:$0xff]  }
  0x40   :  { %2495 = vmatpush3.bf16.msra.mxu0 %v2602_v54 }
  0x41   :  { %2343 = vmatprep.subr.bf16.mxu0 %v2605_v57  ;;  %2336 = vmatpush3.bf16.msra.mxu1 %v2632_v8  ;;  %v2662_v8 = vld [vmem:[%s3361_s2 + $0x68] sm:$0xff]  }
  0x42   :  { %2500 = vmatprep.subr.bf16.mxu1 %v2724_v41 }
  0x44   :  { %758 = vmatmul.mubr.bf16.vlgmr.msra.gmra.mrb[4].mxu1 %v619_v11  ;;  %v2668_v11 = vld [vmem:[%s3361_s2 + $0x30] sm:$0xff]  }
  0x45   :  { %2516 = vmatprep.mubr.msk.bf16.mxu1 %vm2725_vm0, %v2724_v41  ;;  %2501 = vmatpush3.bf16.msra.mxu1 %v2635_v48  ;;  %v2663_v48 = vld [vmem:[%s3362_s1 + $0x20] sm:$0xff]  }
  0x46   :  { %2502 = vmatprep.subr.bf16.mxu1 %v2724_v41 }
  0x49   :  { %2503 = vmatpush3.bf16.msra.mxu1 %v2636_v49  ;;  %v2665_v49 = vld [vmem:[%s3362_s1 + $0x68] sm:$0xff]  }
  0x4a   :  { %2504 = vmatprep.subr.bf16.mxu1 %v2724_v41 }
  0x4d   :  { %2505 = vmatpush3.bf16.msra.mxu1 %v2637_v50  ;;  %v2667_v50 = vld [vmem:[%s3362_s1 + $0x28] sm:$0xff]  }
  0x4e   :  { %2506 = vmatprep.subr.bf16.mxu1 %v2724_v41 }
  0x51   :  { %2507 = vmatpush3.bf16.msra.mxu1 %v2638_v51  ;;  %v2669_v51 = vld [vmem:[%s3362_s1 + $0x70] sm:$0xff]  }
  0x52   :  { %2508 = vmatprep.subr.bf16.mxu1 %v2724_v41 }
  0x55   :  { %2509 = vmatpush3.bf16.msra.mxu1 %v2639_v52  ;;  %v2671_v52 = vld [vmem:[%s3362_s1 + $0x30] sm:$0xff]  }
  0x56   :  { %2510 = vmatprep.subr.bf16.mxu1 %v2724_v41 }
  0x59   :  { %2511 = vmatpush3.bf16.msra.mxu1 %v2640_v55 }
  0x5a   :  { %2512 = vmatprep.subr.bf16.mxu1 %v2724_v41 }
  0x5d   :  { %2513 = vmatpush3.bf16.msra.mxu1 %v2641_v59  ;;  %v2678_v59 = vld [vmem:[%s3364_s4 + $0x18] sm:$0xff]  }
  0x5e   :  { %2514 = vmatprep.subr.bf16.mxu1 %v2724_v41 }
  0x61   :  { %2515 = vmatpush3.bf16.msra.mxu1 %v2642_v60  ;;  %v2679_v60 = vld [vmem:[%s3364_s4 + $0x20] sm:$0xff]  }
  0x62   :  { %2396 = vmatprep.subr.bf16.mxu1 %v2645_v63  ;;  %v2680_v63 = vld [vmem:[%s3364_s4 + $0x28] sm:$0xff]  }
  0xf6   :  { %v2284_v12 = vpop.f32.mrb[0].mxu0 }
  0xf7   :  { %v2306_v13 = vpop.f32.mrb[0].mxu1  ;;  %v2285_v14 = vpop.f32.mrb[1].mxu0 }
  0xf8   :  { %v2286_v15 = vadd.f32 %v2285_v14, %v2284_v12  ;;  %v2307_v16 = vpop.f32.mrb[1].mxu1  ;;  %v2287_v17 = vpop.f32.mrb[2].mxu0  ;;  %v2670_v12 = vld [vmem:[%s3361_s2 + $0x78] sm:$0xff]  }
  0xf9   :  { %v2308_v18 = vadd.f32 %v2307_v16, %v2306_v13  ;;  %v2309_v19 = vpop.f32.mrb[2].mxu1  ;;  %v2288_v20 = vpop.f32.mrb[3].mxu0  ;;  %v2176_v13 = vld.sshfl [vmem:[%s3363_s0 + $0xa] sm:$0x11 pattern:$0x75316420] }
  0xfa   :  { %v2310_v23 = vpop.f32.mrb[3].mxu1  ;;  %v2672_v14 = vld [vmem:[%s3361_s2 + $0x38] sm:$0xff]   ;;  %v1133_v17 = vrot.slane %v2176_v13, %v2854_v36 }
  0xfb   :  { %v408_v24 = vadd.f32 %v2308_v18, %v2286_v15  ;;  %v1126_v15 = vcombine.high %v2176_v13, %v2176_v13  ;;  %v3113_v18 = vld [vmem:[%s3366_s5] ss:$0 sm:$0xff]  ;;  %v2696_v13 = vld [vmem:[%s3361_s2 + $0x18] sm:$0xff]  }
  0xfd   :  { %v420_v26 = vadd.f32 %v2968_v22, %v408_v24  ;;  %v1140_v16 = vrot.slane %v1126_v15, %v2854_v36  ;;  %v2700_v15 = vld [vmem:[%s3361_s2 + $0x20] sm:$0xff]  }
  0xff   :  { %v421_v27 = vmax.f32 %v420_v26, 0.0 }
 0x101   :  { %v422_v30 = vpack.c.bf16 %v421_v27, %v421_v27 }
 0x103   :  { %2497 = vmatmul.mubr.bf16.vlgmr.msra.gmra.mrb[4].mxu0 %v422_v30  ;;  %v2193_v30 = vld.sshfl [vmem:[%s3363_s0 + $0x8] sm:$0x11 pattern:$0x75316420] }
 0x104   :  { %2344 = vmatpush3.bf16.msra.mxu0 %v2607_v28  ;;  %918 = vmatprep.mubr.bf16.mxu0 %v787_v29  ;;  %v1294_v55 = vrot.slane %v2193_v30, %v2854_v36 }
 0x105   :  { %2345 = vmatprep.subr.bf16.mxu0 %v2609_v31 }
 0x108   :  { %2346 = vmatpush3.bf16.msra.mxu0 %v2611_v32 }
 0x109   :  { %2347 = vmatprep.subr.bf16.mxu0 %v2613_v33  ;;  %v1287_v33 = vcombine.high %v2193_v30, %v2193_v30 }
 0x10c   :  { %2348 = vmatpush3.bf16.msra.mxu0 %v2615_v34 }
 0x10d   :  { %2349 = vmatprep.subr.bf16.mxu0 %v2617_v35 }
 0x110   :  { %2350 = vmatpush3.bf16.msra.mxu0 %v2619_v37  ;;  %v2647_v37 = vld [vmem:[%s3362_s1] sm:$0xff]  }
 0x111   :  { %2351 = vmatprep.subr.bf16.mxu0 %v2621_v38  ;;  %v1301_v38 = vrot.slane %v1287_v33, %v2854_v36 }
 0x114   :  { %2352 = vmatpush3.bf16.msra.mxu0 %v2623_v39 }
 0x115   :  { %2353 = vmatprep.subr.bf16.mxu0 %v2625_v40  ;;  %v2649_v40 = vld [vmem:[%s3362_s1 + $0x48] sm:$0xff]  }
 0x117   :  { %v2337_v53 = vpop.f32.mrb[4].mxu1 }
 0x118   :  { %2354 = vmatpush3.bf16.msra.mxu0 %v2627_v42  ;;  %v2338_v54 = vpop.f32.mrb[5].mxu1  ;;  %v2651_v42 = vld [vmem:[%s3362_s1 + $0x8] sm:$0xff]  }
 0x119   :  { %2355 = vmatprep.subr.bf16.mxu0 %v2629_v43  ;;  %v3041_v56 = vadd.f32 %v2338_v54, %v2337_v53  ;;  %v2340_v57 = vpop.f32.mrb[6].mxu1  ;;  %v2653_v43 = vld [vmem:[%s3362_s1 + $0x50] sm:$0xff]   ;;  %v2673_v53 = vld [vmem:[%s3362_s1 + $0x78] sm:$0xff]  }
 0x11a   :  { %v2341_v58 = vpop.f32.mrb[7].mxu1  ;;  %v2674_v54 = vld [vmem:[%s3362_s1 + $0x38] sm:$0xff]   ;;  %v2676_v57 = vld [vmem:[%s3364_s4 + $0x8] sm:$0xff]  }
 0x11b   :  { %v2677_v58 = vld [vmem:[%s3364_s4 + $0x10] sm:$0xff]  }
 0x11c   :  { %2356 = vmatpush3.bf16.msra.mxu0 %v2631_v44  ;;  %v2655_v44 = vld [vmem:[%s3362_s1 + $0x10] sm:$0xff]  }
 0x11d   :  { %2357 = vmatprep.subr.bf16.mxu0 %v2633_v45  ;;  %v2657_v45 = vld [vmem:[%s3362_s1 + $0x58] sm:$0xff]  }
 0x120   :  { %2358 = vmatpush3.bf16.msra.mxu0 %v2634_v46  ;;  %v2659_v46 = vld [vmem:[%s3362_s1 + $0x18] sm:$0xff]  }
 0x121   :  { %2374 = vmatprep.subr.bf16.mxu0 %v2643_v61 }
 0x123   :  { %919 = vmatmul.mubr.bf16.vlgmr.msra.gmra.mrb[8].mxu0 %v780_v47  ;;  %v2661_v47 = vld [vmem:[%s3362_s1 + $0x60] sm:$0xff]  }
 0x124   :  { %2375 = vmatpush3.bf16.msra.mxu0 %v2644_v62  ;;  %1271 = vmatprep.mubr.bf16.mxu0 %v1140_v16  ;;  %v2702_v16 = vld [vmem:[%s3361_s2 + $0x68] sm:$0xff]  }
 0x125   :  { %2376 = vmatprep.subr.bf16.mxu0 %v2646_v0 }
 0x128   :  { %2377 = vmatpush3.bf16.msra.mxu0 %v2648_v1 }
 0x129   :  { %2378 = vmatprep.subr.bf16.mxu0 %v2650_v2 }
 0x12c   :  { %2379 = vmatpush3.bf16.msra.mxu0 %v2652_v3  ;;  %v2681_v3 = vld [vmem:[%s3364_s4 + $0x30] sm:$0xff]  }
 0x12d   :  { %2380 = vmatprep.subr.bf16.mxu0 %v2654_v4  ;;  %v2682_v4 = vld [vmem:[%s3364_s4 + $0x38] sm:$0xff]  }
 0x130   :  { %2381 = vmatpush3.bf16.msra.mxu0 %v2656_v5  ;;  %v2683_v5 = vld [vmem:[%s3361_s2 + $0x40] sm:$0xff]  }
 0x131   :  { %2382 = vmatprep.subr.bf16.mxu0 %v2658_v6  ;;  %v2684_v6 = vld [vmem:[%s3361_s2] sm:$0xff]  }
 0x134   :  { %2383 = vmatpush3.bf16.msra.mxu0 %v2660_v7  ;;  %v2685_v7 = vld [vmem:[%s3362_s1 + $0x40] sm:$0xff]  }
 0x135   :  { %2384 = vmatprep.subr.bf16.mxu0 %v2662_v8  ;;  %v2686_v8 = vld [vmem:[%s3361_s2 + $0x48] sm:$0xff]  }
 0x138   :  { %2385 = vmatpush3.bf16.msra.mxu0 %v2664_v9  ;;  %v2688_v9 = vld [vmem:[%s3361_s2 + $0x8] sm:$0xff]  }
 0x139   :  { %2386 = vmatprep.subr.bf16.mxu0 %v2666_v10  ;;  %v2690_v10 = vld [vmem:[%s3361_s2 + $0x50] sm:$0xff]  }
 0x13c   :  { %2387 = vmatpush3.bf16.msra.mxu0 %v2668_v11  ;;  %v2692_v11 = vld [vmem:[%s3361_s2 + $0x10] sm:$0xff]  }
 0x13d   :  { %2388 = vmatprep.subr.bf16.mxu0 %v2670_v12  ;;  %v2694_v12 = vld [vmem:[%s3361_s2 + $0x58] sm:$0xff]  }
 0x140   :  { %2389 = vmatpush3.bf16.msra.mxu0 %v2672_v14  ;;  %v2698_v14 = vld [vmem:[%s3361_s2 + $0x60] sm:$0xff]  }
 0x141   :  { %2520 = vmatprep.subr.bf16.mxu0 %v2724_v41 }
 0x143   :  { %1272 = vmatmul.mubr.bf16.vlgmr.msra.gmra.mrb[12].mxu0 %v1133_v17  ;;  %v2704_v17 = vld [vmem:[%s3361_s2 + $0x28] sm:$0xff]  }
 0x144   :  { %2536 = vmatprep.mubr.msk.bf16.mxu0 %vm2725_vm0, %v2724_v41 }
 0x1d6   :  { %v528_v19 = vpop.f32.mrb[4].mxu0 }
 0x1d7   :  { %v529_v20 = vadd.f32 %v3113_v18, %v528_v19  ;;  %v2498_v21 = vpop.f32.mrb[5].mxu0  ;;  %v2706_v19 = vld [vmem:[%s3361_s2 + $0x70] sm:$0xff]  }
 0x1d8   :  { %v531_v23 = vpop.f32.mrb[6].mxu0  ;;  %v2710_v21 = vld [vmem:[%s3361_s2 + $0x78] sm:$0xff]  }
 0x1d9   :  { %v534_v24 = vmax.f32 %v529_v20, 0.0  ;;  %v2499_v25 = vpop.f32.mrb[7].mxu0  ;;  %v2708_v20 = vld [vmem:[%s3361_s2 + $0x30] sm:$0xff]  }
 0x1da   :  { %v2223_v23 = vld.sshfl [vmem:[%s3363_s0 + $0xe] sm:$0x11 pattern:$0x75316420] }
 0x1db   :  { %535 = vst [vmem:[%s3367_s6] sm:$0x3] %v534_v24  ;;  %v2712_v24 = vld [vmem:[%s3361_s2 + $0x38] sm:$0xff]   ;;  %v1640_v25 = vcombine.high %v2223_v23, %v2223_v23 }
 0x1f6   :  { %v2359_v26 = vpop.f32.mrb[8].mxu0 }
 0x1f7   :  { %v2360_v27 = vpop.f32.mrb[9].mxu0 }
 0x1f8   :  { %v2361_v28 = vadd.f32 %v2360_v27, %v2359_v26  ;;  %v2362_v29 = vpop.f32.mrb[10].mxu0  ;;  %v1654_v26 = vrot.slane %v1640_v25, %v2854_v36  ;;  %v1647_v27 = vrot.slane %v2223_v23, %v2854_v36 }
 0x1f9   :  { %v2363_v31 = vpop.f32.mrb[11].mxu0 }
 0x1fa   :  { %v921_v32 = vadd.f32 %v2361_v28, %v3041_v56  ;;  %v2675_v56 = vld [vmem:[%s3364_s4] sm:$0xff]  }
 0x1fb   :  { %2521 = vmatpush3.bf16.msra.mxu0 %v2675_v56  ;;  %v2705_v56 = vld [vmem:[%s3362_s1 + $0x68] sm:$0xff]  }
 0x1fc   :  { %v933_v34 = vadd.f32 %v2968_v22, %v921_v32  ;;  %2522 = vmatprep.subr.bf16.mxu0 %v2724_v41 }
 0x1fe   :  { %v934_v35 = vmax.f32 %v933_v34, 0.0 }
 0x1ff   :  { %2523 = vmatpush3.bf16.msra.mxu0 %v2676_v57  ;;  %v2707_v57 = vld [vmem:[%s3362_s1 + $0x28] sm:$0xff]  }
 0x200   :  { %v935_v39 = vpack.c.bf16 %v934_v35, %v934_v35  ;;  %2524 = vmatprep.subr.bf16.mxu0 %v2724_v41 }
 0x202   :  { %2517 = vmatmul.mubr.bf16.vlgmr.msra.gmra.mrb[8].mxu1 %v935_v39  ;;  %v2240_v39 = vld.sshfl [vmem:[%s3363_s0 + $0xc] sm:$0x11 pattern:$0x75316420] }
 0x203   :  { %2397 = vmatpush3.bf16.msra.mxu1 %v2647_v37  ;;  %1432 = vmatprep.mubr.bf16.mxu1 %v1301_v38 }
 0x204   :  { %2398 = vmatprep.subr.bf16.mxu1 %v2649_v40  ;;  %2525 = vmatpush3.bf16.msra.mxu0 %v2677_v58  ;;  %v2709_v58 = vld [vmem:[%s3362_s1 + $0x70] sm:$0xff]  }
 0x205   :  { %2526 = vmatprep.subr.bf16.mxu0 %v2724_v41 }
 0x207   :  { %2399 = vmatpush3.bf16.msra.mxu1 %v2651_v42 }
 0x208   :  { %2400 = vmatprep.subr.bf16.mxu1 %v2653_v43  ;;  %2527 = vmatpush3.bf16.msra.mxu0 %v2678_v59  ;;  %v1801_v43 = vcombine.high %v2240_v39, %v2240_v39  ;;  %v2711_v59 = vld [vmem:[%s3362_s1 + $0x30] sm:$0xff]  }
 0x209   :  { %2528 = vmatprep.subr.bf16.mxu0 %v2724_v41 }
 0x20b   :  { %2401 = vmatpush3.bf16.msra.mxu1 %v2655_v44 }
 0x20c   :  { %2402 = vmatprep.subr.bf16.mxu1 %v2657_v45  ;;  %2529 = vmatpush3.bf16.msra.mxu0 %v2679_v60  ;;  %v2713_v60 = vld [vmem:[%s3362_s1 + $0x78] sm:$0xff]  }
 0x20d   :  { %2530 = vmatprep.subr.bf16.mxu0 %v2724_v41 }
 0x20f   :  { %2403 = vmatpush3.bf16.msra.mxu1 %v2659_v46  ;;  %v2687_v46 = vld [vmem:[%s3362_s1] sm:$0xff]  }
 0x210   :  { %2404 = vmatprep.subr.bf16.mxu1 %v2661_v47  ;;  %2531 = vmatpush3.bf16.msra.mxu0 %v2680_v63  ;;  %v1815_v47 = vrot.slane %v1801_v43, %v2854_v36  ;;  %v2715_v63 = vld [vmem:[%s3364_s4] sm:$0xff]  }
 0x211   :  { %2532 = vmatprep.subr.bf16.mxu0 %v2724_v41 }
 0x213   :  { %2405 = vmatpush3.bf16.msra.mxu1 %v2663_v48 }
 0x214   :  { %2406 = vmatprep.subr.bf16.mxu1 %v2665_v49  ;;  %2533 = vmatpush3.bf16.msra.mxu0 %v2681_v3  ;;  %v2689_v49 = vld [vmem:[%s3362_s1 + $0x48] sm:$0xff]  }
 0x215   :  { %2534 = vmatprep.subr.bf16.mxu0 %v2724_v41 }
 0x216   :  { %v2390_v61 = vpop.f32.mrb[12].mxu0 }
 0x217   :  { %2407 = vmatpush3.bf16.msra.mxu1 %v2667_v50  ;;  %v2391_v62 = vpop.f32.mrb[13].mxu0  ;;  %v2691_v50 = vld [vmem:[%s3362_s1 + $0x8] sm:$0xff]  }
 0x218   :  { %2408 = vmatprep.subr.bf16.mxu1 %v2669_v51  ;;  %v3194_v0 = vadd.f32 %v2391_v62, %v2390_v61  ;;  %v2393_v1 = vpop.f32.mrb[14].mxu0  ;;  %2535 = vmatpush3.bf16.msra.mxu0 %v2682_v4  ;;  %v2695_v51 = vld [vmem:[%s3362_s1 + $0x10] sm:$0xff]   ;;  %v2714_v61 = vld [vmem:[%s3362_s1 + $0x38] sm:$0xff]   ;;  %v1808_v62 = vrot.slane %v2240_v39, %v2854_v36 }
 0x219   :  { %v2394_v2 = vpop.f32.mrb[15].mxu0  ;;  %2449 = vmatprep.subr.bf16.mxu0 %v2685_v7  ;;  %v2717_v1 = vld [vmem:[%s3364_s4 + $0x10] sm:$0xff]   ;;  %v2718_v36 = vld [vmem:[%s3364_s4 + $0x18] sm:$0xff]   ;;  %v2720_v7 = vld [vmem:[%s3364_s4 + $0x28] sm:$0xff]  }
 0x21a   :  { %v2719_v2 = vld [vmem:[%s3364_s4 + $0x20] sm:$0xff]  }
 0x21b   :  { %2409 = vmatpush3.bf16.msra.mxu1 %v2671_v52  ;;  %v2697_v52 = vld [vmem:[%s3362_s1 + $0x58] sm:$0xff]  }
 0x21c   :  { %2410 = vmatprep.subr.bf16.mxu1 %v2673_v53  ;;  %v2699_v53 = vld [vmem:[%s3362_s1 + $0x18] sm:$0xff]  }
 0x21f   :  { %2411 = vmatpush3.bf16.msra.mxu1 %v2674_v54  ;;  %v2701_v54 = vld [vmem:[%s3362_s1 + $0x60] sm:$0xff]  }
 0x220   :  { %2427 = vmatprep.subr.bf16.mxu1 %v2683_v5 }
 0x222   :  { %1433 = vmatmul.mubr.bf16.vlgmr.msra.gmra.mrb[12].mxu1 %v1294_v55  ;;  %v2703_v55 = vld [vmem:[%s3362_s1 + $0x20] sm:$0xff]  }
 0x223   :  { %2428 = vmatpush3.bf16.msra.mxu1 %v2684_v6  ;;  %1785 = vmatprep.mubr.bf16.mxu1 %v1654_v26 }
 0x224   :  { %2429 = vmatprep.subr.bf16.mxu1 %v2686_v8 }
 0x227   :  { %2430 = vmatpush3.bf16.msra.mxu1 %v2688_v9  ;;  %v2721_v9 = vld [vmem:[%s3364_s4 + $0x30] sm:$0xff]  }
 0x228   :  { %2431 = vmatprep.subr.bf16.mxu1 %v2690_v10  ;;  %v2722_v10 = vld [vmem:[%s3364_s4 + $0x38] sm:$0xff]  }
 0x22b   :  { %2432 = vmatpush3.bf16.msra.mxu1 %v2692_v11 }
 0x22c   :  { %2433 = vmatprep.subr.bf16.mxu1 %v2694_v12 }
 0x22f   :  { %2434 = vmatpush3.bf16.msra.mxu1 %v2696_v13 }
 0x230   :  { %2435 = vmatprep.subr.bf16.mxu1 %v2698_v14 }
 0x233   :  { %2436 = vmatpush3.bf16.msra.mxu1 %v2700_v15 }
 0x234   :  { %2437 = vmatprep.subr.bf16.mxu1 %v2702_v16 }
 0x237   :  { %2438 = vmatpush3.bf16.msra.mxu1 %v2704_v17 }
 0x238   :  { %2439 = vmatprep.subr.bf16.mxu1 %v2706_v19 }
 0x23b   :  { %2440 = vmatpush3.bf16.msra.mxu1 %v2708_v20 }
 0x23c   :  { %2441 = vmatprep.subr.bf16.mxu1 %v2710_v21  ;;  %v2257_v21 = vld [vmem:[%s3365_s3] ss:$0 sm:$0xff] }
 0x23f   :  { %2442 = vmatpush3.bf16.msra.mxu1 %v2712_v24 }
 0x240   :  { %2540 = vmatprep.subr.bf16.mxu1 %v2724_v41 }
 0x242   :  { %1786 = vmatmul.mubr.bf16.vlgmr.msra.gmra.mrb[16].mxu1 %v1647_v27 }
 0x243   :  { %2556 = vmatprep.mubr.msk.bf16.mxu1 %vm2725_vm0, %v2724_v41  ;;  %2541 = vmatpush3.bf16.msra.mxu1 %v2715_v63 }
 0x244   :  { %2542 = vmatprep.subr.bf16.mxu1 %v2724_v41 }
 0x2d5   :  { %v1041_v28 = vpop.f32.mrb[8].mxu1 }
 0x2d6   :  { %v1042_v29 = vadd.f32 %v3113_v18, %v1041_v28  ;;  %v2518_v30 = vpop.f32.mrb[9].mxu1 }
 0x2d7   :  { %v1044_v31 = vpop.f32.mrb[10].mxu1 }
 0x2d8   :  { %v1047_v32 = vmax.f32 %v1042_v29, 0.0  ;;  %v2519_v33 = vpop.f32.mrb[11].mxu1 }
 0x2da   :  { %2173 = vst [vmem:[%s3367_s6 + $0x2] sm:$0x3] %v1047_v32 }
 0x2f5   :  { %v2412_v34 = vpop.f32.mrb[12].mxu1 }
 0x2f6   :  { %v2413_v35 = vpop.f32.mrb[13].mxu1 }
 0x2f7   :  { %v2414_v37 = vadd.f32 %v2413_v35, %v2412_v34  ;;  %v2415_v38 = vpop.f32.mrb[14].mxu1 }
 0x2f8   :  { %v2416_v40 = vpop.f32.mrb[15].mxu1 }
 0x2f9   :  { %v1435_v42 = vadd.f32 %v2414_v37, %v3194_v0  ;;  %v2716_v0 = vld [vmem:[%s3364_s4 + $0x8] sm:$0xff]  }
 0x2fa   :  { %2543 = vmatpush3.bf16.msra.mxu1 %v2716_v0 }
 0x2fb   :  { %v1447_v44 = vadd.f32 %v2968_v22, %v1435_v42  ;;  %v2693_v22 = vld [vmem:[%s3362_s1 + $0x50] sm:$0xff]   ;;  %2544 = vmatprep.subr.bf16.mxu1 %v2724_v41 }
 0x2fd   :  { %v1448_v45 = vmax.f32 %v1447_v44, 0.0 }
 0x2fe   :  { %2545 = vmatpush3.bf16.msra.mxu1 %v2717_v1 }
 0x2ff   :  { %v1449_v48 = vpack.c.bf16 %v1448_v45, %v1448_v45  ;;  %2546 = vmatprep.subr.bf16.mxu1 %v2724_v41 }
 0x301   :  { %2537 = vmatmul.mubr.bf16.vlgmr.msra.gmra.mrb[16].mxu0 %v1449_v48 }
 0x302   :  { %2450 = vmatpush3.bf16.msra.mxu0 %v2687_v46  ;;  %1946 = vmatprep.mubr.bf16.mxu0 %v1815_v47 }
 0x303   :  { %2451 = vmatprep.subr.bf16.mxu0 %v2689_v49  ;;  %2547 = vmatpush3.bf16.msra.mxu1 %v2718_v36 }
 0x304   :  { %2548 = vmatprep.subr.bf16.mxu1 %v2724_v41 }
 0x306   :  { %2452 = vmatpush3.bf16.msra.mxu0 %v2691_v50 }
 0x307   :  { %2453 = vmatprep.subr.bf16.mxu0 %v2693_v22  ;;  %2549 = vmatpush3.bf16.msra.mxu1 %v2719_v2 }
 0x308   :  { %2550 = vmatprep.subr.bf16.mxu1 %v2724_v41 }
 0x30a   :  { %2454 = vmatpush3.bf16.msra.mxu0 %v2695_v51 }
 0x30b   :  { %2455 = vmatprep.subr.bf16.mxu0 %v2697_v52  ;;  %2551 = vmatpush3.bf16.msra.mxu1 %v2720_v7 }
 0x30c   :  { %2552 = vmatprep.subr.bf16.mxu1 %v2724_v41 }
 0x30e   :  { %2456 = vmatpush3.bf16.msra.mxu0 %v2699_v53 }
 0x30f   :  { %2457 = vmatprep.subr.bf16.mxu0 %v2701_v54  ;;  %2553 = vmatpush3.bf16.msra.mxu1 %v2721_v9 }
 0x310   :  { %2554 = vmatprep.subr.bf16.mxu1 %v2724_v41 }
 0x312   :  { %2458 = vmatpush3.bf16.msra.mxu0 %v2703_v55 }
 0x313   :  { %2459 = vmatprep.subr.bf16.mxu0 %v2705_v56  ;;  %2555 = vmatpush3.bf16.msra.mxu1 %v2722_v10 }
 0x315   :  { %v2443_v3 = vpop.f32.mrb[16].mxu1 }
 0x316   :  { %2460 = vmatpush3.bf16.msra.mxu0 %v2707_v57  ;;  %v2444_v4 = vpop.f32.mrb[17].mxu1 }
 0x317   :  { %2461 = vmatprep.subr.bf16.mxu0 %v2709_v58  ;;  %v2445_v5 = vadd.f32 %v2444_v4, %v2443_v3  ;;  %v2446_v6 = vpop.f32.mrb[18].mxu1 }
 0x318   :  { %v2447_v8 = vpop.f32.mrb[19].mxu1 }
 0x31a   :  { %2462 = vmatpush3.bf16.msra.mxu0 %v2711_v59 }
 0x31b   :  { %2463 = vmatprep.subr.bf16.mxu0 %v2713_v60 }
 0x31e   :  { %2464 = vmatpush3.bf16.msra.mxu0 %v2714_v61 }
 0x321   :  { %1947 = vmatmul.mubr.bf16.vlgmr.msra.gmra.mrb[20].mxu0 %v1808_v62 }
 0x3d4   :  { %v1555_v11 = vpop.f32.mrb[16].mxu0 }
 0x3d5   :  { %v1556_v12 = vadd.f32 %v3113_v18, %v1555_v11  ;;  %v2538_v13 = vpop.f32.mrb[17].mxu0 }
 0x3d6   :  { %v1558_v14 = vpop.f32.mrb[18].mxu0 }
 0x3d7   :  { %v1561_v15 = vmax.f32 %v1556_v12, 0.0  ;;  %v2539_v16 = vpop.f32.mrb[19].mxu0 }
 0x3d9   :  { %2220 = vst [vmem:[%s3367_s6 + $0x4] sm:$0x3] %v1561_v15 }
 0x3f4   :  { %v2465_v17 = vpop.f32.mrb[20].mxu0 }
 0x3f5   :  { %v2466_v19 = vpop.f32.mrb[21].mxu0 }
 0x3f6   :  { %v2467_v20 = vadd.f32 %v2466_v19, %v2465_v17  ;;  %v2468_v41 = vpop.f32.mrb[22].mxu0 }
 0x3f7   :  { %v2469_v23 = vpop.f32.mrb[23].mxu0 }
 0x3f8   :  { %v1949_v24 = vadd.f32 %v2467_v20, %v2445_v5 }
 0x3fa   :  { %v1961_v25 = vadd.f32 %v2257_v21, %v1949_v24 }
 0x3fc   :  { %v1962_v26 = vmax.f32 %v1961_v25, 0.0 }
 0x3fe   :  { %v1963_v27 = vpack.c.bf16 %v1962_v26, %v1962_v26 }
 0x400   :  { %2557 = vmatmul.mubr.bf16.vlgmr.msra.gmra.mrb[20].mxu1 %v1963_v27 }
 0x4d3   :  { %v2069_v28 = vpop.f32.mrb[20].mxu1 }
 0x4d4   :  { %v2070_v29 = vadd.f32 %v3113_v18, %v2069_v28  ;;  %v2558_v30 = vpop.f32.mrb[21].mxu1 }
 0x4d5   :  { %v2072_v31 = vpop.f32.mrb[22].mxu1 }
 0x4d6   :  { %v2075_v32 = vmax.f32 %v2070_v29, 0.0  ;;  %v2559_v33 = vpop.f32.mrb[23].mxu1 }
 0x4d8   :  { %2267 = vst [vmem:[%s3367_s6 + $0x6] sm:$0x3] %v2075_v32 }

// kernel: backbone_base_forward.5
= control target key start
LH: loop header
LB: loop body
LE: loop exit
PB: predicated region body
PF: predicated region fallthrough
CT: control target
= control target key end

     0   :  { %s4800_s2 = inlined_call_operand.vmem [shape: bf16[256,128], index: 2, kind: input, shape index: {}]   ;;  %s4801_s1 = inlined_call_operand.vmem [shape: bf16[256,128], index: 1, kind: input, shape index: {}]   ;;  %s4802_s0 = inlined_call_operand.vmem [shape: bf16[16,4,256], index: 0, kind: input, shape index: {}]   ;;  %s4803_s3 = inlined_call_operand.vmem [shape: f32[1,128], index: 3, kind: input, shape index: {}]   ;;  %s4804_s4 = inlined_call_operand.vmem [shape: bf16[8,4,128], index: 4, kind: output, shape index: {}]  }
   0x1   :  { %v3666_v0 = vld [vmem:[%s4800_s2 + $0x40] sm:$0xff]   ;;  %v3670_v4 = vld [vmem:[%s4800_s2 + $0x48] sm:$0xff]   ;;  %v3674_v8 = vld [vmem:[%s4800_s2 + $0x50] sm:$0xff]  }
   0x2   :  { %v3667_v1 = vld [vmem:[%s4801_s1 + $0x40] sm:$0xff]   ;;  %3314 = vmatprep.subr.bf16.mxu0 %v3666_v0  ;;  %v3671_v5 = vld [vmem:[%s4801_s1 + $0x48] sm:$0xff]   ;;  %v3675_v9 = vld [vmem:[%s4801_s1 + $0x50] sm:$0xff]  }
   0x3   :  { %v3668_v2 = vld [vmem:[%s4800_s2] sm:$0xff]   ;;  %3336 = vmatprep.subr.bf16.mxu1 %v3667_v1  ;;  %v3672_v6 = vld [vmem:[%s4800_s2 + $0x8] sm:$0xff]   ;;  %v3676_v10 = vld [vmem:[%s4800_s2 + $0x10] sm:$0xff]  }
   0x4   :  { %v3669_v3 = vld [vmem:[%s4801_s1] sm:$0xff]   ;;  %3315 = vmatpush3.bf16.msra.mxu0 %v3668_v2  ;;  %v3673_v7 = vld [vmem:[%s4801_s1 + $0x8] sm:$0xff]   ;;  %v3677_v11 = vld [vmem:[%s4801_s1 + $0x10] sm:$0xff]  }
   0x5   :  { %3337 = vmatpush3.bf16.msra.mxu1 %v3669_v3  ;;  %3316 = vmatprep.subr.bf16.mxu0 %v3670_v4  ;;  %v3678_v12 = vld [vmem:[%s4800_s2 + $0x58] sm:$0xff]   ;;  %v3682_v16 = vld [vmem:[%s4800_s2 + $0x60] sm:$0xff]   ;;  %v3686_v20 = vld [vmem:[%s4800_s2 + $0x68] sm:$0xff]  }
   0x6   :  { %3338 = vmatprep.subr.bf16.mxu1 %v3671_v5  ;;  %v3679_v13 = vld [vmem:[%s4801_s1 + $0x58] sm:$0xff]   ;;  %v3683_v17 = vld [vmem:[%s4801_s1 + $0x60] sm:$0xff]   ;;  %v3687_v21 = vld [vmem:[%s4801_s1 + $0x68] sm:$0xff]  }
   0x7   :  { %v3680_v14 = vld [vmem:[%s4800_s2 + $0x18] sm:$0xff]   ;;  %v3684_v18 = vld [vmem:[%s4800_s2 + $0x20] sm:$0xff]   ;;  %v3688_v22 = vld [vmem:[%s4800_s2 + $0x28] sm:$0xff]  }
   0x8   :  { %3317 = vmatpush3.bf16.msra.mxu0 %v3672_v6  ;;  %v3681_v15 = vld [vmem:[%s4801_s1 + $0x18] sm:$0xff]   ;;  %v3685_v19 = vld [vmem:[%s4801_s1 + $0x20] sm:$0xff]   ;;  %v3689_v23 = vld [vmem:[%s4801_s1 + $0x28] sm:$0xff]  }
   0x9   :  { %3339 = vmatpush3.bf16.msra.mxu1 %v3673_v7  ;;  %3318 = vmatprep.subr.bf16.mxu0 %v3674_v8  ;;  %v3690_v24 = vld [vmem:[%s4800_s2 + $0x70] sm:$0xff]   ;;  %v3694_v28 = vld [vmem:[%s4800_s2 + $0x78] sm:$0xff]   ;;  %v3013_v32 = vld.sshfl [vmem:[%s4802_s0 + $0x4] sm:$0x33 pattern:$0x76325410] }
   0xa   :  { %3340 = vmatprep.subr.bf16.mxu1 %v3675_v9  ;;  %v3691_v25 = vld [vmem:[%s4801_s1 + $0x70] sm:$0xff]   ;;  %v3695_v29 = vld [vmem:[%s4801_s1 + $0x78] sm:$0xff]   ;;  %v93_v33 = vcombine.high %v3013_v32, %v3013_v32  ;;  %v3030_v34 = vld.sshfl [vmem:[%s4802_s0] sm:$0x33 pattern:$0x76325410] }
   0xb   :  { %v3692_v26 = vld [vmem:[%s4800_s2 + $0x30] sm:$0xff]   ;;  %v3696_v30 = vld [vmem:[%s4800_s2 + $0x38] sm:$0xff]   ;;  %v240_v35 = vcombine.high %v3030_v34, %v3030_v34  ;;  %v3698_v36 = vld [vmem:[%s4800_s2 + $0x40] sm:$0xff]  }
   0xc   :  { %3319 = vmatpush3.bf16.msra.mxu0 %v3676_v10  ;;  %v3693_v27 = vld [vmem:[%s4801_s1 + $0x30] sm:$0xff]   ;;  %v3697_v31 = vld [vmem:[%s4801_s1 + $0x38] sm:$0xff]   ;;  %224 = vmatprep.mubr.bf16.mxu0 %v93_v33  ;;  %v3699_v37 = vld [vmem:[%s4801_s1 + $0x40] sm:$0xff]  }
   0xd   :  { %3341 = vmatpush3.bf16.msra.mxu1 %v3677_v11  ;;  %3320 = vmatprep.subr.bf16.mxu0 %v3678_v12  ;;  %v3700_v38 = vld [vmem:[%s4800_s2] sm:$0xff]   ;;  %v3702_v40 = vld [vmem:[%s4800_s2 + $0x48] sm:$0xff]   ;;  %v3706_v44 = vld [vmem:[%s4800_s2 + $0x50] sm:$0xff]  }
   0xe   :  { %3342 = vmatprep.subr.bf16.mxu1 %v3679_v13  ;;  %371 = vmatprep.mubr.bf16.mxu1 %v240_v35  ;;  %v3701_v39 = vld [vmem:[%s4801_s1] sm:$0xff]   ;;  %v3703_v41 = vld [vmem:[%s4801_s1 + $0x48] sm:$0xff]   ;;  %v3707_v45 = vld [vmem:[%s4801_s1 + $0x50] sm:$0xff]  }
   0xf   :  { %v3704_v42 = vld [vmem:[%s4800_s2 + $0x8] sm:$0xff]   ;;  %v3708_v46 = vld [vmem:[%s4800_s2 + $0x10] sm:$0xff]   ;;  %v3710_v48 = vld [vmem:[%s4800_s2 + $0x58] sm:$0xff]  }
  0x10   :  { %3321 = vmatpush3.bf16.msra.mxu0 %v3680_v14  ;;  %v3705_v43 = vld [vmem:[%s4801_s1 + $0x8] sm:$0xff]   ;;  %v3709_v47 = vld [vmem:[%s4801_s1 + $0x10] sm:$0xff]   ;;  %v3711_v49 = vld [vmem:[%s4801_s1 + $0x58] sm:$0xff]  }
  0x11   :  { %3343 = vmatpush3.bf16.msra.mxu1 %v3681_v15  ;;  %3322 = vmatprep.subr.bf16.mxu0 %v3682_v16  ;;  %v3712_v50 = vld [vmem:[%s4800_s2 + $0x18] sm:$0xff]   ;;  %v3714_v52 = vld [vmem:[%s4800_s2 + $0x60] sm:$0xff]   ;;  %v3718_v56 = vld [vmem:[%s4800_s2 + $0x68] sm:$0xff]  }
  0x12   :  { %3344 = vmatprep.subr.bf16.mxu1 %v3683_v17  ;;  %v3713_v51 = vld [vmem:[%s4801_s1 + $0x18] sm:$0xff]   ;;  %v3715_v53 = vld [vmem:[%s4801_s1 + $0x60] sm:$0xff]   ;;  %v3719_v57 = vld [vmem:[%s4801_s1 + $0x68] sm:$0xff]  }
  0x13   :  { %v3716_v54 = vld [vmem:[%s4800_s2 + $0x20] sm:$0xff]   ;;  %v3720_v58 = vld [vmem:[%s4800_s2 + $0x28] sm:$0xff]   ;;  %v3722_v60 = vld [vmem:[%s4800_s2 + $0x70] sm:$0xff]  }
  0x14   :  { %3323 = vmatpush3.bf16.msra.mxu0 %v3684_v18  ;;  %v3717_v55 = vld [vmem:[%s4801_s1 + $0x20] sm:$0xff]   ;;  %v3721_v59 = vld [vmem:[%s4801_s1 + $0x28] sm:$0xff]   ;;  %v3723_v61 = vld [vmem:[%s4801_s1 + $0x70] sm:$0xff]  }
  0x15   :  { %3345 = vmatpush3.bf16.msra.mxu1 %v3685_v19  ;;  %3324 = vmatprep.subr.bf16.mxu0 %v3686_v20  ;;  %v3724_v62 = vld [vmem:[%s4800_s2 + $0x30] sm:$0xff]   ;;  %v3726_v0 = vld [vmem:[%s4800_s2 + $0x78] sm:$0xff]   ;;  %v3050_v4 = vld.sshfl [vmem:[%s4802_s0 + $0xc] sm:$0x33 pattern:$0x76325410] }
  0x16   :  { %3346 = vmatprep.subr.bf16.mxu1 %v3687_v21  ;;  %v3725_v63 = vld [vmem:[%s4801_s1 + $0x30] sm:$0xff]   ;;  %v3727_v1 = vld [vmem:[%s4801_s1 + $0x78] sm:$0xff]   ;;  %v3730_v5 = vld [vmem:[%s4800_s2 + $0x40] sm:$0xff]   ;;  %v466_v6 = vcombine.high %v3050_v4, %v3050_v4 }
  0x17   :  { %v3728_v2 = vld [vmem:[%s4800_s2 + $0x38] sm:$0xff]   ;;  %v3067_v7 = vld.sshfl [vmem:[%s4802_s0 + $0x8] sm:$0x33 pattern:$0x76325410]  ;;  %v3731_v9 = vld [vmem:[%s4801_s1 + $0x40] sm:$0xff]  }
  0x18   :  { %3325 = vmatpush3.bf16.msra.mxu0 %v3688_v22  ;;  %v3729_v3 = vld [vmem:[%s4801_s1 + $0x38] sm:$0xff]   ;;  %v613_v8 = vcombine.high %v3067_v7, %v3067_v7  ;;  %v3732_v10 = vld [vmem:[%s4800_s2] sm:$0xff]   ;;  %v3734_v12 = vld [vmem:[%s4800_s2 + $0x48] sm:$0xff]  }
  0x19   :  { %3347 = vmatpush3.bf16.msra.mxu1 %v3689_v23  ;;  %3326 = vmatprep.subr.bf16.mxu0 %v3690_v24  ;;  %v3733_v11 = vld [vmem:[%s4801_s1] sm:$0xff]   ;;  %v3735_v13 = vld [vmem:[%s4801_s1 + $0x48] sm:$0xff]   ;;  %v3738_v16 = vld [vmem:[%s4800_s2 + $0x50] sm:$0xff]  }
  0x1a   :  { %3348 = vmatprep.subr.bf16.mxu1 %v3691_v25  ;;  %v3736_v14 = vld [vmem:[%s4800_s2 + $0x8] sm:$0xff]   ;;  %v3739_v17 = vld [vmem:[%s4801_s1 + $0x50] sm:$0xff]   ;;  %v3742_v20 = vld [vmem:[%s4800_s2 + $0x58] sm:$0xff]  }
  0x1b   :  { %v3737_v15 = vld [vmem:[%s4801_s1 + $0x8] sm:$0xff]   ;;  %v3740_v18 = vld [vmem:[%s4800_s2 + $0x10] sm:$0xff]   ;;  %v3743_v21 = vld [vmem:[%s4801_s1 + $0x58] sm:$0xff]  }
  0x1c   :  { %3327 = vmatpush3.bf16.msra.mxu0 %v3692_v26  ;;  %v3741_v19 = vld [vmem:[%s4801_s1 + $0x10] sm:$0xff]   ;;  %v3744_v22 = vld [vmem:[%s4800_s2 + $0x18] sm:$0xff]   ;;  %v3746_v24 = vld [vmem:[%s4800_s2 + $0x60] sm:$0xff]  }
  0x1d   :  { %3349 = vmatpush3.bf16.msra.mxu1 %v3693_v27  ;;  %3328 = vmatprep.subr.bf16.mxu0 %v3694_v28  ;;  %v3745_v23 = vld [vmem:[%s4801_s1 + $0x18] sm:$0xff]   ;;  %v3747_v25 = vld [vmem:[%s4801_s1 + $0x60] sm:$0xff]   ;;  %v3750_v28 = vld [vmem:[%s4800_s2 + $0x68] sm:$0xff]  }
  0x1e   :  { %3350 = vmatprep.subr.bf16.mxu1 %v3695_v29  ;;  %v3748_v26 = vld [vmem:[%s4800_s2 + $0x20] sm:$0xff]   ;;  %v3751_v29 = vld [vmem:[%s4801_s1 + $0x68] sm:$0xff]   ;;  %v3755_v33 = vld [vmem:[%s4801_s1 + $0x70] sm:$0xff]  }
  0x1f   :  { %v3749_v27 = vld [vmem:[%s4801_s1 + $0x20] sm:$0xff]   ;;  %v3757_v35 = vld [vmem:[%s4801_s1 + $0x30] sm:$0xff]  }
  0x20   :  { %3329 = vmatpush3.bf16.msra.mxu0 %v3696_v30  ;;  %v3752_v30 = vld [vmem:[%s4800_s2 + $0x28] sm:$0xff]  }
  0x21   :  { %3351 = vmatpush3.bf16.msra.mxu1 %v3697_v31  ;;  %3358 = vmatprep.subr.bf16.mxu0 %v3698_v36  ;;  %v3753_v31 = vld [vmem:[%s4801_s1 + $0x28] sm:$0xff]   ;;  %v3758_v36 = vld [vmem:[%s4800_s2 + $0x78] sm:$0xff]  }
  0x22   :  { %3380 = vmatprep.subr.bf16.mxu1 %v3699_v37  ;;  %v3759_v37 = vld [vmem:[%s4801_s1 + $0x78] sm:$0xff]  }
  0x23   :  { %225 = vmatmul.mubr.bf16.vlgmr.msra.gmra.mrb[0].mxu0 %v3013_v32  ;;  %v3754_v32 = vld [vmem:[%s4800_s2 + $0x70] sm:$0xff]  }
  0x24   :  { %372 = vmatmul.mubr.bf16.vlgmr.msra.gmra.mrb[0].mxu1 %v3030_v34  ;;  %3359 = vmatpush3.bf16.msra.mxu0 %v3700_v38  ;;  %v3756_v34 = vld [vmem:[%s4800_s2 + $0x30] sm:$0xff]   ;;  %v3760_v38 = vld [vmem:[%s4800_s2 + $0x38] sm:$0xff]  }
  0x25   :  { %3381 = vmatpush3.bf16.msra.mxu1 %v3701_v39  ;;  %3360 = vmatprep.subr.bf16.mxu0 %v3702_v40  ;;  %v3761_v39 = vld [vmem:[%s4801_s1 + $0x38] sm:$0xff]   ;;  %v3088_v40 = vld.sshfl [vmem:[%s4802_s0 + $0x14] sm:$0x33 pattern:$0x76325410] }
  0x26   :  { %3382 = vmatprep.subr.bf16.mxu1 %v3703_v41  ;;  %597 = vmatprep.mubr.bf16.mxu0 %v466_v6  ;;  %v3762_v41 = vld [vmem:[%s4800_s2 + $0x40] sm:$0xff]   ;;  %v3788_v6 = vld [vmem:[%s4800_s2 + $0x30] sm:$0xff]  }
  0x27   :  { %744 = vmatprep.mubr.bf16.mxu1 %v613_v8  ;;  %v3790_v8 = vld [vmem:[%s4800_s2 + $0x78] sm:$0xff]  }
  0x28   :  { %3361 = vmatpush3.bf16.msra.mxu0 %v3704_v42  ;;  %v840_v42 = vcombine.high %v3088_v40, %v3088_v40 }
  0x29   :  { %3383 = vmatpush3.bf16.msra.mxu1 %v3705_v43  ;;  %3362 = vmatprep.subr.bf16.mxu0 %v3706_v44  ;;  %v3105_v43 = vld.sshfl [vmem:[%s4802_s0 + $0x10] sm:$0x33 pattern:$0x76325410] }
  0x2a   :  { %3384 = vmatprep.subr.bf16.mxu1 %v3707_v45  ;;  %v987_v44 = vcombine.high %v3105_v43, %v3105_v43  ;;  %v3763_v45 = vld [vmem:[%s4801_s1 + $0x40] sm:$0xff]  }
  0x2c   :  { %3363 = vmatpush3.bf16.msra.mxu0 %v3708_v46  ;;  %v3764_v46 = vld [vmem:[%s4800_s2] sm:$0xff]  }
  0x2d   :  { %3385 = vmatpush3.bf16.msra.mxu1 %v3709_v47  ;;  %3364 = vmatprep.subr.bf16.mxu0 %v3710_v48  ;;  %v3765_v47 = vld [vmem:[%s4801_s1] sm:$0xff]   ;;  %v3766_v48 = vld [vmem:[%s4800_s2 + $0x48] sm:$0xff]  }
  0x2e   :  { %3386 = vmatprep.subr.bf16.mxu1 %v3711_v49  ;;  %v3767_v49 = vld [vmem:[%s4801_s1 + $0x48] sm:$0xff]  }
  0x30   :  { %3365 = vmatpush3.bf16.msra.mxu0 %v3712_v50  ;;  %v3768_v50 = vld [vmem:[%s4800_s2 + $0x8] sm:$0xff]  }
  0x31   :  { %3387 = vmatpush3.bf16.msra.mxu1 %v3713_v51  ;;  %3366 = vmatprep.subr.bf16.mxu0 %v3714_v52  ;;  %v3769_v51 = vld [vmem:[%s4801_s1 + $0x8] sm:$0xff]   ;;  %v3770_v52 = vld [vmem:[%s4800_s2 + $0x50] sm:$0xff]  }
  0x32   :  { %3388 = vmatprep.subr.bf16.mxu1 %v3715_v53  ;;  %v3771_v53 = vld [vmem:[%s4801_s1 + $0x50] sm:$0xff]  }
  0x34   :  { %3367 = vmatpush3.bf16.msra.mxu0 %v3716_v54  ;;  %v3772_v54 = vld [vmem:[%s4800_s2 + $0x10] sm:$0xff]  }
  0x35   :  { %3389 = vmatpush3.bf16.msra.mxu1 %v3717_v55  ;;  %3368 = vmatprep.subr.bf16.mxu0 %v3718_v56  ;;  %v3773_v55 = vld [vmem:[%s4801_s1 + $0x10] sm:$0xff]   ;;  %v3774_v56 = vld [vmem:[%s4800_s2 + $0x58] sm:$0xff]  }
  0x36   :  { %3390 = vmatprep.subr.bf16.mxu1 %v3719_v57  ;;  %v3775_v57 = vld [vmem:[%s4801_s1 + $0x58] sm:$0xff]  }
  0x38   :  { %3369 = vmatpush3.bf16.msra.mxu0 %v3720_v58  ;;  %v3776_v58 = vld [vmem:[%s4800_s2 + $0x18] sm:$0xff]  }
  0x39   :  { %3391 = vmatpush3.bf16.msra.mxu1 %v3721_v59  ;;  %3370 = vmatprep.subr.bf16.mxu0 %v3722_v60  ;;  %v3777_v59 = vld [vmem:[%s4801_s1 + $0x18] sm:$0xff]   ;;  %v3778_v60 = vld [vmem:[%s4800_s2 + $0x60] sm:$0xff]  }
  0x3a   :  { %3392 = vmatprep.subr.bf16.mxu1 %v3723_v61  ;;  %v3779_v61 = vld [vmem:[%s4801_s1 + $0x60] sm:$0xff]  }
  0x3c   :  { %3371 = vmatpush3.bf16.msra.mxu0 %v3724_v62  ;;  %v3780_v62 = vld [vmem:[%s4800_s2 + $0x20] sm:$0xff]  }
  0x3d   :  { %3393 = vmatpush3.bf16.msra.mxu1 %v3725_v63  ;;  %3372 = vmatprep.subr.bf16.mxu0 %v3726_v0  ;;  %v3781_v63 = vld [vmem:[%s4801_s1 + $0x20] sm:$0xff]   ;;  %v3782_v0 = vld [vmem:[%s4800_s2 + $0x68] sm:$0xff]  }
  0x3e   :  { %3394 = vmatprep.subr.bf16.mxu1 %v3727_v1  ;;  %v3783_v1 = vld [vmem:[%s4801_s1 + $0x68] sm:$0xff]  }
  0x40   :  { %3373 = vmatpush3.bf16.msra.mxu0 %v3728_v2  ;;  %v3784_v2 = vld [vmem:[%s4800_s2 + $0x28] sm:$0xff]  }
  0x41   :  { %3395 = vmatpush3.bf16.msra.mxu1 %v3729_v3  ;;  %3402 = vmatprep.subr.bf16.mxu0 %v3730_v5  ;;  %v3785_v3 = vld [vmem:[%s4801_s1 + $0x28] sm:$0xff]   ;;  %v3787_v5 = vld [vmem:[%s4801_s1 + $0x70] sm:$0xff]  }
  0x42   :  { %3424 = vmatprep.subr.bf16.mxu1 %v3731_v9  ;;  %v3791_v9 = vld [vmem:[%s4801_s1 + $0x78] sm:$0xff]  }
  0x43   :  { %598 = vmatmul.mubr.bf16.vlgmr.msra.gmra.mrb[4].mxu0 %v3050_v4  ;;  %v3786_v4 = vld [vmem:[%s4800_s2 + $0x70] sm:$0xff]  }
  0x44   :  { %745 = vmatmul.mubr.bf16.vlgmr.msra.gmra.mrb[4].mxu1 %v3067_v7  ;;  %3403 = vmatpush3.bf16.msra.mxu0 %v3732_v10  ;;  %v3789_v7 = vld [vmem:[%s4801_s1 + $0x30] sm:$0xff]   ;;  %v3792_v10 = vld [vmem:[%s4800_s2 + $0x38] sm:$0xff]  }
  0x45   :  { %3425 = vmatpush3.bf16.msra.mxu1 %v3733_v11  ;;  %3404 = vmatprep.subr.bf16.mxu0 %v3734_v12  ;;  %v3793_v11 = vld [vmem:[%s4801_s1 + $0x38] sm:$0xff]  }
  0x46   :  { %3426 = vmatprep.subr.bf16.mxu1 %v3735_v13  ;;  %971 = vmatprep.mubr.bf16.mxu0 %v840_v42  ;;  %v3126_v12 = vld.sshfl [vmem:[%s4802_s0 + $0x1c] sm:$0x33 pattern:$0x76325410]  ;;  %v3794_v13 = vld [vmem:[%s4800_s2 + $0x40] sm:$0xff]   ;;  %v3820_v42 = vld [vmem:[%s4800_s2 + $0x30] sm:$0xff]  }
  0x47   :  { %1118 = vmatprep.mubr.bf16.mxu1 %v987_v44  ;;  %v3822_v44 = vld [vmem:[%s4800_s2 + $0x78] sm:$0xff]  }
  0x48   :  { %3405 = vmatpush3.bf16.msra.mxu0 %v3736_v14  ;;  %v1214_v14 = vcombine.high %v3126_v12, %v3126_v12 }
  0x49   :  { %3427 = vmatpush3.bf16.msra.mxu1 %v3737_v15  ;;  %3406 = vmatprep.subr.bf16.mxu0 %v3738_v16  ;;  %v3143_v15 = vld.sshfl [vmem:[%s4802_s0 + $0x18] sm:$0x33 pattern:$0x76325410] }
  0x4a   :  { %3428 = vmatprep.subr.bf16.mxu1 %v3739_v17  ;;  %v1361_v16 = vcombine.high %v3143_v15, %v3143_v15  ;;  %v3795_v17 = vld [vmem:[%s4801_s1 + $0x40] sm:$0xff]  }
  0x4c   :  { %3407 = vmatpush3.bf16.msra.mxu0 %v3740_v18  ;;  %v3796_v18 = vld [vmem:[%s4800_s2] sm:$0xff]  }
  0x4d   :  { %3429 = vmatpush3.bf16.msra.mxu1 %v3741_v19  ;;  %3408 = vmatprep.subr.bf16.mxu0 %v3742_v20  ;;  %v3797_v19 = vld [vmem:[%s4801_s1] sm:$0xff]   ;;  %v3798_v20 = vld [vmem:[%s4800_s2 + $0x48] sm:$0xff]  }
  0x4e   :  { %3430 = vmatprep.subr.bf16.mxu1 %v3743_v21  ;;  %v3799_v21 = vld [vmem:[%s4801_s1 + $0x48] sm:$0xff]  }
  0x50   :  { %3409 = vmatpush3.bf16.msra.mxu0 %v3744_v22  ;;  %v3800_v22 = vld [vmem:[%s4800_s2 + $0x8] sm:$0xff]  }
  0x51   :  { %3431 = vmatpush3.bf16.msra.mxu1 %v3745_v23  ;;  %3410 = vmatprep.subr.bf16.mxu0 %v3746_v24  ;;  %v3801_v23 = vld [vmem:[%s4801_s1 + $0x8] sm:$0xff]   ;;  %v3802_v24 = vld [vmem:[%s4800_s2 + $0x50] sm:$0xff]  }
  0x52   :  { %3432 = vmatprep.subr.bf16.mxu1 %v3747_v25  ;;  %v3803_v25 = vld [vmem:[%s4801_s1 + $0x50] sm:$0xff]  }
  0x54   :  { %3411 = vmatpush3.bf16.msra.mxu0 %v3748_v26  ;;  %v3804_v26 = vld [vmem:[%s4800_s2 + $0x10] sm:$0xff]  }
  0x55   :  { %3433 = vmatpush3.bf16.msra.mxu1 %v3749_v27  ;;  %3412 = vmatprep.subr.bf16.mxu0 %v3750_v28  ;;  %v3805_v27 = vld [vmem:[%s4801_s1 + $0x10] sm:$0xff]   ;;  %v3806_v28 = vld [vmem:[%s4800_s2 + $0x58] sm:$0xff]  }
  0x56   :  { %3434 = vmatprep.subr.bf16.mxu1 %v3751_v29  ;;  %v3807_v29 = vld [vmem:[%s4801_s1 + $0x58] sm:$0xff]  }
  0x58   :  { %3413 = vmatpush3.bf16.msra.mxu0 %v3752_v30  ;;  %v3808_v30 = vld [vmem:[%s4800_s2 + $0x18] sm:$0xff]  }
  0x59   :  { %3435 = vmatpush3.bf16.msra.mxu1 %v3753_v31  ;;  %3414 = vmatprep.subr.bf16.mxu0 %v3754_v32  ;;  %v3809_v31 = vld [vmem:[%s4801_s1 + $0x18] sm:$0xff]   ;;  %v3810_v32 = vld [vmem:[%s4800_s2 + $0x60] sm:$0xff]  }
  0x5a   :  { %3436 = vmatprep.subr.bf16.mxu1 %v3755_v33  ;;  %v3811_v33 = vld [vmem:[%s4801_s1 + $0x60] sm:$0xff]  }
  0x5c   :  { %3415 = vmatpush3.bf16.msra.mxu0 %v3756_v34  ;;  %v3812_v34 = vld [vmem:[%s4800_s2 + $0x20] sm:$0xff]  }
  0x5d   :  { %3437 = vmatpush3.bf16.msra.mxu1 %v3757_v35  ;;  %3416 = vmatprep.subr.bf16.mxu0 %v3758_v36  ;;  %v3813_v35 = vld [vmem:[%s4801_s1 + $0x20] sm:$0xff]   ;;  %v3814_v36 = vld [vmem:[%s4800_s2 + $0x68] sm:$0xff]  }
  0x5e   :  { %3438 = vmatprep.subr.bf16.mxu1 %v3759_v37  ;;  %v3815_v37 = vld [vmem:[%s4801_s1 + $0x68] sm:$0xff]  }
  0x60   :  { %3417 = vmatpush3.bf16.msra.mxu0 %v3760_v38  ;;  %v3816_v38 = vld [vmem:[%s4800_s2 + $0x28] sm:$0xff]  }
  0x61   :  { %3439 = vmatpush3.bf16.msra.mxu1 %v3761_v39  ;;  %3446 = vmatprep.subr.bf16.mxu0 %v3762_v41  ;;  %v3817_v39 = vld [vmem:[%s4801_s1 + $0x28] sm:$0xff]   ;;  %v3819_v41 = vld [vmem:[%s4801_s1 + $0x70] sm:$0xff]  }
  0x62   :  { %3468 = vmatprep.subr.bf16.mxu1 %v3763_v45  ;;  %v3823_v45 = vld [vmem:[%s4801_s1 + $0x78] sm:$0xff]  }
  0x63   :  { %972 = vmatmul.mubr.bf16.vlgmr.msra.gmra.mrb[8].mxu0 %v3088_v40  ;;  %v3818_v40 = vld [vmem:[%s4800_s2 + $0x70] sm:$0xff]  }
  0x64   :  { %1119 = vmatmul.mubr.bf16.vlgmr.msra.gmra.mrb[8].mxu1 %v3105_v43  ;;  %3447 = vmatpush3.bf16.msra.mxu0 %v3764_v46  ;;  %v3821_v43 = vld [vmem:[%s4801_s1 + $0x30] sm:$0xff]   ;;  %v3824_v46 = vld [vmem:[%s4800_s2 + $0x38] sm:$0xff]  }
  0x65   :  { %3469 = vmatpush3.bf16.msra.mxu1 %v3765_v47  ;;  %3448 = vmatprep.subr.bf16.mxu0 %v3766_v48  ;;  %v3825_v47 = vld [vmem:[%s4801_s1 + $0x38] sm:$0xff]   ;;  %v3164_v48 = vld.sshfl [vmem:[%s4802_s0 + $0x24] sm:$0x33 pattern:$0x76325410] }
  0x66   :  { %3470 = vmatprep.subr.bf16.mxu1 %v3767_v49  ;;  %1345 = vmatprep.mubr.bf16.mxu0 %v1214_v14  ;;  %v3826_v49 = vld [vmem:[%s4800_s2 + $0x40] sm:$0xff]   ;;  %v3852_v14 = vld [vmem:[%s4800_s2 + $0x30] sm:$0xff]  }
  0x67   :  { %1492 = vmatprep.mubr.bf16.mxu1 %v1361_v16  ;;  %v3854_v16 = vld [vmem:[%s4800_s2 + $0x78] sm:$0xff]  }
  0x68   :  { %3449 = vmatpush3.bf16.msra.mxu0 %v3768_v50  ;;  %v1588_v50 = vcombine.high %v3164_v48, %v3164_v48 }
  0x69   :  { %3471 = vmatpush3.bf16.msra.mxu1 %v3769_v51  ;;  %3450 = vmatprep.subr.bf16.mxu0 %v3770_v52  ;;  %v3181_v51 = vld.sshfl [vmem:[%s4802_s0 + $0x20] sm:$0x33 pattern:$0x76325410] }
  0x6a   :  { %3472 = vmatprep.subr.bf16.mxu1 %v3771_v53  ;;  %v1735_v52 = vcombine.high %v3181_v51, %v3181_v51  ;;  %v3827_v53 = vld [vmem:[%s4801_s1 + $0x40] sm:$0xff]  }
  0x6c   :  { %3451 = vmatpush3.bf16.msra.mxu0 %v3772_v54  ;;  %v3828_v54 = vld [vmem:[%s4800_s2] sm:$0xff]  }
  0x6d   :  { %3473 = vmatpush3.bf16.msra.mxu1 %v3773_v55  ;;  %3452 = vmatprep.subr.bf16.mxu0 %v3774_v56  ;;  %v3829_v55 = vld [vmem:[%s4801_s1] sm:$0xff]   ;;  %v3830_v56 = vld [vmem:[%s4800_s2 + $0x48] sm:$0xff]  }
  0x6e   :  { %3474 = vmatprep.subr.bf16.mxu1 %v3775_v57  ;;  %v3831_v57 = vld [vmem:[%s4801_s1 + $0x48] sm:$0xff]  }
  0x70   :  { %3453 = vmatpush3.bf16.msra.mxu0 %v3776_v58  ;;  %v3832_v58 = vld [vmem:[%s4800_s2 + $0x8] sm:$0xff]  }
  0x71   :  { %3475 = vmatpush3.bf16.msra.mxu1 %v3777_v59  ;;  %3454 = vmatprep.subr.bf16.mxu0 %v3778_v60  ;;  %v3833_v59 = vld [vmem:[%s4801_s1 + $0x8] sm:$0xff]   ;;  %v3834_v60 = vld [vmem:[%s4800_s2 + $0x50] sm:$0xff]  }
  0x72   :  { %3476 = vmatprep.subr.bf16.mxu1 %v3779_v61  ;;  %v3835_v61 = vld [vmem:[%s4801_s1 + $0x50] sm:$0xff]  }
  0x74   :  { %3455 = vmatpush3.bf16.msra.mxu0 %v3780_v62  ;;  %v3836_v62 = vld [vmem:[%s4800_s2 + $0x10] sm:$0xff]  }
  0x75   :  { %3477 = vmatpush3.bf16.msra.mxu1 %v3781_v63  ;;  %3456 = vmatprep.subr.bf16.mxu0 %v3782_v0  ;;  %v3837_v63 = vld [vmem:[%s4801_s1 + $0x10] sm:$0xff]   ;;  %v3838_v0 = vld [vmem:[%s4800_s2 + $0x58] sm:$0xff]  }
  0x76   :  { %3478 = vmatprep.subr.bf16.mxu1 %v3783_v1  ;;  %v3839_v1 = vld [vmem:[%s4801_s1 + $0x58] sm:$0xff]  }
  0x78   :  { %3457 = vmatpush3.bf16.msra.mxu0 %v3784_v2  ;;  %v3840_v2 = vld [vmem:[%s4800_s2 + $0x18] sm:$0xff]  }
  0x79   :  { %3479 = vmatpush3.bf16.msra.mxu1 %v3785_v3  ;;  %3458 = vmatprep.subr.bf16.mxu0 %v3786_v4  ;;  %v3841_v3 = vld [vmem:[%s4801_s1 + $0x18] sm:$0xff]   ;;  %v3842_v4 = vld [vmem:[%s4800_s2 + $0x60] sm:$0xff]  }
  0x7a   :  { %3480 = vmatprep.subr.bf16.mxu1 %v3787_v5  ;;  %v3843_v5 = vld [vmem:[%s4801_s1 + $0x60] sm:$0xff]  }
  0x7c   :  { %3459 = vmatpush3.bf16.msra.mxu0 %v3788_v6  ;;  %v3844_v6 = vld [vmem:[%s4800_s2 + $0x20] sm:$0xff]  }
  0x7d   :  { %3481 = vmatpush3.bf16.msra.mxu1 %v3789_v7  ;;  %3460 = vmatprep.subr.bf16.mxu0 %v3790_v8  ;;  %v3845_v7 = vld [vmem:[%s4801_s1 + $0x20] sm:$0xff]   ;;  %v3846_v8 = vld [vmem:[%s4800_s2 + $0x68] sm:$0xff]  }
  0x7e   :  { %3482 = vmatprep.subr.bf16.mxu1 %v3791_v9  ;;  %v3847_v9 = vld [vmem:[%s4801_s1 + $0x68] sm:$0xff]  }
  0x80   :  { %3461 = vmatpush3.bf16.msra.mxu0 %v3792_v10  ;;  %v3848_v10 = vld [vmem:[%s4800_s2 + $0x28] sm:$0xff]  }
  0x81   :  { %3483 = vmatpush3.bf16.msra.mxu1 %v3793_v11  ;;  %3490 = vmatprep.subr.bf16.mxu0 %v3794_v13  ;;  %v3849_v11 = vld [vmem:[%s4801_s1 + $0x28] sm:$0xff]   ;;  %v3851_v13 = vld [vmem:[%s4801_s1 + $0x70] sm:$0xff]  }
  0x82   :  { %3512 = vmatprep.subr.bf16.mxu1 %v3795_v17  ;;  %v3855_v17 = vld [vmem:[%s4801_s1 + $0x78] sm:$0xff]  }
  0x83   :  { %1346 = vmatmul.mubr.bf16.vlgmr.msra.gmra.mrb[12].mxu0 %v3126_v12  ;;  %v3850_v12 = vld [vmem:[%s4800_s2 + $0x70] sm:$0xff]  }
  0x84   :  { %1493 = vmatmul.mubr.bf16.vlgmr.msra.gmra.mrb[12].mxu1 %v3143_v15  ;;  %3491 = vmatpush3.bf16.msra.mxu0 %v3796_v18  ;;  %v3853_v15 = vld [vmem:[%s4801_s1 + $0x30] sm:$0xff]   ;;  %v3856_v18 = vld [vmem:[%s4800_s2 + $0x38] sm:$0xff]  }
  0x85   :  { %3513 = vmatpush3.bf16.msra.mxu1 %v3797_v19  ;;  %3492 = vmatprep.subr.bf16.mxu0 %v3798_v20  ;;  %v3857_v19 = vld [vmem:[%s4801_s1 + $0x38] sm:$0xff]   ;;  %v3202_v20 = vld.sshfl [vmem:[%s4802_s0 + $0x2c] sm:$0x33 pattern:$0x76325410] }
  0x86   :  { %3514 = vmatprep.subr.bf16.mxu1 %v3799_v21  ;;  %1719 = vmatprep.mubr.bf16.mxu0 %v1588_v50  ;;  %v3858_v21 = vld [vmem:[%s4800_s2 + $0x40] sm:$0xff]   ;;  %v3884_v50 = vld [vmem:[%s4800_s2 + $0x30] sm:$0xff]  }
  0x87   :  { %1866 = vmatprep.mubr.bf16.mxu1 %v1735_v52  ;;  %v3886_v52 = vld [vmem:[%s4800_s2 + $0x78] sm:$0xff]  }
  0x88   :  { %3493 = vmatpush3.bf16.msra.mxu0 %v3800_v22  ;;  %v1962_v22 = vcombine.high %v3202_v20, %v3202_v20 }
  0x89   :  { %3515 = vmatpush3.bf16.msra.mxu1 %v3801_v23  ;;  %3494 = vmatprep.subr.bf16.mxu0 %v3802_v24  ;;  %v3219_v23 = vld.sshfl [vmem:[%s4802_s0 + $0x28] sm:$0x33 pattern:$0x76325410] }
  0x8a   :  { %3516 = vmatprep.subr.bf16.mxu1 %v3803_v25  ;;  %v2109_v24 = vcombine.high %v3219_v23, %v3219_v23  ;;  %v3859_v25 = vld [vmem:[%s4801_s1 + $0x40] sm:$0xff]  }
  0x8c   :  { %3495 = vmatpush3.bf16.msra.mxu0 %v3804_v26  ;;  %v3860_v26 = vld [vmem:[%s4800_s2] sm:$0xff]  }
  0x8d   :  { %3517 = vmatpush3.bf16.msra.mxu1 %v3805_v27  ;;  %3496 = vmatprep.subr.bf16.mxu0 %v3806_v28  ;;  %v3861_v27 = vld [vmem:[%s4801_s1] sm:$0xff]   ;;  %v3862_v28 = vld [vmem:[%s4800_s2 + $0x48] sm:$0xff]  }
  0x8e   :  { %3518 = vmatprep.subr.bf16.mxu1 %v3807_v29  ;;  %v3863_v29 = vld [vmem:[%s4801_s1 + $0x48] sm:$0xff]  }
  0x90   :  { %3497 = vmatpush3.bf16.msra.mxu0 %v3808_v30  ;;  %v3864_v30 = vld [vmem:[%s4800_s2 + $0x8] sm:$0xff]  }
  0x91   :  { %3519 = vmatpush3.bf16.msra.mxu1 %v3809_v31  ;;  %3498 = vmatprep.subr.bf16.mxu0 %v3810_v32  ;;  %v3865_v31 = vld [vmem:[%s4801_s1 + $0x8] sm:$0xff]   ;;  %v3866_v32 = vld [vmem:[%s4800_s2 + $0x50] sm:$0xff]  }
  0x92   :  { %3520 = vmatprep.subr.bf16.mxu1 %v3811_v33  ;;  %v3867_v33 = vld [vmem:[%s4801_s1 + $0x50] sm:$0xff]  }
  0x94   :  { %3499 = vmatpush3.bf16.msra.mxu0 %v3812_v34  ;;  %v3868_v34 = vld [vmem:[%s4800_s2 + $0x10] sm:$0xff]  }
  0x95   :  { %3521 = vmatpush3.bf16.msra.mxu1 %v3813_v35  ;;  %3500 = vmatprep.subr.bf16.mxu0 %v3814_v36  ;;  %v3869_v35 = vld [vmem:[%s4801_s1 + $0x10] sm:$0xff]   ;;  %v3870_v36 = vld [vmem:[%s4800_s2 + $0x58] sm:$0xff]  }
  0x96   :  { %3522 = vmatprep.subr.bf16.mxu1 %v3815_v37  ;;  %v3871_v37 = vld [vmem:[%s4801_s1 + $0x58] sm:$0xff]  }
  0x98   :  { %3501 = vmatpush3.bf16.msra.mxu0 %v3816_v38  ;;  %v3872_v38 = vld [vmem:[%s4800_s2 + $0x18] sm:$0xff]  }
  0x99   :  { %3523 = vmatpush3.bf16.msra.mxu1 %v3817_v39  ;;  %3502 = vmatprep.subr.bf16.mxu0 %v3818_v40  ;;  %v3873_v39 = vld [vmem:[%s4801_s1 + $0x18] sm:$0xff]   ;;  %v3874_v40 = vld [vmem:[%s4800_s2 + $0x60] sm:$0xff]  }
  0x9a   :  { %3524 = vmatprep.subr.bf16.mxu1 %v3819_v41  ;;  %v3875_v41 = vld [vmem:[%s4801_s1 + $0x60] sm:$0xff]  }
  0x9c   :  { %3503 = vmatpush3.bf16.msra.mxu0 %v3820_v42  ;;  %v3876_v42 = vld [vmem:[%s4800_s2 + $0x20] sm:$0xff]  }
  0x9d   :  { %3525 = vmatpush3.bf16.msra.mxu1 %v3821_v43  ;;  %3504 = vmatprep.subr.bf16.mxu0 %v3822_v44  ;;  %v3877_v43 = vld [vmem:[%s4801_s1 + $0x20] sm:$0xff]   ;;  %v3878_v44 = vld [vmem:[%s4800_s2 + $0x68] sm:$0xff]  }
  0x9e   :  { %3526 = vmatprep.subr.bf16.mxu1 %v3823_v45  ;;  %v3879_v45 = vld [vmem:[%s4801_s1 + $0x68] sm:$0xff]  }
  0xa0   :  { %3505 = vmatpush3.bf16.msra.mxu0 %v3824_v46  ;;  %v3880_v46 = vld [vmem:[%s4800_s2 + $0x28] sm:$0xff]  }
  0xa1   :  { %3527 = vmatpush3.bf16.msra.mxu1 %v3825_v47  ;;  %3534 = vmatprep.subr.bf16.mxu0 %v3826_v49  ;;  %v3881_v47 = vld [vmem:[%s4801_s1 + $0x28] sm:$0xff]   ;;  %v3883_v49 = vld [vmem:[%s4801_s1 + $0x70] sm:$0xff]  }
  0xa2   :  { %3556 = vmatprep.subr.bf16.mxu1 %v3827_v53  ;;  %v3887_v53 = vld [vmem:[%s4801_s1 + $0x78] sm:$0xff]  }
  0xa3   :  { %1720 = vmatmul.mubr.bf16.vlgmr.msra.gmra.mrb[16].mxu0 %v3164_v48  ;;  %v3882_v48 = vld [vmem:[%s4800_s2 + $0x70] sm:$0xff]  }
  0xa4   :  { %1867 = vmatmul.mubr.bf16.vlgmr.msra.gmra.mrb[16].mxu1 %v3181_v51  ;;  %3535 = vmatpush3.bf16.msra.mxu0 %v3828_v54  ;;  %v3885_v51 = vld [vmem:[%s4801_s1 + $0x30] sm:$0xff]   ;;  %v3888_v54 = vld [vmem:[%s4800_s2 + $0x38] sm:$0xff]  }
  0xa5   :  { %3557 = vmatpush3.bf16.msra.mxu1 %v3829_v55  ;;  %3536 = vmatprep.subr.bf16.mxu0 %v3830_v56  ;;  %v3889_v55 = vld [vmem:[%s4801_s1 + $0x38] sm:$0xff]   ;;  %v3240_v56 = vld.sshfl [vmem:[%s4802_s0 + $0x34] sm:$0x33 pattern:$0x76325410] }
  0xa6   :  { %3558 = vmatprep.subr.bf16.mxu1 %v3831_v57  ;;  %2093 = vmatprep.mubr.bf16.mxu0 %v1962_v22  ;;  %v3890_v57 = vld [vmem:[%s4800_s2 + $0x40] sm:$0xff]  }
  0xa7   :  { %2240 = vmatprep.mubr.bf16.mxu1 %v2109_v24  ;;  %v4724_v22 = vld [vmem:[%s4803_s3] ss:$0 sm:$0xff]  ;;  %v3910_v24 = vld [vmem:[%s4800_s2 + $0x68] sm:$0xff]  }
  0xa8   :  { %3537 = vmatpush3.bf16.msra.mxu0 %v3832_v58  ;;  %v2336_v58 = vcombine.high %v3240_v56, %v3240_v56 }
  0xa9   :  { %3559 = vmatpush3.bf16.msra.mxu1 %v3833_v59  ;;  %3538 = vmatprep.subr.bf16.mxu0 %v3834_v60  ;;  %v3257_v59 = vld.sshfl [vmem:[%s4802_s0 + $0x30] sm:$0x33 pattern:$0x76325410] }
  0xaa   :  { %3560 = vmatprep.subr.bf16.mxu1 %v3835_v61  ;;  %v2483_v60 = vcombine.high %v3257_v59, %v3257_v59  ;;  %v3891_v61 = vld [vmem:[%s4801_s1 + $0x40] sm:$0xff]  }
  0xac   :  { %3539 = vmatpush3.bf16.msra.mxu0 %v3836_v62  ;;  %v3892_v62 = vld [vmem:[%s4800_s2] sm:$0xff]  }
  0xad   :  { %3561 = vmatpush3.bf16.msra.mxu1 %v3837_v63  ;;  %3540 = vmatprep.subr.bf16.mxu0 %v3838_v0  ;;  %v3893_v63 = vld [vmem:[%s4801_s1] sm:$0xff]   ;;  %v3894_v0 = vld [vmem:[%s4800_s2 + $0x48] sm:$0xff]  }
  0xae   :  { %3562 = vmatprep.subr.bf16.mxu1 %v3839_v1  ;;  %v3895_v1 = vld [vmem:[%s4801_s1 + $0x48] sm:$0xff]  }
  0xb0   :  { %3541 = vmatpush3.bf16.msra.mxu0 %v3840_v2  ;;  %v3896_v2 = vld [vmem:[%s4800_s2 + $0x8] sm:$0xff]  }
  0xb1   :  { %3563 = vmatpush3.bf16.msra.mxu1 %v3841_v3  ;;  %3542 = vmatprep.subr.bf16.mxu0 %v3842_v4  ;;  %v3897_v3 = vld [vmem:[%s4801_s1 + $0x8] sm:$0xff]   ;;  %v3898_v4 = vld [vmem:[%s4800_s2 + $0x50] sm:$0xff]  }
  0xb2   :  { %3564 = vmatprep.subr.bf16.mxu1 %v3843_v5  ;;  %v3899_v5 = vld [vmem:[%s4801_s1 + $0x50] sm:$0xff]  }
  0xb4   :  { %3543 = vmatpush3.bf16.msra.mxu0 %v3844_v6  ;;  %v3900_v6 = vld [vmem:[%s4800_s2 + $0x10] sm:$0xff]  }
  0xb5   :  { %3565 = vmatpush3.bf16.msra.mxu1 %v3845_v7  ;;  %3544 = vmatprep.subr.bf16.mxu0 %v3846_v8  ;;  %v3901_v7 = vld [vmem:[%s4801_s1 + $0x10] sm:$0xff]   ;;  %v3902_v8 = vld [vmem:[%s4800_s2 + $0x58] sm:$0xff]  }
  0xb6   :  { %3566 = vmatprep.subr.bf16.mxu1 %v3847_v9  ;;  %v3903_v9 = vld [vmem:[%s4801_s1 + $0x58] sm:$0xff]  }
  0xb8   :  { %3545 = vmatpush3.bf16.msra.mxu0 %v3848_v10  ;;  %v3904_v10 = vld [vmem:[%s4800_s2 + $0x18] sm:$0xff]  }
  0xb9   :  { %3567 = vmatpush3.bf16.msra.mxu1 %v3849_v11  ;;  %3546 = vmatprep.subr.bf16.mxu0 %v3850_v12  ;;  %v3905_v11 = vld [vmem:[%s4801_s1 + $0x18] sm:$0xff]  }
  0xba   :  { %3568 = vmatprep.subr.bf16.mxu1 %v3851_v13  ;;  %v3906_v13 = vld [vmem:[%s4800_s2 + $0x60] sm:$0xff]  }
  0xbc   :  { %3547 = vmatpush3.bf16.msra.mxu0 %v3852_v14 }
  0xbd   :  { %3569 = vmatpush3.bf16.msra.mxu1 %v3853_v15  ;;  %3548 = vmatprep.subr.bf16.mxu0 %v3854_v16  ;;  %v3907_v15 = vld [vmem:[%s4801_s1 + $0x60] sm:$0xff]  }
  0xbe   :  { %3570 = vmatprep.subr.bf16.mxu1 %v3855_v17  ;;  %v3908_v17 = vld [vmem:[%s4800_s2 + $0x20] sm:$0xff]  }
  0xc0   :  { %3549 = vmatpush3.bf16.msra.mxu0 %v3856_v18 }
  0xc1   :  { %3571 = vmatpush3.bf16.msra.mxu1 %v3857_v19  ;;  %3578 = vmatprep.subr.bf16.mxu0 %v3858_v21 }
  0xc2   :  { %3600 = vmatprep.subr.bf16.mxu1 %v3859_v25 }
  0xc3   :  { %2094 = vmatmul.mubr.bf16.vlgmr.msra.gmra.mrb[20].mxu0 %v3202_v20  ;;  %v3909_v20 = vld [vmem:[%s4801_s1 + $0x20] sm:$0xff]  }
  0xc4   :  { %2241 = vmatmul.mubr.bf16.vlgmr.msra.gmra.mrb[20].mxu1 %v3219_v23  ;;  %3579 = vmatpush3.bf16.msra.mxu0 %v3860_v26 }
  0xc5   :  { %3601 = vmatpush3.bf16.msra.mxu1 %v3861_v27  ;;  %3580 = vmatprep.subr.bf16.mxu0 %v3862_v28  ;;  %v3911_v27 = vld [vmem:[%s4801_s1 + $0x68] sm:$0xff]  }
  0xc6   :  { %3602 = vmatprep.subr.bf16.mxu1 %v3863_v29  ;;  %2467 = vmatprep.mubr.bf16.mxu0 %v2336_v58  ;;  %v3912_v29 = vld [vmem:[%s4800_s2 + $0x28] sm:$0xff]  }
  0xc7   :  { %2614 = vmatprep.mubr.bf16.mxu1 %v2483_v60 }
  0xc8   :  { %3581 = vmatpush3.bf16.msra.mxu0 %v3864_v30 }
  0xc9   :  { %3603 = vmatpush3.bf16.msra.mxu1 %v3865_v31  ;;  %3582 = vmatprep.subr.bf16.mxu0 %v3866_v32  ;;  %v3913_v32 = vld [vmem:[%s4801_s1 + $0x28] sm:$0xff]  }
  0xca   :  { %3604 = vmatprep.subr.bf16.mxu1 %v3867_v33  ;;  %v3914_v33 = vld [vmem:[%s4800_s2 + $0x70] sm:$0xff]  }
  0xcc   :  { %3583 = vmatpush3.bf16.msra.mxu0 %v3868_v34 }
  0xcd   :  { %3605 = vmatpush3.bf16.msra.mxu1 %v3869_v35  ;;  %3584 = vmatprep.subr.bf16.mxu0 %v3870_v36  ;;  %v3915_v35 = vld [vmem:[%s4801_s1 + $0x70] sm:$0xff]  }
  0xce   :  { %3606 = vmatprep.subr.bf16.mxu1 %v3871_v37  ;;  %v3916_v36 = vld [vmem:[%s4800_s2 + $0x30] sm:$0xff]  }
  0xd0   :  { %3585 = vmatpush3.bf16.msra.mxu0 %v3872_v38  ;;  %v3917_v38 = vld [vmem:[%s4801_s1 + $0x30] sm:$0xff]  }
  0xd1   :  { %3607 = vmatpush3.bf16.msra.mxu1 %v3873_v39  ;;  %3586 = vmatprep.subr.bf16.mxu0 %v3874_v40  ;;  %v3918_v39 = vld [vmem:[%s4800_s2 + $0x78] sm:$0xff]  }
  0xd2   :  { %3608 = vmatprep.subr.bf16.mxu1 %v3875_v41  ;;  %v3919_v40 = vld [vmem:[%s4801_s1 + $0x78] sm:$0xff]  }
  0xd3   :  { %v3920_v41 = vld [vmem:[%s4800_s2 + $0x38] sm:$0xff]  }
  0xd4   :  { %3587 = vmatpush3.bf16.msra.mxu0 %v3876_v42  ;;  %v3921_v42 = vld [vmem:[%s4801_s1 + $0x38] sm:$0xff]  }
  0xd5   :  { %3609 = vmatpush3.bf16.msra.mxu1 %v3877_v43  ;;  %3588 = vmatprep.subr.bf16.mxu0 %v3878_v44  ;;  %v3278_v43 = vld.sshfl [vmem:[%s4802_s0 + $0x3c] sm:$0x33 pattern:$0x76325410] }
  0xd6   :  { %3610 = vmatprep.subr.bf16.mxu1 %v3879_v45  ;;  %v2710_v44 = vcombine.high %v3278_v43, %v3278_v43  ;;  %v3295_v45 = vld.sshfl [vmem:[%s4802_s0 + $0x38] sm:$0x33 pattern:$0x76325410] }
  0xd8   :  { %3589 = vmatpush3.bf16.msra.mxu0 %v3880_v46  ;;  %v2857_v46 = vcombine.high %v3295_v45, %v3295_v45 }
  0xd9   :  { %3611 = vmatpush3.bf16.msra.mxu1 %v3881_v47  ;;  %3590 = vmatprep.subr.bf16.mxu0 %v3882_v48 }
  0xda   :  { %3612 = vmatprep.subr.bf16.mxu1 %v3883_v49 }
  0xdc   :  { %3591 = vmatpush3.bf16.msra.mxu0 %v3884_v50 }
  0xdd   :  { %3613 = vmatpush3.bf16.msra.mxu1 %v3885_v51  ;;  %3592 = vmatprep.subr.bf16.mxu0 %v3886_v52 }
  0xde   :  { %3614 = vmatprep.subr.bf16.mxu1 %v3887_v53 }
  0xe0   :  { %3593 = vmatpush3.bf16.msra.mxu0 %v3888_v54 }
  0xe1   :  { %3615 = vmatpush3.bf16.msra.mxu1 %v3889_v55  ;;  %3622 = vmatprep.subr.bf16.mxu0 %v3890_v57 }
  0xe2   :  { %3644 = vmatprep.subr.bf16.mxu1 %v3891_v61 }
  0xe3   :  { %2468 = vmatmul.mubr.bf16.vlgmr.msra.gmra.mrb[24].mxu0 %v3240_v56 }
  0xe4   :  { %2615 = vmatmul.mubr.bf16.vlgmr.msra.gmra.mrb[24].mxu1 %v3257_v59  ;;  %3623 = vmatpush3.bf16.msra.mxu0 %v3892_v62 }
  0xe5   :  { %3645 = vmatpush3.bf16.msra.mxu1 %v3893_v63  ;;  %3624 = vmatprep.subr.bf16.mxu0 %v3894_v0 }
  0xe6   :  { %3646 = vmatprep.subr.bf16.mxu1 %v3895_v1  ;;  %2841 = vmatprep.mubr.bf16.mxu0 %v2710_v44 }
  0xe7   :  { %2988 = vmatprep.mubr.bf16.mxu1 %v2857_v46 }
  0xe8   :  { %3625 = vmatpush3.bf16.msra.mxu0 %v3896_v2 }
  0xe9   :  { %3647 = vmatpush3.bf16.msra.mxu1 %v3897_v3  ;;  %3626 = vmatprep.subr.bf16.mxu0 %v3898_v4 }
  0xea   :  { %3648 = vmatprep.subr.bf16.mxu1 %v3899_v5 }
  0xec   :  { %3627 = vmatpush3.bf16.msra.mxu0 %v3900_v6 }
  0xed   :  { %3649 = vmatpush3.bf16.msra.mxu1 %v3901_v7  ;;  %3628 = vmatprep.subr.bf16.mxu0 %v3902_v8 }
  0xee   :  { %3650 = vmatprep.subr.bf16.mxu1 %v3903_v9 }
  0xf0   :  { %3629 = vmatpush3.bf16.msra.mxu0 %v3904_v10 }
  0xf1   :  { %3651 = vmatpush3.bf16.msra.mxu1 %v3905_v11  ;;  %3630 = vmatprep.subr.bf16.mxu0 %v3906_v13 }
  0xf2   :  { %3652 = vmatprep.subr.bf16.mxu1 %v3907_v15 }
  0xf4   :  { %3631 = vmatpush3.bf16.msra.mxu0 %v3908_v17 }
  0xf5   :  { %3653 = vmatpush3.bf16.msra.mxu1 %v3909_v20  ;;  %3632 = vmatprep.subr.bf16.mxu0 %v3910_v24 }
  0xf6   :  { %v3330_v12 = vpop.f32.mrb[0].mxu0  ;;  %3654 = vmatprep.subr.bf16.mxu1 %v3911_v27 }
  0xf7   :  { %v3352_v14 = vpop.f32.mrb[0].mxu1  ;;  %v3331_v16 = vpop.f32.mrb[1].mxu0 }
  0xf8   :  { %v3332_v18 = vadd.f32 %v3331_v16, %v3330_v12  ;;  %v3353_v19 = vpop.f32.mrb[1].mxu1  ;;  %v3333_v23 = vpop.f32.mrb[2].mxu0  ;;  %3633 = vmatpush3.bf16.msra.mxu0 %v3912_v29 }
  0xf9   :  { %v3354_v21 = vadd.f32 %v3353_v19, %v3352_v14  ;;  %v3355_v25 = vpop.f32.mrb[2].mxu1  ;;  %v3334_v28 = vpop.f32.mrb[3].mxu0  ;;  %3655 = vmatpush3.bf16.msra.mxu1 %v3913_v32  ;;  %3634 = vmatprep.subr.bf16.mxu0 %v3914_v33 }
  0xfa   :  { %v3356_v30 = vpop.f32.mrb[3].mxu1  ;;  %3656 = vmatprep.subr.bf16.mxu1 %v3915_v35 }
  0xfb   :  { %v374_v26 = vadd.f32 %v3354_v21, %v3332_v18 }
  0xfc   :  { %3635 = vmatpush3.bf16.msra.mxu0 %v3916_v36 }
  0xfd   :  { %v386_v31 = vadd.f32 %v4724_v22, %v374_v26  ;;  %3657 = vmatpush3.bf16.msra.mxu1 %v3917_v38  ;;  %3636 = vmatprep.subr.bf16.mxu0 %v3918_v39 }
  0xfe   :  { %3658 = vmatprep.subr.bf16.mxu1 %v3919_v40 }
  0xff   :  { %v387_v34 = vmax.f32 %v386_v31, 0.0 }
 0x100   :  { %3637 = vmatpush3.bf16.msra.mxu0 %v3920_v41 }
 0x101   :  { %v388_v37 = vpack.c.bf16 %v387_v34, %v387_v34  ;;  %3659 = vmatpush3.bf16.msra.mxu1 %v3921_v42 }
 0x103   :  { %389 = vst [vmem:[%s4804_s4] sm:$0x3] %v388_v37  ;;  %2842 = vmatmul.mubr.bf16.vlgmr.msra.gmra.mrb[28].mxu0 %v3278_v43 }
 0x104   :  { %2989 = vmatmul.mubr.bf16.vlgmr.msra.gmra.mrb[28].mxu1 %v3295_v45 }
 0x116   :  { %v3374_v47 = vpop.f32.mrb[4].mxu0 }
 0x117   :  { %v3396_v48 = vpop.f32.mrb[4].mxu1  ;;  %v3375_v49 = vpop.f32.mrb[5].mxu0 }
 0x118   :  { %v3376_v50 = vadd.f32 %v3375_v49, %v3374_v47  ;;  %v3397_v51 = vpop.f32.mrb[5].mxu1  ;;  %v3377_v52 = vpop.f32.mrb[6].mxu0 }
 0x119   :  { %v3398_v53 = vadd.f32 %v3397_v51, %v3396_v48  ;;  %v3399_v54 = vpop.f32.mrb[6].mxu1  ;;  %v3378_v55 = vpop.f32.mrb[7].mxu0 }
 0x11a   :  { %v3400_v56 = vpop.f32.mrb[7].mxu1 }
 0x11b   :  { %v747_v57 = vadd.f32 %v3398_v53, %v3376_v50 }
 0x11d   :  { %v759_v58 = vadd.f32 %v4724_v22, %v747_v57 }
 0x11f   :  { %v760_v59 = vmax.f32 %v759_v58, 0.0 }
 0x121   :  { %v761_v60 = vpack.c.bf16 %v760_v59, %v760_v59 }
 0x123   :  { %3085 = vst [vmem:[%s4804_s4 + $0x2] sm:$0x3] %v761_v60 }
 0x136   :  { %v3418_v61 = vpop.f32.mrb[8].mxu0 }
 0x137   :  { %v3440_v62 = vpop.f32.mrb[8].mxu1  ;;  %v3419_v63 = vpop.f32.mrb[9].mxu0 }
 0x138   :  { %v3420_v0 = vadd.f32 %v3419_v63, %v3418_v61  ;;  %v3441_v1 = vpop.f32.mrb[9].mxu1  ;;  %v3421_v2 = vpop.f32.mrb[10].mxu0 }
 0x139   :  { %v3442_v3 = vadd.f32 %v3441_v1, %v3440_v62  ;;  %v3443_v4 = vpop.f32.mrb[10].mxu1  ;;  %v3422_v5 = vpop.f32.mrb[11].mxu0 }
 0x13a   :  { %v3444_v6 = vpop.f32.mrb[11].mxu1 }
 0x13b   :  { %v1121_v7 = vadd.f32 %v3442_v3, %v3420_v0 }
 0x13d   :  { %v1133_v8 = vadd.f32 %v4724_v22, %v1121_v7 }
 0x13f   :  { %v1134_v9 = vmax.f32 %v1133_v8, 0.0 }
 0x141   :  { %v1135_v10 = vpack.c.bf16 %v1134_v9, %v1134_v9 }
 0x143   :  { %3123 = vst [vmem:[%s4804_s4 + $0x4] sm:$0x3] %v1135_v10 }
 0x156   :  { %v3462_v11 = vpop.f32.mrb[12].mxu0 }
 0x157   :  { %v3484_v12 = vpop.f32.mrb[12].mxu1  ;;  %v3463_v13 = vpop.f32.mrb[13].mxu0 }
 0x158   :  { %v3464_v14 = vadd.f32 %v3463_v13, %v3462_v11  ;;  %v3485_v15 = vpop.f32.mrb[13].mxu1  ;;  %v3465_v16 = vpop.f32.mrb[14].mxu0 }
 0x159   :  { %v3486_v17 = vadd.f32 %v3485_v15, %v3484_v12  ;;  %v3487_v18 = vpop.f32.mrb[14].mxu1  ;;  %v3466_v19 = vpop.f32.mrb[15].mxu0 }
 0x15a   :  { %v3488_v20 = vpop.f32.mrb[15].mxu1 }
 0x15b   :  { %v1495_v21 = vadd.f32 %v3486_v17, %v3464_v14 }
 0x15d   :  { %v1507_v23 = vadd.f32 %v4724_v22, %v1495_v21 }
 0x15f   :  { %v1508_v24 = vmax.f32 %v1507_v23, 0.0 }
 0x161   :  { %v1509_v25 = vpack.c.bf16 %v1508_v24, %v1508_v24 }
 0x163   :  { %3161 = vst [vmem:[%s4804_s4 + $0x6] sm:$0x3] %v1509_v25 }
 0x176   :  { %v3506_v26 = vpop.f32.mrb[16].mxu0 }
 0x177   :  { %v3528_v27 = vpop.f32.mrb[16].mxu1  ;;  %v3507_v28 = vpop.f32.mrb[17].mxu0 }
 0x178   :  { %v3508_v29 = vadd.f32 %v3507_v28, %v3506_v26  ;;  %v3529_v30 = vpop.f32.mrb[17].mxu1  ;;  %v3509_v31 = vpop.f32.mrb[18].mxu0 }
 0x179   :  { %v3530_v32 = vadd.f32 %v3529_v30, %v3528_v27  ;;  %v3531_v33 = vpop.f32.mrb[18].mxu1  ;;  %v3510_v34 = vpop.f32.mrb[19].mxu0 }
 0x17a   :  { %v3532_v35 = vpop.f32.mrb[19].mxu1 }
 0x17b   :  { %v1869_v36 = vadd.f32 %v3530_v32, %v3508_v29 }
 0x17d   :  { %v1881_v37 = vadd.f32 %v4724_v22, %v1869_v36 }
 0x17f   :  { %v1882_v38 = vmax.f32 %v1881_v37, 0.0 }
 0x181   :  { %v1883_v39 = vpack.c.bf16 %v1882_v38, %v1882_v38 }
 0x183   :  { %3199 = vst [vmem:[%s4804_s4 + $0x8] sm:$0x3] %v1883_v39 }
 0x196   :  { %v3550_v40 = vpop.f32.mrb[20].mxu0 }
 0x197   :  { %v3572_v41 = vpop.f32.mrb[20].mxu1  ;;  %v3551_v42 = vpop.f32.mrb[21].mxu0 }
 0x198   :  { %v3552_v43 = vadd.f32 %v3551_v42, %v3550_v40  ;;  %v3573_v44 = vpop.f32.mrb[21].mxu1  ;;  %v3553_v45 = vpop.f32.mrb[22].mxu0 }
 0x199   :  { %v3574_v46 = vadd.f32 %v3573_v44, %v3572_v41  ;;  %v3575_v47 = vpop.f32.mrb[22].mxu1  ;;  %v3554_v48 = vpop.f32.mrb[23].mxu0 }
 0x19a   :  { %v3576_v49 = vpop.f32.mrb[23].mxu1 }
 0x19b   :  { %v2243_v50 = vadd.f32 %v3574_v46, %v3552_v43 }
 0x19d   :  { %v2255_v51 = vadd.f32 %v4724_v22, %v2243_v50 }
 0x19f   :  { %v2256_v52 = vmax.f32 %v2255_v51, 0.0 }
 0x1a1   :  { %v2257_v53 = vpack.c.bf16 %v2256_v52, %v2256_v52 }
 0x1a3   :  { %3237 = vst [vmem:[%s4804_s4 + $0xa] sm:$0x3] %v2257_v53 }
 0x1b6   :  { %v3594_v54 = vpop.f32.mrb[24].mxu0 }
 0x1b7   :  { %v3616_v55 = vpop.f32.mrb[24].mxu1  ;;  %v3595_v56 = vpop.f32.mrb[25].mxu0 }
 0x1b8   :  { %v3596_v57 = vadd.f32 %v3595_v56, %v3594_v54  ;;  %v3617_v58 = vpop.f32.mrb[25].mxu1  ;;  %v3597_v59 = vpop.f32.mrb[26].mxu0 }
 0x1b9   :  { %v3618_v60 = vadd.f32 %v3617_v58, %v3616_v55  ;;  %v3619_v61 = vpop.f32.mrb[26].mxu1  ;;  %v3598_v62 = vpop.f32.mrb[27].mxu0 }
 0x1ba   :  { %v3620_v63 = vpop.f32.mrb[27].mxu1 }
 0x1bb   :  { %v2617_v0 = vadd.f32 %v3618_v60, %v3596_v57 }
 0x1bd   :  { %v2629_v1 = vadd.f32 %v4724_v22, %v2617_v0 }
 0x1bf   :  { %v2630_v2 = vmax.f32 %v2629_v1, 0.0 }
 0x1c1   :  { %v2631_v3 = vpack.c.bf16 %v2630_v2, %v2630_v2 }
 0x1c3   :  { %3275 = vst [vmem:[%s4804_s4 + $0xc] sm:$0x3] %v2631_v3 }
 0x1d6   :  { %v3638_v4 = vpop.f32.mrb[28].mxu0 }
 0x1d7   :  { %v3660_v5 = vpop.f32.mrb[28].mxu1  ;;  %v3639_v6 = vpop.f32.mrb[29].mxu0 }
 0x1d8   :  { %v3640_v7 = vadd.f32 %v3639_v6, %v3638_v4  ;;  %v3661_v8 = vpop.f32.mrb[29].mxu1  ;;  %v3641_v9 = vpop.f32.mrb[30].mxu0 }
 0x1d9   :  { %v3662_v10 = vadd.f32 %v3661_v8, %v3660_v5  ;;  %v3663_v11 = vpop.f32.mrb[30].mxu1  ;;  %v3642_v12 = vpop.f32.mrb[31].mxu0 }
 0x1da   :  { %v3664_v13 = vpop.f32.mrb[31].mxu1 }
 0x1db   :  { %v2991_v14 = vadd.f32 %v3662_v10, %v3640_v7 }
 0x1dd   :  { %v3003_v15 = vadd.f32 %v4724_v22, %v2991_v14 }
 0x1df   :  { %v3004_v16 = vmax.f32 %v3003_v15, 0.0 }
 0x1e1   :  { %v3005_v17 = vpack.c.bf16 %v3004_v16, %v3004_v16 }
 0x1e3   :  { %3313 = vst [vmem:[%s4804_s4 + $0xe] sm:$0x3] %v3005_v17 }

// kernel: backbone_base_forward.4
= control target key start
LH: loop header
LB: loop body
LE: loop exit
PB: predicated region body
PF: predicated region fallthrough
CT: control target
= control target key end

     0   :  { %s9530_s2 = inlined_call_operand.vmem [shape: bf16[256,128], index: 2, kind: input, shape index: {}]   ;;  %s9531_s1 = inlined_call_operand.vmem [shape: bf16[256,128], index: 1, kind: input, shape index: {}]   ;;  %s9532_s0 = inlined_call_operand.vmem [shape: bf16[32,8,256], index: 0, kind: input, shape index: {}]   ;;  %s9533_s3 = inlined_call_operand.vmem [shape: f32[1,128], index: 3, kind: input, shape index: {}]   ;;  %s9534_s4 = inlined_call_operand.vmem [shape: bf16[16,8,128], index: 4, kind: output, shape index: {}]  }
   0x1   :  { %v7218_v0 = vld [vmem:[%s9530_s2 + $0x40] sm:$0xff]   ;;  %v7222_v4 = vld [vmem:[%s9530_s2 + $0x48] sm:$0xff]   ;;  %v7226_v8 = vld [vmem:[%s9530_s2 + $0x50] sm:$0xff]  }
   0x2   :  { %v7219_v1 = vld [vmem:[%s9531_s1 + $0x40] sm:$0xff]   ;;  %6514 = vmatprep.subr.bf16.mxu0 %v7218_v0  ;;  %v7223_v5 = vld [vmem:[%s9531_s1 + $0x48] sm:$0xff]   ;;  %v7227_v9 = vld [vmem:[%s9531_s1 + $0x50] sm:$0xff]  }
   0x3   :  { %v7220_v2 = vld [vmem:[%s9530_s2] sm:$0xff]   ;;  %6536 = vmatprep.subr.bf16.mxu1 %v7219_v1  ;;  %v7224_v6 = vld [vmem:[%s9530_s2 + $0x8] sm:$0xff]   ;;  %v7228_v10 = vld [vmem:[%s9530_s2 + $0x10] sm:$0xff]  }
   0x4   :  { %v7221_v3 = vld [vmem:[%s9531_s1] sm:$0xff]   ;;  %6515 = vmatpush3.bf16.msra.mxu0 %v7220_v2  ;;  %v7225_v7 = vld [vmem:[%s9531_s1 + $0x8] sm:$0xff]   ;;  %v7229_v11 = vld [vmem:[%s9531_s1 + $0x10] sm:$0xff]  }
   0x5   :  { %6537 = vmatpush3.bf16.msra.mxu1 %v7221_v3  ;;  %6516 = vmatprep.subr.bf16.mxu0 %v7222_v4  ;;  %v7230_v12 = vld [vmem:[%s9530_s2 + $0x58] sm:$0xff]   ;;  %v7234_v16 = vld [vmem:[%s9530_s2 + $0x60] sm:$0xff]   ;;  %v7238_v20 = vld [vmem:[%s9530_s2 + $0x68] sm:$0xff]  }
   0x6   :  { %6538 = vmatprep.subr.bf16.mxu1 %v7223_v5  ;;  %v7231_v13 = vld [vmem:[%s9531_s1 + $0x58] sm:$0xff]   ;;  %v7235_v17 = vld [vmem:[%s9531_s1 + $0x60] sm:$0xff]   ;;  %v7239_v21 = vld [vmem:[%s9531_s1 + $0x68] sm:$0xff]  }
   0x7   :  { %v7232_v14 = vld [vmem:[%s9530_s2 + $0x18] sm:$0xff]   ;;  %v7236_v18 = vld [vmem:[%s9530_s2 + $0x20] sm:$0xff]   ;;  %v7240_v22 = vld [vmem:[%s9530_s2 + $0x28] sm:$0xff]  }
   0x8   :  { %6517 = vmatpush3.bf16.msra.mxu0 %v7224_v6  ;;  %v7233_v15 = vld [vmem:[%s9531_s1 + $0x18] sm:$0xff]   ;;  %v7237_v19 = vld [vmem:[%s9531_s1 + $0x20] sm:$0xff]   ;;  %v7241_v23 = vld [vmem:[%s9531_s1 + $0x28] sm:$0xff]  }
   0x9   :  { %6539 = vmatpush3.bf16.msra.mxu1 %v7225_v7  ;;  %6518 = vmatprep.subr.bf16.mxu0 %v7226_v8  ;;  %v7242_v24 = vld [vmem:[%s9530_s2 + $0x70] sm:$0xff]   ;;  %v7246_v28 = vld [vmem:[%s9530_s2 + $0x78] sm:$0xff]   ;;  %v5876_v32 = vld [vmem:[%s9532_s0 + $0x8] sm:$0xff] }
   0xa   :  { %6540 = vmatprep.subr.bf16.mxu1 %v7227_v9  ;;  %v7243_v25 = vld [vmem:[%s9531_s1 + $0x70] sm:$0xff]   ;;  %v7247_v29 = vld [vmem:[%s9531_s1 + $0x78] sm:$0xff]   ;;  %v18_v33 = vld [vmem:[%s9532_s0] sm:$0xff]  ;;  %v5877_v34 = vcombine.low %v5876_v32, %v5876_v32  ;;  %v5878_v35 = vcombine.high %v5876_v32, %v5876_v32 }
   0xb   :  { %v7244_v26 = vld [vmem:[%s9530_s2 + $0x30] sm:$0xff]   ;;  %v7248_v30 = vld [vmem:[%s9530_s2 + $0x38] sm:$0xff]   ;;  %v5895_v36 = vcombine.low %v18_v33, %v18_v33  ;;  %v5896_v37 = vcombine.high %v18_v33, %v18_v33  ;;  %v7254_v38 = vld [vmem:[%s9530_s2 + $0x40] sm:$0xff]  }
   0xc   :  { %6519 = vmatpush3.bf16.msra.mxu0 %v7228_v10  ;;  %v7245_v27 = vld [vmem:[%s9531_s1 + $0x30] sm:$0xff]   ;;  %v7249_v31 = vld [vmem:[%s9531_s1 + $0x38] sm:$0xff]   ;;  %v7255_v39 = vld [vmem:[%s9531_s1 + $0x40] sm:$0xff]   ;;  %220 = vmatprep.mubr.bf16.mxu0 %v5878_v35 }
   0xd   :  { %6541 = vmatpush3.bf16.msra.mxu1 %v7229_v11  ;;  %6520 = vmatprep.subr.bf16.mxu0 %v7230_v12  ;;  %v7256_v40 = vld [vmem:[%s9530_s2] sm:$0xff]   ;;  %v7258_v42 = vld [vmem:[%s9530_s2 + $0x48] sm:$0xff]   ;;  %v7262_v46 = vld [vmem:[%s9530_s2 + $0x50] sm:$0xff]  }
   0xe   :  { %6542 = vmatprep.subr.bf16.mxu1 %v7231_v13  ;;  %363 = vmatprep.mubr.bf16.mxu1 %v5896_v37  ;;  %v7257_v41 = vld [vmem:[%s9531_s1] sm:$0xff]   ;;  %v7259_v43 = vld [vmem:[%s9531_s1 + $0x48] sm:$0xff]   ;;  %v7263_v47 = vld [vmem:[%s9531_s1 + $0x50] sm:$0xff]  }
   0xf   :  { %v7260_v44 = vld [vmem:[%s9530_s2 + $0x8] sm:$0xff]   ;;  %v7264_v48 = vld [vmem:[%s9530_s2 + $0x10] sm:$0xff]   ;;  %v7266_v50 = vld [vmem:[%s9530_s2 + $0x58] sm:$0xff]  }
  0x10   :  { %6521 = vmatpush3.bf16.msra.mxu0 %v7232_v14  ;;  %v7261_v45 = vld [vmem:[%s9531_s1 + $0x8] sm:$0xff]   ;;  %v7265_v49 = vld [vmem:[%s9531_s1 + $0x10] sm:$0xff]   ;;  %v7267_v51 = vld [vmem:[%s9531_s1 + $0x58] sm:$0xff]  }
  0x11   :  { %6543 = vmatpush3.bf16.msra.mxu1 %v7233_v15  ;;  %6522 = vmatprep.subr.bf16.mxu0 %v7234_v16  ;;  %v7268_v52 = vld [vmem:[%s9530_s2 + $0x18] sm:$0xff]   ;;  %v7270_v54 = vld [vmem:[%s9530_s2 + $0x60] sm:$0xff]   ;;  %v7274_v58 = vld [vmem:[%s9530_s2 + $0x68] sm:$0xff]  }
  0x12   :  { %6544 = vmatprep.subr.bf16.mxu1 %v7235_v17  ;;  %v7269_v53 = vld [vmem:[%s9531_s1 + $0x18] sm:$0xff]   ;;  %v7271_v55 = vld [vmem:[%s9531_s1 + $0x60] sm:$0xff]   ;;  %v7275_v59 = vld [vmem:[%s9531_s1 + $0x68] sm:$0xff]  }
  0x13   :  { %v7272_v56 = vld [vmem:[%s9530_s2 + $0x20] sm:$0xff]   ;;  %v7276_v60 = vld [vmem:[%s9530_s2 + $0x28] sm:$0xff]   ;;  %v7278_v62 = vld [vmem:[%s9530_s2 + $0x70] sm:$0xff]  }
  0x14   :  { %6523 = vmatpush3.bf16.msra.mxu0 %v7236_v18  ;;  %v7273_v57 = vld [vmem:[%s9531_s1 + $0x20] sm:$0xff]   ;;  %v7277_v61 = vld [vmem:[%s9531_s1 + $0x28] sm:$0xff]   ;;  %v7279_v63 = vld [vmem:[%s9531_s1 + $0x70] sm:$0xff]  }
  0x15   :  { %6545 = vmatpush3.bf16.msra.mxu1 %v7237_v19  ;;  %6524 = vmatprep.subr.bf16.mxu0 %v7238_v20  ;;  %v7280_v0 = vld [vmem:[%s9530_s2 + $0x30] sm:$0xff]   ;;  %v7282_v2 = vld [vmem:[%s9530_s2 + $0x78] sm:$0xff]   ;;  %v7290_v12 = vld [vmem:[%s9530_s2 + $0x40] sm:$0xff]  }
  0x16   :  { %6546 = vmatprep.subr.bf16.mxu1 %v7239_v21  ;;  %v7281_v1 = vld [vmem:[%s9531_s1 + $0x30] sm:$0xff]   ;;  %v7283_v3 = vld [vmem:[%s9531_s1 + $0x78] sm:$0xff]   ;;  %v7291_v13 = vld [vmem:[%s9531_s1 + $0x40] sm:$0xff]  }
  0x17   :  { %v7284_v4 = vld [vmem:[%s9530_s2 + $0x38] sm:$0xff]   ;;  %v5914_v9 = vld [vmem:[%s9532_s0 + $0x10] sm:$0xff]  ;;  %v7292_v14 = vld [vmem:[%s9530_s2] sm:$0xff]  }
  0x18   :  { %6525 = vmatpush3.bf16.msra.mxu0 %v7240_v22  ;;  %v7285_v5 = vld [vmem:[%s9531_s1 + $0x38] sm:$0xff]   ;;  %v5934_v10 = vcombine.low %v5914_v9, %v5914_v9  ;;  %v5935_v11 = vcombine.high %v5914_v9, %v5914_v9  ;;  %v7293_v15 = vld [vmem:[%s9531_s1] sm:$0xff]   ;;  %v7294_v16 = vld [vmem:[%s9530_s2 + $0x48] sm:$0xff]  }
  0x19   :  { %6547 = vmatpush3.bf16.msra.mxu1 %v7241_v23  ;;  %6526 = vmatprep.subr.bf16.mxu0 %v7242_v24  ;;  %v5915_v6 = vld [vmem:[%s9532_s0 + $0x18] sm:$0xff]  ;;  %v7295_v17 = vld [vmem:[%s9531_s1 + $0x48] sm:$0xff]   ;;  %v7298_v20 = vld [vmem:[%s9530_s2 + $0x50] sm:$0xff]  }
  0x1a   :  { %6548 = vmatprep.subr.bf16.mxu1 %v7243_v25  ;;  %v5916_v7 = vcombine.low %v5915_v6, %v5915_v6  ;;  %v5917_v8 = vcombine.high %v5915_v6, %v5915_v6  ;;  %v7296_v18 = vld [vmem:[%s9530_s2 + $0x8] sm:$0xff]   ;;  %v7299_v21 = vld [vmem:[%s9531_s1 + $0x50] sm:$0xff]   ;;  %v7302_v24 = vld [vmem:[%s9530_s2 + $0x58] sm:$0xff]  }
  0x1b   :  { %v7297_v19 = vld [vmem:[%s9531_s1 + $0x8] sm:$0xff]   ;;  %v7300_v22 = vld [vmem:[%s9530_s2 + $0x10] sm:$0xff]   ;;  %v7303_v25 = vld [vmem:[%s9531_s1 + $0x58] sm:$0xff]  }
  0x1c   :  { %6527 = vmatpush3.bf16.msra.mxu0 %v7244_v26  ;;  %v7301_v23 = vld [vmem:[%s9531_s1 + $0x10] sm:$0xff]   ;;  %v7304_v26 = vld [vmem:[%s9530_s2 + $0x18] sm:$0xff]   ;;  %v7310_v32 = vld [vmem:[%s9530_s2 + $0x68] sm:$0xff]  }
  0x1d   :  { %6549 = vmatpush3.bf16.msra.mxu1 %v7245_v27  ;;  %6528 = vmatprep.subr.bf16.mxu0 %v7246_v28  ;;  %v7305_v27 = vld [vmem:[%s9531_s1 + $0x18] sm:$0xff]   ;;  %v7306_v28 = vld [vmem:[%s9530_s2 + $0x60] sm:$0xff]   ;;  %v7311_v33 = vld [vmem:[%s9531_s1 + $0x68] sm:$0xff]  }
  0x1e   :  { %6550 = vmatprep.subr.bf16.mxu1 %v7247_v29  ;;  %v7307_v29 = vld [vmem:[%s9531_s1 + $0x60] sm:$0xff]   ;;  %v7313_v35 = vld [vmem:[%s9531_s1 + $0x28] sm:$0xff]   ;;  %v7315_v37 = vld [vmem:[%s9531_s1 + $0x70] sm:$0xff]  }
  0x1f   :  { %v7346_v6 = vld [vmem:[%s9530_s2 + $0x68] sm:$0xff]  }
  0x20   :  { %6529 = vmatpush3.bf16.msra.mxu0 %v7248_v30  ;;  %v7308_v30 = vld [vmem:[%s9530_s2 + $0x20] sm:$0xff]   ;;  %v7349_v9 = vld [vmem:[%s9531_s1 + $0x28] sm:$0xff]  }
  0x21   :  { %6551 = vmatpush3.bf16.msra.mxu1 %v7249_v31  ;;  %6558 = vmatprep.subr.bf16.mxu0 %v7254_v38  ;;  %v7309_v31 = vld [vmem:[%s9531_s1 + $0x20] sm:$0xff]   ;;  %v7316_v38 = vld [vmem:[%s9530_s2 + $0x30] sm:$0xff]  }
  0x22   :  { %6580 = vmatprep.subr.bf16.mxu1 %v7255_v39  ;;  %v7317_v39 = vld [vmem:[%s9531_s1 + $0x30] sm:$0xff]  }
  0x23   :  { %221 = vmatmul.mubr.bf16.vlgmr.msra.gmra.mrb[0].mxu0 %v5877_v34  ;;  %v7312_v34 = vld [vmem:[%s9530_s2 + $0x28] sm:$0xff]  }
  0x24   :  { %364 = vmatmul.mubr.bf16.vlgmr.msra.gmra.mrb[0].mxu1 %v5895_v36  ;;  %6559 = vmatpush3.bf16.msra.mxu0 %v7256_v40  ;;  %v7314_v36 = vld [vmem:[%s9530_s2 + $0x70] sm:$0xff]   ;;  %v7318_v40 = vld [vmem:[%s9530_s2 + $0x78] sm:$0xff]  }
  0x25   :  { %6581 = vmatpush3.bf16.msra.mxu1 %v7257_v41  ;;  %6560 = vmatprep.subr.bf16.mxu0 %v7258_v42  ;;  %v7319_v41 = vld [vmem:[%s9531_s1 + $0x78] sm:$0xff]  }
  0x26   :  { %6582 = vmatprep.subr.bf16.mxu1 %v7259_v43  ;;  %585 = vmatprep.mubr.bf16.mxu0 %v5917_v8  ;;  %v7320_v42 = vld [vmem:[%s9530_s2 + $0x38] sm:$0xff]   ;;  %v7348_v8 = vld [vmem:[%s9530_s2 + $0x28] sm:$0xff]  }
  0x27   :  { %728 = vmatprep.mubr.bf16.mxu1 %v5935_v11  ;;  %v7321_v43 = vld [vmem:[%s9531_s1 + $0x38] sm:$0xff]   ;;  %v7351_v11 = vld [vmem:[%s9531_s1 + $0x70] sm:$0xff]  }
  0x28   :  { %6561 = vmatpush3.bf16.msra.mxu0 %v7260_v44  ;;  %v5955_v44 = vld [vmem:[%s9532_s0 + $0x28] sm:$0xff] }
  0x29   :  { %6583 = vmatpush3.bf16.msra.mxu1 %v7261_v45  ;;  %6562 = vmatprep.subr.bf16.mxu0 %v7262_v46  ;;  %v5954_v45 = vld [vmem:[%s9532_s0 + $0x20] sm:$0xff]  ;;  %v5956_v46 = vcombine.low %v5955_v44, %v5955_v44 }
  0x2a   :  { %6584 = vmatprep.subr.bf16.mxu1 %v7263_v47  ;;  %v5957_v47 = vcombine.high %v5955_v44, %v5955_v44  ;;  %v7382_v44 = vld [vmem:[%s9530_s2 + $0x68] sm:$0xff]  }
  0x2c   :  { %6563 = vmatpush3.bf16.msra.mxu0 %v7264_v48  ;;  %v5974_v48 = vcombine.low %v5954_v45, %v5954_v45 }
  0x2d   :  { %6585 = vmatpush3.bf16.msra.mxu1 %v7265_v49  ;;  %6564 = vmatprep.subr.bf16.mxu0 %v7266_v50  ;;  %v5975_v49 = vcombine.high %v5954_v45, %v5954_v45  ;;  %v7326_v50 = vld [vmem:[%s9530_s2 + $0x40] sm:$0xff]   ;;  %v7383_v45 = vld [vmem:[%s9531_s1 + $0x68] sm:$0xff]  }
  0x2e   :  { %6586 = vmatprep.subr.bf16.mxu1 %v7267_v51  ;;  %v7327_v51 = vld [vmem:[%s9531_s1 + $0x40] sm:$0xff]  }
  0x30   :  { %6565 = vmatpush3.bf16.msra.mxu0 %v7268_v52  ;;  %v7328_v52 = vld [vmem:[%s9530_s2] sm:$0xff]  }
  0x31   :  { %6587 = vmatpush3.bf16.msra.mxu1 %v7269_v53  ;;  %6566 = vmatprep.subr.bf16.mxu0 %v7270_v54  ;;  %v7329_v53 = vld [vmem:[%s9531_s1] sm:$0xff]   ;;  %v7330_v54 = vld [vmem:[%s9530_s2 + $0x48] sm:$0xff]  }
  0x32   :  { %6588 = vmatprep.subr.bf16.mxu1 %v7271_v55  ;;  %v7331_v55 = vld [vmem:[%s9531_s1 + $0x48] sm:$0xff]  }
  0x34   :  { %6567 = vmatpush3.bf16.msra.mxu0 %v7272_v56  ;;  %v7332_v56 = vld [vmem:[%s9530_s2 + $0x8] sm:$0xff]  }
  0x35   :  { %6589 = vmatpush3.bf16.msra.mxu1 %v7273_v57  ;;  %6568 = vmatprep.subr.bf16.mxu0 %v7274_v58  ;;  %v7333_v57 = vld [vmem:[%s9531_s1 + $0x8] sm:$0xff]   ;;  %v7334_v58 = vld [vmem:[%s9530_s2 + $0x50] sm:$0xff]  }
  0x36   :  { %6590 = vmatprep.subr.bf16.mxu1 %v7275_v59  ;;  %v7335_v59 = vld [vmem:[%s9531_s1 + $0x50] sm:$0xff]  }
  0x38   :  { %6569 = vmatpush3.bf16.msra.mxu0 %v7276_v60  ;;  %v7336_v60 = vld [vmem:[%s9530_s2 + $0x10] sm:$0xff]  }
  0x39   :  { %6591 = vmatpush3.bf16.msra.mxu1 %v7277_v61  ;;  %6570 = vmatprep.subr.bf16.mxu0 %v7278_v62  ;;  %v7337_v61 = vld [vmem:[%s9531_s1 + $0x10] sm:$0xff]   ;;  %v7338_v62 = vld [vmem:[%s9530_s2 + $0x58] sm:$0xff]  }
  0x3a   :  { %6592 = vmatprep.subr.bf16.mxu1 %v7279_v63  ;;  %v7339_v63 = vld [vmem:[%s9531_s1 + $0x58] sm:$0xff]  }
  0x3c   :  { %6571 = vmatpush3.bf16.msra.mxu0 %v7280_v0  ;;  %v7340_v0 = vld [vmem:[%s9530_s2 + $0x18] sm:$0xff]  }
  0x3d   :  { %6593 = vmatpush3.bf16.msra.mxu1 %v7281_v1  ;;  %6572 = vmatprep.subr.bf16.mxu0 %v7282_v2  ;;  %v7341_v1 = vld [vmem:[%s9531_s1 + $0x18] sm:$0xff]   ;;  %v7342_v2 = vld [vmem:[%s9530_s2 + $0x60] sm:$0xff]  }
  0x3e   :  { %6594 = vmatprep.subr.bf16.mxu1 %v7283_v3  ;;  %v7343_v3 = vld [vmem:[%s9531_s1 + $0x60] sm:$0xff]  }
  0x40   :  { %6573 = vmatpush3.bf16.msra.mxu0 %v7284_v4  ;;  %v7344_v4 = vld [vmem:[%s9530_s2 + $0x20] sm:$0xff]  }
  0x41   :  { %6595 = vmatpush3.bf16.msra.mxu1 %v7285_v5  ;;  %6602 = vmatprep.subr.bf16.mxu0 %v7290_v12  ;;  %v7345_v5 = vld [vmem:[%s9531_s1 + $0x20] sm:$0xff]   ;;  %v7352_v12 = vld [vmem:[%s9530_s2 + $0x30] sm:$0xff]  }
  0x42   :  { %6624 = vmatprep.subr.bf16.mxu1 %v7291_v13  ;;  %v7353_v13 = vld [vmem:[%s9531_s1 + $0x30] sm:$0xff]  }
  0x43   :  { %586 = vmatmul.mubr.bf16.vlgmr.msra.gmra.mrb[4].mxu0 %v5916_v7  ;;  %v7347_v7 = vld [vmem:[%s9531_s1 + $0x68] sm:$0xff]  }
  0x44   :  { %729 = vmatmul.mubr.bf16.vlgmr.msra.gmra.mrb[4].mxu1 %v5934_v10  ;;  %6603 = vmatpush3.bf16.msra.mxu0 %v7292_v14  ;;  %v7350_v10 = vld [vmem:[%s9530_s2 + $0x70] sm:$0xff]   ;;  %v7354_v14 = vld [vmem:[%s9530_s2 + $0x78] sm:$0xff]  }
  0x45   :  { %6625 = vmatpush3.bf16.msra.mxu1 %v7293_v15  ;;  %6604 = vmatprep.subr.bf16.mxu0 %v7294_v16  ;;  %v7355_v15 = vld [vmem:[%s9531_s1 + $0x78] sm:$0xff]  }
  0x46   :  { %6626 = vmatprep.subr.bf16.mxu1 %v7295_v17  ;;  %951 = vmatprep.mubr.bf16.mxu0 %v5957_v47  ;;  %v7356_v16 = vld [vmem:[%s9530_s2 + $0x38] sm:$0xff]   ;;  %v7385_v47 = vld [vmem:[%s9531_s1 + $0x28] sm:$0xff]  }
  0x47   :  { %1094 = vmatprep.mubr.bf16.mxu1 %v5975_v49  ;;  %v7357_v17 = vld [vmem:[%s9531_s1 + $0x38] sm:$0xff]   ;;  %v7387_v49 = vld [vmem:[%s9531_s1 + $0x70] sm:$0xff]  }
  0x48   :  { %6605 = vmatpush3.bf16.msra.mxu0 %v7296_v18  ;;  %v5995_v18 = vld [vmem:[%s9532_s0 + $0x38] sm:$0xff] }
  0x49   :  { %6627 = vmatpush3.bf16.msra.mxu1 %v7297_v19  ;;  %6606 = vmatprep.subr.bf16.mxu0 %v7298_v20  ;;  %v5994_v19 = vld [vmem:[%s9532_s0 + $0x30] sm:$0xff]  ;;  %v5996_v20 = vcombine.low %v5995_v18, %v5995_v18 }
  0x4a   :  { %6628 = vmatprep.subr.bf16.mxu1 %v7299_v21  ;;  %v5997_v21 = vcombine.high %v5995_v18, %v5995_v18  ;;  %v7418_v18 = vld [vmem:[%s9530_s2 + $0x68] sm:$0xff]  }
  0x4c   :  { %6607 = vmatpush3.bf16.msra.mxu0 %v7300_v22  ;;  %v6014_v22 = vcombine.low %v5994_v19, %v5994_v19 }
  0x4d   :  { %6629 = vmatpush3.bf16.msra.mxu1 %v7301_v23  ;;  %6608 = vmatprep.subr.bf16.mxu0 %v7302_v24  ;;  %v7362_v23 = vld [vmem:[%s9530_s2 + $0x40] sm:$0xff]   ;;  %v6015_v24 = vcombine.high %v5994_v19, %v5994_v19  ;;  %v7419_v19 = vld [vmem:[%s9531_s1 + $0x68] sm:$0xff]  }
  0x4e   :  { %6630 = vmatprep.subr.bf16.mxu1 %v7303_v25  ;;  %v7363_v25 = vld [vmem:[%s9531_s1 + $0x40] sm:$0xff]  }
  0x50   :  { %6609 = vmatpush3.bf16.msra.mxu0 %v7304_v26  ;;  %v7364_v26 = vld [vmem:[%s9530_s2] sm:$0xff]  }
  0x51   :  { %6631 = vmatpush3.bf16.msra.mxu1 %v7305_v27  ;;  %6610 = vmatprep.subr.bf16.mxu0 %v7306_v28  ;;  %v7365_v27 = vld [vmem:[%s9531_s1] sm:$0xff]   ;;  %v7366_v28 = vld [vmem:[%s9530_s2 + $0x48] sm:$0xff]  }
  0x52   :  { %6632 = vmatprep.subr.bf16.mxu1 %v7307_v29  ;;  %v7367_v29 = vld [vmem:[%s9531_s1 + $0x48] sm:$0xff]  }
  0x54   :  { %6611 = vmatpush3.bf16.msra.mxu0 %v7308_v30  ;;  %v7368_v30 = vld [vmem:[%s9530_s2 + $0x8] sm:$0xff]  }
  0x55   :  { %6633 = vmatpush3.bf16.msra.mxu1 %v7309_v31  ;;  %6612 = vmatprep.subr.bf16.mxu0 %v7310_v32  ;;  %v7369_v31 = vld [vmem:[%s9531_s1 + $0x8] sm:$0xff]   ;;  %v7370_v32 = vld [vmem:[%s9530_s2 + $0x50] sm:$0xff]  }
  0x56   :  { %6634 = vmatprep.subr.bf16.mxu1 %v7311_v33  ;;  %v7371_v33 = vld [vmem:[%s9531_s1 + $0x50] sm:$0xff]  }
  0x58   :  { %6613 = vmatpush3.bf16.msra.mxu0 %v7312_v34  ;;  %v7372_v34 = vld [vmem:[%s9530_s2 + $0x10] sm:$0xff]  }
  0x59   :  { %6635 = vmatpush3.bf16.msra.mxu1 %v7313_v35  ;;  %6614 = vmatprep.subr.bf16.mxu0 %v7314_v36  ;;  %v7373_v35 = vld [vmem:[%s9531_s1 + $0x10] sm:$0xff]   ;;  %v7374_v36 = vld [vmem:[%s9530_s2 + $0x58] sm:$0xff]  }
  0x5a   :  { %6636 = vmatprep.subr.bf16.mxu1 %v7315_v37  ;;  %v7375_v37 = vld [vmem:[%s9531_s1 + $0x58] sm:$0xff]  }
  0x5c   :  { %6615 = vmatpush3.bf16.msra.mxu0 %v7316_v38  ;;  %v7376_v38 = vld [vmem:[%s9530_s2 + $0x18] sm:$0xff]  }
  0x5d   :  { %6637 = vmatpush3.bf16.msra.mxu1 %v7317_v39  ;;  %6616 = vmatprep.subr.bf16.mxu0 %v7318_v40  ;;  %v7377_v39 = vld [vmem:[%s9531_s1 + $0x18] sm:$0xff]   ;;  %v7378_v40 = vld [vmem:[%s9530_s2 + $0x60] sm:$0xff]  }
  0x5e   :  { %6638 = vmatprep.subr.bf16.mxu1 %v7319_v41  ;;  %v7379_v41 = vld [vmem:[%s9531_s1 + $0x60] sm:$0xff]  }
  0x60   :  { %6617 = vmatpush3.bf16.msra.mxu0 %v7320_v42  ;;  %v7380_v42 = vld [vmem:[%s9530_s2 + $0x20] sm:$0xff]  }
  0x61   :  { %6639 = vmatpush3.bf16.msra.mxu1 %v7321_v43  ;;  %6646 = vmatprep.subr.bf16.mxu0 %v7326_v50  ;;  %v7381_v43 = vld [vmem:[%s9531_s1 + $0x20] sm:$0xff]   ;;  %v7388_v50 = vld [vmem:[%s9530_s2 + $0x30] sm:$0xff]  }
  0x62   :  { %6668 = vmatprep.subr.bf16.mxu1 %v7327_v51  ;;  %v7389_v51 = vld [vmem:[%s9531_s1 + $0x30] sm:$0xff]  }
  0x63   :  { %952 = vmatmul.mubr.bf16.vlgmr.msra.gmra.mrb[8].mxu0 %v5956_v46  ;;  %v7384_v46 = vld [vmem:[%s9530_s2 + $0x28] sm:$0xff]  }
  0x64   :  { %1095 = vmatmul.mubr.bf16.vlgmr.msra.gmra.mrb[8].mxu1 %v5974_v48  ;;  %6647 = vmatpush3.bf16.msra.mxu0 %v7328_v52  ;;  %v7386_v48 = vld [vmem:[%s9530_s2 + $0x70] sm:$0xff]   ;;  %v7390_v52 = vld [vmem:[%s9530_s2 + $0x78] sm:$0xff]  }
  0x65   :  { %6669 = vmatpush3.bf16.msra.mxu1 %v7329_v53  ;;  %6648 = vmatprep.subr.bf16.mxu0 %v7330_v54  ;;  %v7391_v53 = vld [vmem:[%s9531_s1 + $0x78] sm:$0xff]  }
  0x66   :  { %6670 = vmatprep.subr.bf16.mxu1 %v7331_v55  ;;  %1317 = vmatprep.mubr.bf16.mxu0 %v5997_v21  ;;  %v7392_v54 = vld [vmem:[%s9530_s2 + $0x38] sm:$0xff]   ;;  %v7421_v21 = vld [vmem:[%s9531_s1 + $0x28] sm:$0xff]  }
  0x67   :  { %1460 = vmatprep.mubr.bf16.mxu1 %v6015_v24  ;;  %v7393_v55 = vld [vmem:[%s9531_s1 + $0x38] sm:$0xff]   ;;  %v7424_v24 = vld [vmem:[%s9530_s2 + $0x30] sm:$0xff]  }
  0x68   :  { %6649 = vmatpush3.bf16.msra.mxu0 %v7332_v56  ;;  %v6035_v56 = vld [vmem:[%s9532_s0 + $0x48] sm:$0xff] }
  0x69   :  { %6671 = vmatpush3.bf16.msra.mxu1 %v7333_v57  ;;  %6650 = vmatprep.subr.bf16.mxu0 %v7334_v58  ;;  %v6036_v57 = vcombine.low %v6035_v56, %v6035_v56  ;;  %v6037_v58 = vcombine.high %v6035_v56, %v6035_v56  ;;  %v7454_v56 = vld [vmem:[%s9530_s2 + $0x68] sm:$0xff]  }
  0x6a   :  { %6672 = vmatprep.subr.bf16.mxu1 %v7335_v59  ;;  %v6034_v59 = vld [vmem:[%s9532_s0 + $0x40] sm:$0xff] }
  0x6c   :  { %6651 = vmatpush3.bf16.msra.mxu0 %v7336_v60  ;;  %v6054_v60 = vcombine.low %v6034_v59, %v6034_v59 }
  0x6d   :  { %6673 = vmatpush3.bf16.msra.mxu1 %v7337_v61  ;;  %6652 = vmatprep.subr.bf16.mxu0 %v7338_v62  ;;  %v6055_v61 = vcombine.high %v6034_v59, %v6034_v59  ;;  %v7398_v62 = vld [vmem:[%s9530_s2 + $0x40] sm:$0xff]   ;;  %v7457_v59 = vld [vmem:[%s9531_s1 + $0x28] sm:$0xff]  }
  0x6e   :  { %6674 = vmatprep.subr.bf16.mxu1 %v7339_v63  ;;  %v7399_v63 = vld [vmem:[%s9531_s1 + $0x40] sm:$0xff]  }
  0x70   :  { %6653 = vmatpush3.bf16.msra.mxu0 %v7340_v0  ;;  %v7400_v0 = vld [vmem:[%s9530_s2] sm:$0xff]  }
  0x71   :  { %6675 = vmatpush3.bf16.msra.mxu1 %v7341_v1  ;;  %6654 = vmatprep.subr.bf16.mxu0 %v7342_v2  ;;  %v7401_v1 = vld [vmem:[%s9531_s1] sm:$0xff]   ;;  %v7402_v2 = vld [vmem:[%s9530_s2 + $0x48] sm:$0xff]  }
  0x72   :  { %6676 = vmatprep.subr.bf16.mxu1 %v7343_v3  ;;  %v7403_v3 = vld [vmem:[%s9531_s1 + $0x48] sm:$0xff]  }
  0x74   :  { %6655 = vmatpush3.bf16.msra.mxu0 %v7344_v4  ;;  %v7404_v4 = vld [vmem:[%s9530_s2 + $0x8] sm:$0xff]  }
  0x75   :  { %6677 = vmatpush3.bf16.msra.mxu1 %v7345_v5  ;;  %6656 = vmatprep.subr.bf16.mxu0 %v7346_v6  ;;  %v7405_v5 = vld [vmem:[%s9531_s1 + $0x8] sm:$0xff]   ;;  %v7406_v6 = vld [vmem:[%s9530_s2 + $0x50] sm:$0xff]  }
  0x76   :  { %6678 = vmatprep.subr.bf16.mxu1 %v7347_v7  ;;  %v7407_v7 = vld [vmem:[%s9531_s1 + $0x50] sm:$0xff]  }
  0x78   :  { %6657 = vmatpush3.bf16.msra.mxu0 %v7348_v8  ;;  %v7408_v8 = vld [vmem:[%s9530_s2 + $0x10] sm:$0xff]  }
  0x79   :  { %6679 = vmatpush3.bf16.msra.mxu1 %v7349_v9  ;;  %6658 = vmatprep.subr.bf16.mxu0 %v7350_v10  ;;  %v7409_v9 = vld [vmem:[%s9531_s1 + $0x10] sm:$0xff]   ;;  %v7410_v10 = vld [vmem:[%s9530_s2 + $0x58] sm:$0xff]  }
  0x7a   :  { %6680 = vmatprep.subr.bf16.mxu1 %v7351_v11  ;;  %v7411_v11 = vld [vmem:[%s9531_s1 + $0x58] sm:$0xff]  }
  0x7c   :  { %6659 = vmatpush3.bf16.msra.mxu0 %v7352_v12  ;;  %v7412_v12 = vld [vmem:[%s9530_s2 + $0x18] sm:$0xff]  }
  0x7d   :  { %6681 = vmatpush3.bf16.msra.mxu1 %v7353_v13  ;;  %6660 = vmatprep.subr.bf16.mxu0 %v7354_v14  ;;  %v7413_v13 = vld [vmem:[%s9531_s1 + $0x18] sm:$0xff]   ;;  %v7414_v14 = vld [vmem:[%s9530_s2 + $0x60] sm:$0xff]  }
  0x7e   :  { %6682 = vmatprep.subr.bf16.mxu1 %v7355_v15  ;;  %v7415_v15 = vld [vmem:[%s9531_s1 + $0x60] sm:$0xff]  }
  0x80   :  { %6661 = vmatpush3.bf16.msra.mxu0 %v7356_v16  ;;  %v7416_v16 = vld [vmem:[%s9530_s2 + $0x20] sm:$0xff]  }
  0x81   :  { %6683 = vmatpush3.bf16.msra.mxu1 %v7357_v17  ;;  %6690 = vmatprep.subr.bf16.mxu0 %v7362_v23  ;;  %v7417_v17 = vld [vmem:[%s9531_s1 + $0x20] sm:$0xff]   ;;  %v7423_v23 = vld [vmem:[%s9531_s1 + $0x70] sm:$0xff]  }
  0x82   :  { %6712 = vmatprep.subr.bf16.mxu1 %v7363_v25  ;;  %v7425_v25 = vld [vmem:[%s9531_s1 + $0x30] sm:$0xff]  }
  0x83   :  { %1318 = vmatmul.mubr.bf16.vlgmr.msra.gmra.mrb[12].mxu0 %v5996_v20  ;;  %v7420_v20 = vld [vmem:[%s9530_s2 + $0x28] sm:$0xff]  }
  0x84   :  { %1461 = vmatmul.mubr.bf16.vlgmr.msra.gmra.mrb[12].mxu1 %v6014_v22  ;;  %6691 = vmatpush3.bf16.msra.mxu0 %v7364_v26  ;;  %v7422_v22 = vld [vmem:[%s9530_s2 + $0x70] sm:$0xff]   ;;  %v7426_v26 = vld [vmem:[%s9530_s2 + $0x78] sm:$0xff]  }
  0x85   :  { %6713 = vmatpush3.bf16.msra.mxu1 %v7365_v27  ;;  %6692 = vmatprep.subr.bf16.mxu0 %v7366_v28  ;;  %v7427_v27 = vld [vmem:[%s9531_s1 + $0x78] sm:$0xff]  }
  0x86   :  { %6714 = vmatprep.subr.bf16.mxu1 %v7367_v29  ;;  %1683 = vmatprep.mubr.bf16.mxu0 %v6037_v58  ;;  %v7428_v28 = vld [vmem:[%s9530_s2 + $0x38] sm:$0xff]   ;;  %v7456_v58 = vld [vmem:[%s9530_s2 + $0x28] sm:$0xff]  }
  0x87   :  { %1826 = vmatprep.mubr.bf16.mxu1 %v6055_v61  ;;  %v7429_v29 = vld [vmem:[%s9531_s1 + $0x38] sm:$0xff]   ;;  %v7459_v61 = vld [vmem:[%s9531_s1 + $0x70] sm:$0xff]  }
  0x88   :  { %6693 = vmatpush3.bf16.msra.mxu0 %v7368_v30  ;;  %v6075_v30 = vld [vmem:[%s9532_s0 + $0x58] sm:$0xff] }
  0x89   :  { %6715 = vmatpush3.bf16.msra.mxu1 %v7369_v31  ;;  %6694 = vmatprep.subr.bf16.mxu0 %v7370_v32  ;;  %v6074_v31 = vld [vmem:[%s9532_s0 + $0x50] sm:$0xff]  ;;  %v6076_v32 = vcombine.low %v6075_v30, %v6075_v30 }
  0x8a   :  { %6716 = vmatprep.subr.bf16.mxu1 %v7371_v33  ;;  %v6077_v33 = vcombine.high %v6075_v30, %v6075_v30  ;;  %v7489_v30 = vld [vmem:[%s9531_s1 + $0x20] sm:$0xff]  }
  0x8c   :  { %6695 = vmatpush3.bf16.msra.mxu0 %v7372_v34  ;;  %v6094_v34 = vcombine.low %v6074_v31, %v6074_v31 }
  0x8d   :  { %6717 = vmatpush3.bf16.msra.mxu1 %v7373_v35  ;;  %6696 = vmatprep.subr.bf16.mxu0 %v7374_v36  ;;  %v6095_v35 = vcombine.high %v6074_v31, %v6074_v31  ;;  %v7434_v36 = vld [vmem:[%s9530_s2 + $0x40] sm:$0xff]  }
  0x8e   :  { %6718 = vmatprep.subr.bf16.mxu1 %v7375_v37  ;;  %v7435_v37 = vld [vmem:[%s9531_s1 + $0x40] sm:$0xff]  }
  0x90   :  { %6697 = vmatpush3.bf16.msra.mxu0 %v7376_v38  ;;  %v7436_v38 = vld [vmem:[%s9530_s2] sm:$0xff]  }
  0x91   :  { %6719 = vmatpush3.bf16.msra.mxu1 %v7377_v39  ;;  %6698 = vmatprep.subr.bf16.mxu0 %v7378_v40  ;;  %v7437_v39 = vld [vmem:[%s9531_s1] sm:$0xff]   ;;  %v7438_v40 = vld [vmem:[%s9530_s2 + $0x48] sm:$0xff]  }
  0x92   :  { %6720 = vmatprep.subr.bf16.mxu1 %v7379_v41  ;;  %v7439_v41 = vld [vmem:[%s9531_s1 + $0x48] sm:$0xff]  }
  0x94   :  { %6699 = vmatpush3.bf16.msra.mxu0 %v7380_v42  ;;  %v7440_v42 = vld [vmem:[%s9530_s2 + $0x8] sm:$0xff]  }
  0x95   :  { %6721 = vmatpush3.bf16.msra.mxu1 %v7381_v43  ;;  %6700 = vmatprep.subr.bf16.mxu0 %v7382_v44  ;;  %v7441_v43 = vld [vmem:[%s9531_s1 + $0x8] sm:$0xff]   ;;  %v7442_v44 = vld [vmem:[%s9530_s2 + $0x50] sm:$0xff]  }
  0x96   :  { %6722 = vmatprep.subr.bf16.mxu1 %v7383_v45  ;;  %v7443_v45 = vld [vmem:[%s9531_s1 + $0x50] sm:$0xff]  }
  0x98   :  { %6701 = vmatpush3.bf16.msra.mxu0 %v7384_v46  ;;  %v7444_v46 = vld [vmem:[%s9530_s2 + $0x10] sm:$0xff]  }
  0x99   :  { %6723 = vmatpush3.bf16.msra.mxu1 %v7385_v47  ;;  %6702 = vmatprep.subr.bf16.mxu0 %v7386_v48  ;;  %v7445_v47 = vld [vmem:[%s9531_s1 + $0x10] sm:$0xff]   ;;  %v7446_v48 = vld [vmem:[%s9530_s2 + $0x58] sm:$0xff]  }
  0x9a   :  { %6724 = vmatprep.subr.bf16.mxu1 %v7387_v49  ;;  %v7447_v49 = vld [vmem:[%s9531_s1 + $0x58] sm:$0xff]  }
  0x9c   :  { %6703 = vmatpush3.bf16.msra.mxu0 %v7388_v50  ;;  %v7448_v50 = vld [vmem:[%s9530_s2 + $0x18] sm:$0xff]  }
  0x9d   :  { %6725 = vmatpush3.bf16.msra.mxu1 %v7389_v51  ;;  %6704 = vmatprep.subr.bf16.mxu0 %v7390_v52  ;;  %v7449_v51 = vld [vmem:[%s9531_s1 + $0x18] sm:$0xff]   ;;  %v7450_v52 = vld [vmem:[%s9530_s2 + $0x60] sm:$0xff]  }
  0x9e   :  { %6726 = vmatprep.subr.bf16.mxu1 %v7391_v53  ;;  %v7451_v53 = vld [vmem:[%s9531_s1 + $0x60] sm:$0xff]  }
  0xa0   :  { %6705 = vmatpush3.bf16.msra.mxu0 %v7392_v54  ;;  %v7452_v54 = vld [vmem:[%s9530_s2 + $0x20] sm:$0xff]  }
  0xa1   :  { %6727 = vmatpush3.bf16.msra.mxu1 %v7393_v55  ;;  %6734 = vmatprep.subr.bf16.mxu0 %v7398_v62  ;;  %v7453_v55 = vld [vmem:[%s9531_s1 + $0x20] sm:$0xff]   ;;  %v7460_v62 = vld [vmem:[%s9530_s2 + $0x30] sm:$0xff]  }
  0xa2   :  { %6756 = vmatprep.subr.bf16.mxu1 %v7399_v63  ;;  %v7461_v63 = vld [vmem:[%s9531_s1 + $0x30] sm:$0xff]  }
  0xa3   :  { %1684 = vmatmul.mubr.bf16.vlgmr.msra.gmra.mrb[16].mxu0 %v6036_v57  ;;  %v7455_v57 = vld [vmem:[%s9531_s1 + $0x68] sm:$0xff]  }
  0xa4   :  { %1827 = vmatmul.mubr.bf16.vlgmr.msra.gmra.mrb[16].mxu1 %v6054_v60  ;;  %6735 = vmatpush3.bf16.msra.mxu0 %v7400_v0  ;;  %v7458_v60 = vld [vmem:[%s9530_s2 + $0x70] sm:$0xff]   ;;  %v7462_v0 = vld [vmem:[%s9530_s2 + $0x78] sm:$0xff]  }
  0xa5   :  { %6757 = vmatpush3.bf16.msra.mxu1 %v7401_v1  ;;  %6736 = vmatprep.subr.bf16.mxu0 %v7402_v2  ;;  %v7463_v1 = vld [vmem:[%s9531_s1 + $0x78] sm:$0xff]  }
  0xa6   :  { %6758 = vmatprep.subr.bf16.mxu1 %v7403_v3  ;;  %2049 = vmatprep.mubr.bf16.mxu0 %v6077_v33  ;;  %v7464_v2 = vld [vmem:[%s9530_s2 + $0x38] sm:$0xff]   ;;  %v7490_v33 = vld [vmem:[%s9530_s2 + $0x68] sm:$0xff]  }
  0xa7   :  { %2192 = vmatprep.mubr.bf16.mxu1 %v6095_v35  ;;  %v7465_v3 = vld [vmem:[%s9531_s1 + $0x38] sm:$0xff]  }
  0xa8   :  { %6737 = vmatpush3.bf16.msra.mxu0 %v7404_v4  ;;  %v6115_v4 = vld [vmem:[%s9532_s0 + $0x68] sm:$0xff] }
  0xa9   :  { %6759 = vmatpush3.bf16.msra.mxu1 %v7405_v5  ;;  %6738 = vmatprep.subr.bf16.mxu0 %v7406_v6  ;;  %v6114_v5 = vld [vmem:[%s9532_s0 + $0x60] sm:$0xff]  ;;  %v6116_v6 = vcombine.low %v6115_v4, %v6115_v4 }
  0xaa   :  { %6760 = vmatprep.subr.bf16.mxu1 %v7407_v7  ;;  %v6117_v7 = vcombine.high %v6115_v4, %v6115_v4  ;;  %v7511_v4 = vld [vmem:[%s9531_s1 + $0x48] sm:$0xff]  }
  0xac   :  { %6739 = vmatpush3.bf16.msra.mxu0 %v7408_v8  ;;  %v6134_v8 = vcombine.low %v6114_v5, %v6114_v5 }
  0xad   :  { %6761 = vmatpush3.bf16.msra.mxu1 %v7409_v9  ;;  %6740 = vmatprep.subr.bf16.mxu0 %v7410_v10  ;;  %v7470_v9 = vld [vmem:[%s9530_s2 + $0x40] sm:$0xff]   ;;  %v6135_v10 = vcombine.high %v6114_v5, %v6114_v5  ;;  %v7512_v5 = vld [vmem:[%s9530_s2 + $0x8] sm:$0xff]  }
  0xae   :  { %6762 = vmatprep.subr.bf16.mxu1 %v7411_v11  ;;  %v7471_v11 = vld [vmem:[%s9531_s1 + $0x40] sm:$0xff]  }
  0xb0   :  { %6741 = vmatpush3.bf16.msra.mxu0 %v7412_v12  ;;  %v7472_v12 = vld [vmem:[%s9530_s2] sm:$0xff]  }
  0xb1   :  { %6763 = vmatpush3.bf16.msra.mxu1 %v7413_v13  ;;  %6742 = vmatprep.subr.bf16.mxu0 %v7414_v14  ;;  %v7473_v13 = vld [vmem:[%s9531_s1] sm:$0xff]   ;;  %v7474_v14 = vld [vmem:[%s9530_s2 + $0x48] sm:$0xff]  }
  0xb2   :  { %6764 = vmatprep.subr.bf16.mxu1 %v7415_v15  ;;  %v7475_v15 = vld [vmem:[%s9531_s1 + $0x48] sm:$0xff]  }
  0xb4   :  { %6743 = vmatpush3.bf16.msra.mxu0 %v7416_v16  ;;  %v7476_v16 = vld [vmem:[%s9530_s2 + $0x8] sm:$0xff]  }
  0xb5   :  { %6765 = vmatpush3.bf16.msra.mxu1 %v7417_v17  ;;  %6744 = vmatprep.subr.bf16.mxu0 %v7418_v18  ;;  %v7477_v17 = vld [vmem:[%s9531_s1 + $0x8] sm:$0xff]   ;;  %v7478_v18 = vld [vmem:[%s9530_s2 + $0x50] sm:$0xff]  }
  0xb6   :  { %6766 = vmatprep.subr.bf16.mxu1 %v7419_v19  ;;  %v7479_v19 = vld [vmem:[%s9531_s1 + $0x50] sm:$0xff]  }
  0xb8   :  { %6745 = vmatpush3.bf16.msra.mxu0 %v7420_v20  ;;  %v7480_v20 = vld [vmem:[%s9530_s2 + $0x10] sm:$0xff]  }
  0xb9   :  { %6767 = vmatpush3.bf16.msra.mxu1 %v7421_v21  ;;  %6746 = vmatprep.subr.bf16.mxu0 %v7422_v22  ;;  %v7481_v21 = vld [vmem:[%s9531_s1 + $0x10] sm:$0xff]   ;;  %v7482_v22 = vld [vmem:[%s9530_s2 + $0x58] sm:$0xff]  }
  0xba   :  { %6768 = vmatprep.subr.bf16.mxu1 %v7423_v23  ;;  %v7483_v23 = vld [vmem:[%s9531_s1 + $0x58] sm:$0xff]  }
  0xbc   :  { %6747 = vmatpush3.bf16.msra.mxu0 %v7424_v24  ;;  %v7484_v24 = vld [vmem:[%s9530_s2 + $0x18] sm:$0xff]  }
  0xbd   :  { %6769 = vmatpush3.bf16.msra.mxu1 %v7425_v25  ;;  %6748 = vmatprep.subr.bf16.mxu0 %v7426_v26  ;;  %v7485_v25 = vld [vmem:[%s9531_s1 + $0x18] sm:$0xff]   ;;  %v7486_v26 = vld [vmem:[%s9530_s2 + $0x60] sm:$0xff]  }
  0xbe   :  { %6770 = vmatprep.subr.bf16.mxu1 %v7427_v27  ;;  %v7487_v27 = vld [vmem:[%s9531_s1 + $0x60] sm:$0xff]  }
  0xc0   :  { %6749 = vmatpush3.bf16.msra.mxu0 %v7428_v28  ;;  %v7488_v28 = vld [vmem:[%s9530_s2 + $0x20] sm:$0xff]  }
  0xc1   :  { %6771 = vmatpush3.bf16.msra.mxu1 %v7429_v29  ;;  %6778 = vmatprep.subr.bf16.mxu0 %v7434_v36  ;;  %v8599_v36 = vld [vmem:[%s9533_s3] ss:$0 sm:$0xff] }
  0xc2   :  { %6800 = vmatprep.subr.bf16.mxu1 %v7435_v37  ;;  %v7491_v37 = vld [vmem:[%s9531_s1 + $0x68] sm:$0xff]  }
  0xc3   :  { %2050 = vmatmul.mubr.bf16.vlgmr.msra.gmra.mrb[20].mxu0 %v6076_v32 }
  0xc4   :  { %2193 = vmatmul.mubr.bf16.vlgmr.msra.gmra.mrb[20].mxu1 %v6094_v34  ;;  %6779 = vmatpush3.bf16.msra.mxu0 %v7436_v38 }
  0xc5   :  { %6801 = vmatpush3.bf16.msra.mxu1 %v7437_v39  ;;  %6780 = vmatprep.subr.bf16.mxu0 %v7438_v40 }
  0xc6   :  { %6802 = vmatprep.subr.bf16.mxu1 %v7439_v41  ;;  %2415 = vmatprep.mubr.bf16.mxu0 %v6117_v7  ;;  %v7514_v7 = vld [vmem:[%s9530_s2 + $0x50] sm:$0xff]  }
  0xc7   :  { %2558 = vmatprep.mubr.bf16.mxu1 %v6135_v10  ;;  %v7517_v10 = vld [vmem:[%s9531_s1 + $0x10] sm:$0xff]  }
  0xc8   :  { %6781 = vmatpush3.bf16.msra.mxu0 %v7440_v42  ;;  %v7492_v42 = vld [vmem:[%s9530_s2 + $0x28] sm:$0xff]  }
  0xc9   :  { %6803 = vmatpush3.bf16.msra.mxu1 %v7441_v43  ;;  %6782 = vmatprep.subr.bf16.mxu0 %v7442_v44  ;;  %v7493_v44 = vld [vmem:[%s9531_s1 + $0x28] sm:$0xff]  }
  0xca   :  { %6804 = vmatprep.subr.bf16.mxu1 %v7443_v45 }
  0xcc   :  { %6783 = vmatpush3.bf16.msra.mxu0 %v7444_v46 }
  0xcd   :  { %6805 = vmatpush3.bf16.msra.mxu1 %v7445_v47  ;;  %6784 = vmatprep.subr.bf16.mxu0 %v7446_v48  ;;  %v7494_v47 = vld [vmem:[%s9530_s2 + $0x70] sm:$0xff]  }
  0xce   :  { %6806 = vmatprep.subr.bf16.mxu1 %v7447_v49  ;;  %v7495_v48 = vld [vmem:[%s9531_s1 + $0x70] sm:$0xff]  }
  0xd0   :  { %6785 = vmatpush3.bf16.msra.mxu0 %v7448_v50  ;;  %v7496_v50 = vld [vmem:[%s9530_s2 + $0x30] sm:$0xff]  }
  0xd1   :  { %6807 = vmatpush3.bf16.msra.mxu1 %v7449_v51  ;;  %6786 = vmatprep.subr.bf16.mxu0 %v7450_v52  ;;  %v7497_v51 = vld [vmem:[%s9531_s1 + $0x30] sm:$0xff]  }
  0xd2   :  { %6808 = vmatprep.subr.bf16.mxu1 %v7451_v53  ;;  %v7498_v53 = vld [vmem:[%s9530_s2 + $0x78] sm:$0xff]  }
  0xd4   :  { %6787 = vmatpush3.bf16.msra.mxu0 %v7452_v54  ;;  %v7499_v54 = vld [vmem:[%s9531_s1 + $0x78] sm:$0xff]  }
  0xd5   :  { %6809 = vmatpush3.bf16.msra.mxu1 %v7453_v55  ;;  %6788 = vmatprep.subr.bf16.mxu0 %v7454_v56  ;;  %v7500_v55 = vld [vmem:[%s9530_s2 + $0x38] sm:$0xff]  }
  0xd6   :  { %6810 = vmatprep.subr.bf16.mxu1 %v7455_v57  ;;  %v7501_v56 = vld [vmem:[%s9531_s1 + $0x38] sm:$0xff]  }
  0xd7   :  { %v6155_v57 = vld [vmem:[%s9532_s0 + $0x78] sm:$0xff] }
  0xd8   :  { %6789 = vmatpush3.bf16.msra.mxu0 %v7456_v58  ;;  %v6154_v58 = vld [vmem:[%s9532_s0 + $0x70] sm:$0xff] }
  0xd9   :  { %6811 = vmatpush3.bf16.msra.mxu1 %v7457_v59  ;;  %6790 = vmatprep.subr.bf16.mxu0 %v7458_v60  ;;  %v6156_v59 = vcombine.low %v6155_v57, %v6155_v57  ;;  %v6157_v60 = vcombine.high %v6155_v57, %v6155_v57  ;;  %v7547_v57 = vld [vmem:[%s9531_s1 + $0x48] sm:$0xff]  }
  0xda   :  { %6812 = vmatprep.subr.bf16.mxu1 %v7459_v61  ;;  %v6174_v61 = vcombine.low %v6154_v58, %v6154_v58 }
  0xdc   :  { %6791 = vmatpush3.bf16.msra.mxu0 %v7460_v62  ;;  %v6175_v62 = vcombine.high %v6154_v58, %v6154_v58  ;;  %v7548_v58 = vld [vmem:[%s9530_s2 + $0x8] sm:$0xff]  }
  0xdd   :  { %6813 = vmatpush3.bf16.msra.mxu1 %v7461_v63  ;;  %6792 = vmatprep.subr.bf16.mxu0 %v7462_v0  ;;  %v7506_v63 = vld [vmem:[%s9530_s2 + $0x40] sm:$0xff]  }
  0xde   :  { %6814 = vmatprep.subr.bf16.mxu1 %v7463_v1  ;;  %v7507_v0 = vld [vmem:[%s9531_s1 + $0x40] sm:$0xff]  }
  0xdf   :  { %v7508_v1 = vld [vmem:[%s9530_s2] sm:$0xff]  }
  0xe0   :  { %6793 = vmatpush3.bf16.msra.mxu0 %v7464_v2  ;;  %v7509_v2 = vld [vmem:[%s9531_s1] sm:$0xff]  }
  0xe1   :  { %6815 = vmatpush3.bf16.msra.mxu1 %v7465_v3  ;;  %6822 = vmatprep.subr.bf16.mxu0 %v7470_v9  ;;  %v7510_v3 = vld [vmem:[%s9530_s2 + $0x48] sm:$0xff]   ;;  %v7516_v9 = vld [vmem:[%s9530_s2 + $0x10] sm:$0xff]  }
  0xe2   :  { %6844 = vmatprep.subr.bf16.mxu1 %v7471_v11  ;;  %v7518_v11 = vld [vmem:[%s9530_s2 + $0x58] sm:$0xff]  }
  0xe3   :  { %2416 = vmatmul.mubr.bf16.vlgmr.msra.gmra.mrb[24].mxu0 %v6116_v6  ;;  %v7513_v6 = vld [vmem:[%s9531_s1 + $0x8] sm:$0xff]  }
  0xe4   :  { %2559 = vmatmul.mubr.bf16.vlgmr.msra.gmra.mrb[24].mxu1 %v6134_v8  ;;  %6823 = vmatpush3.bf16.msra.mxu0 %v7472_v12  ;;  %v7515_v8 = vld [vmem:[%s9531_s1 + $0x50] sm:$0xff]   ;;  %v7519_v12 = vld [vmem:[%s9531_s1 + $0x58] sm:$0xff]  }
  0xe5   :  { %6845 = vmatpush3.bf16.msra.mxu1 %v7473_v13  ;;  %6824 = vmatprep.subr.bf16.mxu0 %v7474_v14  ;;  %v7520_v13 = vld [vmem:[%s9530_s2 + $0x18] sm:$0xff]  }
  0xe6   :  { %6846 = vmatprep.subr.bf16.mxu1 %v7475_v15  ;;  %2781 = vmatprep.mubr.bf16.mxu0 %v6157_v60  ;;  %v7521_v14 = vld [vmem:[%s9531_s1 + $0x18] sm:$0xff]   ;;  %v7522_v15 = vld [vmem:[%s9530_s2 + $0x60] sm:$0xff]   ;;  %v7550_v60 = vld [vmem:[%s9530_s2 + $0x50] sm:$0xff]  }
  0xe7   :  { %2924 = vmatprep.mubr.bf16.mxu1 %v6175_v62  ;;  %v7552_v62 = vld [vmem:[%s9530_s2 + $0x10] sm:$0xff]  }
  0xe8   :  { %6825 = vmatpush3.bf16.msra.mxu0 %v7476_v16  ;;  %v7523_v16 = vld [vmem:[%s9531_s1 + $0x60] sm:$0xff]  }
  0xe9   :  { %6847 = vmatpush3.bf16.msra.mxu1 %v7477_v17  ;;  %6826 = vmatprep.subr.bf16.mxu0 %v7478_v18  ;;  %v7524_v17 = vld [vmem:[%s9530_s2 + $0x20] sm:$0xff]  }
  0xea   :  { %6848 = vmatprep.subr.bf16.mxu1 %v7479_v19  ;;  %v7525_v19 = vld [vmem:[%s9531_s1 + $0x20] sm:$0xff]  }
  0xec   :  { %6827 = vmatpush3.bf16.msra.mxu0 %v7480_v20 }
  0xed   :  { %6849 = vmatpush3.bf16.msra.mxu1 %v7481_v21  ;;  %6828 = vmatprep.subr.bf16.mxu0 %v7482_v22 }
  0xee   :  { %6850 = vmatprep.subr.bf16.mxu1 %v7483_v23 }
  0xf0   :  { %6829 = vmatpush3.bf16.msra.mxu0 %v7484_v24 }
  0xf1   :  { %6851 = vmatpush3.bf16.msra.mxu1 %v7485_v25  ;;  %6830 = vmatprep.subr.bf16.mxu0 %v7486_v26  ;;  %v7526_v25 = vld [vmem:[%s9530_s2 + $0x68] sm:$0xff]  }
  0xf2   :  { %6852 = vmatprep.subr.bf16.mxu1 %v7487_v27  ;;  %v7527_v27 = vld [vmem:[%s9531_s1 + $0x68] sm:$0xff]  }
  0xf4   :  { %6831 = vmatpush3.bf16.msra.mxu0 %v7488_v28 }
  0xf5   :  { %6853 = vmatpush3.bf16.msra.mxu1 %v7489_v30  ;;  %6832 = vmatprep.subr.bf16.mxu0 %v7490_v33  ;;  %v7528_v30 = vld [vmem:[%s9530_s2 + $0x28] sm:$0xff]  }
  0xf6   :  { %v6530_v29 = vpop.f32.mrb[0].mxu0  ;;  %6854 = vmatprep.subr.bf16.mxu1 %v7491_v37  ;;  %v7531_v37 = vld [vmem:[%s9531_s1 + $0x70] sm:$0xff]  }
  0xf7   :  { %v6552_v31 = vpop.f32.mrb[0].mxu1  ;;  %v6531_v32 = vpop.f32.mrb[1].mxu0 }
  0xf8   :  { %v6532_v34 = vadd.f32 %v6531_v32, %v6530_v29  ;;  %v6553_v35 = vpop.f32.mrb[1].mxu1  ;;  %v6533_v39 = vpop.f32.mrb[2].mxu0  ;;  %6833 = vmatpush3.bf16.msra.mxu0 %v7492_v42  ;;  %v7529_v32 = vld [vmem:[%s9531_s1 + $0x28] sm:$0xff]   ;;  %v7534_v42 = vld [vmem:[%s9530_s2 + $0x78] sm:$0xff]  }
  0xf9   :  { %v6554_v38 = vadd.f32 %v6553_v35, %v6552_v31  ;;  %v6555_v40 = vpop.f32.mrb[2].mxu1  ;;  %v6534_v43 = vpop.f32.mrb[3].mxu0  ;;  %6855 = vmatpush3.bf16.msra.mxu1 %v7493_v44  ;;  %6834 = vmatprep.subr.bf16.mxu0 %v7494_v47  ;;  %v7530_v35 = vld [vmem:[%s9530_s2 + $0x70] sm:$0xff]   ;;  %v7536_v44 = vld [vmem:[%s9530_s2 + $0x38] sm:$0xff]   ;;  %v6194_v47 = vld [vmem:[%s9532_s0 + $0x80] sm:$0xff] }
  0xfa   :  { %v6556_v45 = vpop.f32.mrb[3].mxu1  ;;  %6856 = vmatprep.subr.bf16.mxu1 %v7495_v48  ;;  %v7532_v39 = vld [vmem:[%s9530_s2 + $0x30] sm:$0xff]   ;;  %v7535_v43 = vld [vmem:[%s9531_s1 + $0x78] sm:$0xff]  }
  0xfb   :  { %v366_v41 = vadd.f32 %v6554_v38, %v6532_v34  ;;  %v7533_v40 = vld [vmem:[%s9531_s1 + $0x30] sm:$0xff]   ;;  %v7537_v45 = vld [vmem:[%s9531_s1 + $0x38] sm:$0xff]  }
  0xfc   :  { %6835 = vmatpush3.bf16.msra.mxu0 %v7496_v50  ;;  %v6214_v50 = vcombine.low %v6194_v47, %v6194_v47 }
  0xfd   :  { %v378_v46 = vadd.f32 %v8599_v36, %v366_v41  ;;  %6857 = vmatpush3.bf16.msra.mxu1 %v7497_v51  ;;  %6836 = vmatprep.subr.bf16.mxu0 %v7498_v53  ;;  %v6215_v51 = vcombine.high %v6194_v47, %v6194_v47  ;;  %v7543_v53 = vld [vmem:[%s9531_s1 + $0x40] sm:$0xff]   ;;  %v7584_v47 = vld [vmem:[%s9530_s2 + $0x8] sm:$0xff]  }
  0xfe   :  { %6858 = vmatprep.subr.bf16.mxu1 %v7499_v54  ;;  %v7544_v54 = vld [vmem:[%s9530_s2] sm:$0xff]  }
  0xff   :  { %v379_v49 = vmax.f32 %v378_v46, 0.0  ;;  %v6195_v46 = vld [vmem:[%s9532_s0 + $0x88] sm:$0xff] }
 0x100   :  { %6837 = vmatpush3.bf16.msra.mxu0 %v7500_v55  ;;  %v6196_v48 = vcombine.low %v6195_v46, %v6195_v46  ;;  %v7545_v55 = vld [vmem:[%s9531_s1] sm:$0xff]  }
 0x101   :  { %v380_v52 = vpack.c.bf16 %v379_v49, %v379_v49  ;;  %6859 = vmatpush3.bf16.msra.mxu1 %v7501_v56  ;;  %6866 = vmatprep.subr.bf16.mxu0 %v7506_v63  ;;  %v6197_v49 = vcombine.high %v6195_v46, %v6195_v46  ;;  %v7546_v56 = vld [vmem:[%s9530_s2 + $0x48] sm:$0xff]   ;;  %v7553_v63 = vld [vmem:[%s9531_s1 + $0x10] sm:$0xff]  }
 0x102   :  { %6888 = vmatprep.subr.bf16.mxu1 %v7507_v0  ;;  %v7554_v0 = vld [vmem:[%s9530_s2 + $0x58] sm:$0xff]   ;;  %v7583_v46 = vld [vmem:[%s9531_s1 + $0x48] sm:$0xff]  }
 0x103   :  { %381 = vst [vmem:[%s9534_s4] sm:$0xf] %v380_v52  ;;  %2782 = vmatmul.mubr.bf16.vlgmr.msra.gmra.mrb[28].mxu0 %v6156_v59  ;;  %v7542_v52 = vld [vmem:[%s9530_s2 + $0x40] sm:$0xff]   ;;  %v7549_v59 = vld [vmem:[%s9531_s1 + $0x8] sm:$0xff]  }
 0x104   :  { %2925 = vmatmul.mubr.bf16.vlgmr.msra.gmra.mrb[28].mxu1 %v6174_v61  ;;  %6867 = vmatpush3.bf16.msra.mxu0 %v7508_v1  ;;  %v7551_v61 = vld [vmem:[%s9531_s1 + $0x50] sm:$0xff]   ;;  %v7555_v1 = vld [vmem:[%s9531_s1 + $0x58] sm:$0xff]  }
 0x105   :  { %6889 = vmatpush3.bf16.msra.mxu1 %v7509_v2  ;;  %6868 = vmatprep.subr.bf16.mxu0 %v7510_v3  ;;  %v7556_v2 = vld [vmem:[%s9530_s2 + $0x18] sm:$0xff]  }
 0x106   :  { %6890 = vmatprep.subr.bf16.mxu1 %v7511_v4  ;;  %3147 = vmatprep.mubr.bf16.mxu0 %v6197_v49  ;;  %v7557_v3 = vld [vmem:[%s9531_s1 + $0x18] sm:$0xff]   ;;  %v7558_v4 = vld [vmem:[%s9530_s2 + $0x60] sm:$0xff]   ;;  %v7586_v49 = vld [vmem:[%s9530_s2 + $0x50] sm:$0xff]  }
 0x107   :  { %3290 = vmatprep.mubr.bf16.mxu1 %v6215_v51  ;;  %v7588_v51 = vld [vmem:[%s9530_s2 + $0x10] sm:$0xff]  }
 0x108   :  { %6869 = vmatpush3.bf16.msra.mxu0 %v7512_v5  ;;  %v7559_v5 = vld [vmem:[%s9531_s1 + $0x60] sm:$0xff]  }
 0x109   :  { %6891 = vmatpush3.bf16.msra.mxu1 %v7513_v6  ;;  %6870 = vmatprep.subr.bf16.mxu0 %v7514_v7  ;;  %v7560_v7 = vld [vmem:[%s9530_s2 + $0x20] sm:$0xff]  }
 0x10a   :  { %6892 = vmatprep.subr.bf16.mxu1 %v7515_v8 }
 0x10c   :  { %6871 = vmatpush3.bf16.msra.mxu0 %v7516_v9  ;;  %v7561_v9 = vld [vmem:[%s9531_s1 + $0x20] sm:$0xff]  }
 0x10d   :  { %6893 = vmatpush3.bf16.msra.mxu1 %v7517_v10  ;;  %6872 = vmatprep.subr.bf16.mxu0 %v7518_v11 }
 0x10e   :  { %6894 = vmatprep.subr.bf16.mxu1 %v7519_v12 }
 0x110   :  { %6873 = vmatpush3.bf16.msra.mxu0 %v7520_v13  ;;  %v7562_v13 = vld [vmem:[%s9530_s2 + $0x68] sm:$0xff]  }
 0x111   :  { %6895 = vmatpush3.bf16.msra.mxu1 %v7521_v14  ;;  %6874 = vmatprep.subr.bf16.mxu0 %v7522_v15  ;;  %v7563_v15 = vld [vmem:[%s9531_s1 + $0x68] sm:$0xff]  }
 0x112   :  { %6896 = vmatprep.subr.bf16.mxu1 %v7523_v16 }
 0x114   :  { %6875 = vmatpush3.bf16.msra.mxu0 %v7524_v17 }
 0x115   :  { %6897 = vmatpush3.bf16.msra.mxu1 %v7525_v19  ;;  %6876 = vmatprep.subr.bf16.mxu0 %v7526_v25  ;;  %v7567_v25 = vld [vmem:[%s9531_s1 + $0x70] sm:$0xff]  }
 0x116   :  { %v6574_v18 = vpop.f32.mrb[4].mxu0  ;;  %6898 = vmatprep.subr.bf16.mxu1 %v7527_v27 }
 0x117   :  { %v6596_v20 = vpop.f32.mrb[4].mxu1  ;;  %v6575_v21 = vpop.f32.mrb[5].mxu0 }
 0x118   :  { %v6597_v22 = vpop.f32.mrb[5].mxu1  ;;  %v6576_v23 = vadd.f32 %v6575_v21, %v6574_v18  ;;  %v6577_v26 = vpop.f32.mrb[6].mxu0  ;;  %6877 = vmatpush3.bf16.msra.mxu0 %v7528_v30  ;;  %v7564_v18 = vld [vmem:[%s9530_s2 + $0x28] sm:$0xff]  }
 0x119   :  { %v6598_v24 = vadd.f32 %v6597_v22, %v6596_v20  ;;  %v6599_v28 = vpop.f32.mrb[6].mxu1  ;;  %v6578_v31 = vpop.f32.mrb[7].mxu0  ;;  %6899 = vmatpush3.bf16.msra.mxu1 %v7529_v32  ;;  %6878 = vmatprep.subr.bf16.mxu0 %v7530_v35  ;;  %v7565_v20 = vld [vmem:[%s9531_s1 + $0x28] sm:$0xff]   ;;  %v7568_v26 = vld [vmem:[%s9530_s2 + $0x30] sm:$0xff]   ;;  %v7572_v32 = vld [vmem:[%s9530_s2 + $0x38] sm:$0xff]  }
 0x11a   :  { %v6600_v33 = vpop.f32.mrb[7].mxu1  ;;  %6900 = vmatprep.subr.bf16.mxu1 %v7531_v37  ;;  %v7569_v28 = vld [vmem:[%s9531_s1 + $0x30] sm:$0xff]   ;;  %v7571_v31 = vld [vmem:[%s9531_s1 + $0x78] sm:$0xff]  }
 0x11b   :  { %v731_v29 = vadd.f32 %v6598_v24, %v6576_v23  ;;  %v7566_v23 = vld [vmem:[%s9530_s2 + $0x70] sm:$0xff]   ;;  %v7573_v33 = vld [vmem:[%s9531_s1 + $0x38] sm:$0xff]  }
 0x11c   :  { %6879 = vmatpush3.bf16.msra.mxu0 %v7532_v39  ;;  %v6234_v35 = vld [vmem:[%s9532_s0 + $0x90] sm:$0xff] }
 0x11d   :  { %v743_v34 = vadd.f32 %v8599_v36, %v731_v29  ;;  %6901 = vmatpush3.bf16.msra.mxu1 %v7533_v40  ;;  %6880 = vmatprep.subr.bf16.mxu0 %v7534_v42  ;;  %v7570_v29 = vld [vmem:[%s9530_s2 + $0x78] sm:$0xff]   ;;  %v6254_v39 = vcombine.low %v6234_v35, %v6234_v35  ;;  %v7578_v40 = vld [vmem:[%s9530_s2 + $0x40] sm:$0xff]  }
 0x11e   :  { %6902 = vmatprep.subr.bf16.mxu1 %v7535_v43  ;;  %v7579_v42 = vld [vmem:[%s9531_s1 + $0x40] sm:$0xff]  }
 0x11f   :  { %v744_v38 = vmax.f32 %v743_v34, 0.0  ;;  %v6235_v34 = vld [vmem:[%s9532_s0 + $0x98] sm:$0xff]  ;;  %v7580_v43 = vld [vmem:[%s9530_s2] sm:$0xff]  }
 0x120   :  { %6881 = vmatpush3.bf16.msra.mxu0 %v7536_v44  ;;  %v6236_v37 = vcombine.low %v6235_v34, %v6235_v34  ;;  %v7581_v44 = vld [vmem:[%s9531_s1] sm:$0xff]  }
 0x121   :  { %v745_v41 = vpack.c.bf16 %v744_v38, %v744_v38  ;;  %6903 = vmatpush3.bf16.msra.mxu1 %v7537_v45  ;;  %6910 = vmatprep.subr.bf16.mxu0 %v7542_v52  ;;  %v6237_v38 = vcombine.high %v6235_v34, %v6235_v34  ;;  %v7582_v45 = vld [vmem:[%s9530_s2 + $0x48] sm:$0xff]   ;;  %v7589_v52 = vld [vmem:[%s9531_s1 + $0x10] sm:$0xff]  }
 0x122   :  { %6932 = vmatprep.subr.bf16.mxu1 %v7543_v53  ;;  %v7590_v53 = vld [vmem:[%s9530_s2 + $0x58] sm:$0xff]   ;;  %v7620_v34 = vld [vmem:[%s9530_s2 + $0x8] sm:$0xff]  }
 0x123   :  { %5953 = vst [vmem:[%s9534_s4 + $0x4] sm:$0xf] %v745_v41  ;;  %3148 = vmatmul.mubr.bf16.vlgmr.msra.gmra.mrb[32].mxu0 %v6196_v48  ;;  %v6255_v41 = vcombine.high %v6234_v35, %v6234_v35  ;;  %v7585_v48 = vld [vmem:[%s9531_s1 + $0x8] sm:$0xff]  }
 0x124   :  { %3291 = vmatmul.mubr.bf16.vlgmr.msra.gmra.mrb[32].mxu1 %v6214_v50  ;;  %6911 = vmatpush3.bf16.msra.mxu0 %v7544_v54  ;;  %v7587_v50 = vld [vmem:[%s9531_s1 + $0x50] sm:$0xff]   ;;  %v7591_v54 = vld [vmem:[%s9531_s1 + $0x58] sm:$0xff]   ;;  %v7621_v35 = vld [vmem:[%s9531_s1 + $0x8] sm:$0xff]  }
 0x125   :  { %6933 = vmatpush3.bf16.msra.mxu1 %v7545_v55  ;;  %6912 = vmatprep.subr.bf16.mxu0 %v7546_v56  ;;  %v7592_v55 = vld [vmem:[%s9530_s2 + $0x18] sm:$0xff]  }
 0x126   :  { %6934 = vmatprep.subr.bf16.mxu1 %v7547_v57  ;;  %3513 = vmatprep.mubr.bf16.mxu0 %v6237_v38  ;;  %v7593_v56 = vld [vmem:[%s9531_s1 + $0x18] sm:$0xff]   ;;  %v7594_v57 = vld [vmem:[%s9530_s2 + $0x60] sm:$0xff]   ;;  %v7623_v38 = vld [vmem:[%s9531_s1 + $0x50] sm:$0xff]  }
 0x127   :  { %3656 = vmatprep.mubr.bf16.mxu1 %v6255_v41  ;;  %v7626_v41 = vld [vmem:[%s9530_s2 + $0x58] sm:$0xff]  }
 0x128   :  { %6913 = vmatpush3.bf16.msra.mxu0 %v7548_v58  ;;  %v7595_v58 = vld [vmem:[%s9531_s1 + $0x60] sm:$0xff]  }
 0x129   :  { %6935 = vmatpush3.bf16.msra.mxu1 %v7549_v59  ;;  %6914 = vmatprep.subr.bf16.mxu0 %v7550_v60  ;;  %v7596_v60 = vld [vmem:[%s9530_s2 + $0x20] sm:$0xff]  }
 0x12a   :  { %6936 = vmatprep.subr.bf16.mxu1 %v7551_v61 }
 0x12c   :  { %6915 = vmatpush3.bf16.msra.mxu0 %v7552_v62  ;;  %v7597_v62 = vld [vmem:[%s9531_s1 + $0x20] sm:$0xff]  }
 0x12d   :  { %6937 = vmatpush3.bf16.msra.mxu1 %v7553_v63  ;;  %6916 = vmatprep.subr.bf16.mxu0 %v7554_v0 }
 0x12e   :  { %6938 = vmatprep.subr.bf16.mxu1 %v7555_v1  ;;  %v7598_v1 = vld [vmem:[%s9530_s2 + $0x68] sm:$0xff]  }
 0x130   :  { %6917 = vmatpush3.bf16.msra.mxu0 %v7556_v2 }
 0x131   :  { %6939 = vmatpush3.bf16.msra.mxu1 %v7557_v3  ;;  %6918 = vmatprep.subr.bf16.mxu0 %v7558_v4  ;;  %v7599_v4 = vld [vmem:[%s9531_s1 + $0x68] sm:$0xff]  }
 0x132   :  { %6940 = vmatprep.subr.bf16.mxu1 %v7559_v5 }
 0x134   :  { %6919 = vmatpush3.bf16.msra.mxu0 %v7560_v7  ;;  %v7600_v7 = vld [vmem:[%s9530_s2 + $0x28] sm:$0xff]  }
 0x135   :  { %6941 = vmatpush3.bf16.msra.mxu1 %v7561_v9  ;;  %6920 = vmatprep.subr.bf16.mxu0 %v7562_v13  ;;  %v7601_v9 = vld [vmem:[%s9531_s1 + $0x28] sm:$0xff]  }
 0x136   :  { %v6618_v6 = vpop.f32.mrb[8].mxu0  ;;  %6942 = vmatprep.subr.bf16.mxu1 %v7563_v15 }
 0x137   :  { %v6640_v8 = vpop.f32.mrb[8].mxu1  ;;  %v6619_v10 = vpop.f32.mrb[9].mxu0 }
 0x138   :  { %v6620_v11 = vadd.f32 %v6619_v10, %v6618_v6  ;;  %v6641_v12 = vpop.f32.mrb[9].mxu1  ;;  %v6621_v16 = vpop.f32.mrb[10].mxu0  ;;  %6921 = vmatpush3.bf16.msra.mxu0 %v7564_v18 }
 0x139   :  { %v6642_v14 = vadd.f32 %v6641_v12, %v6640_v8  ;;  %v6643_v17 = vpop.f32.mrb[10].mxu1  ;;  %v6622_v21 = vpop.f32.mrb[11].mxu0  ;;  %6943 = vmatpush3.bf16.msra.mxu1 %v7565_v20  ;;  %6922 = vmatprep.subr.bf16.mxu0 %v7566_v23  ;;  %v7602_v12 = vld [vmem:[%s9530_s2 + $0x70] sm:$0xff]   ;;  %v7608_v20 = vld [vmem:[%s9530_s2 + $0x38] sm:$0xff]  }
 0x13a   :  { %v6644_v22 = vpop.f32.mrb[11].mxu1  ;;  %6944 = vmatprep.subr.bf16.mxu1 %v7567_v25  ;;  %v7604_v16 = vld [vmem:[%s9530_s2 + $0x30] sm:$0xff]   ;;  %v7609_v21 = vld [vmem:[%s9531_s1 + $0x38] sm:$0xff]   ;;  %v6274_v25 = vld [vmem:[%s9532_s0 + $0xa0] sm:$0xff] }
 0x13b   :  { %v1097_v19 = vadd.f32 %v6642_v14, %v6620_v11  ;;  %v7603_v14 = vld [vmem:[%s9531_s1 + $0x70] sm:$0xff]   ;;  %v6275_v22 = vld [vmem:[%s9532_s0 + $0xa8] sm:$0xff] }
 0x13c   :  { %6923 = vmatpush3.bf16.msra.mxu0 %v7568_v26  ;;  %v7605_v17 = vld [vmem:[%s9531_s1 + $0x30] sm:$0xff]   ;;  %v6276_v23 = vcombine.low %v6275_v22, %v6275_v22  ;;  %v6294_v26 = vcombine.low %v6274_v25, %v6274_v25 }
 0x13d   :  { %v1109_v24 = vadd.f32 %v8599_v36, %v1097_v19  ;;  %6945 = vmatpush3.bf16.msra.mxu1 %v7569_v28  ;;  %6924 = vmatprep.subr.bf16.mxu0 %v7570_v29  ;;  %v7607_v19 = vld [vmem:[%s9531_s1 + $0x78] sm:$0xff]   ;;  %v7614_v28 = vld [vmem:[%s9530_s2 + $0x40] sm:$0xff]  }
 0x13e   :  { %6946 = vmatprep.subr.bf16.mxu1 %v7571_v31  ;;  %v7615_v29 = vld [vmem:[%s9531_s1 + $0x40] sm:$0xff]  }
 0x13f   :  { %v1110_v27 = vmax.f32 %v1109_v24, 0.0  ;;  %v6277_v24 = vcombine.high %v6275_v22, %v6275_v22  ;;  %v7617_v31 = vld [vmem:[%s9531_s1] sm:$0xff]   ;;  %v7655_v22 = vld [vmem:[%s9531_s1 + $0x48] sm:$0xff]  }
 0x140   :  { %6925 = vmatpush3.bf16.msra.mxu0 %v7572_v32  ;;  %v7618_v32 = vld [vmem:[%s9530_s2 + $0x48] sm:$0xff]  }
 0x141   :  { %v1111_v30 = vpack.c.bf16 %v1110_v27, %v1110_v27  ;;  %6947 = vmatpush3.bf16.msra.mxu1 %v7573_v33  ;;  %6954 = vmatprep.subr.bf16.mxu0 %v7578_v40  ;;  %v6295_v27 = vcombine.high %v6274_v25, %v6274_v25  ;;  %v7619_v33 = vld [vmem:[%s9531_s1 + $0x48] sm:$0xff]   ;;  %v7625_v40 = vld [vmem:[%s9531_s1 + $0x10] sm:$0xff]  }
 0x142   :  { %6976 = vmatprep.subr.bf16.mxu1 %v7579_v42  ;;  %v7627_v42 = vld [vmem:[%s9531_s1 + $0x58] sm:$0xff]   ;;  %v7658_v25 = vld [vmem:[%s9530_s2 + $0x50] sm:$0xff]  }
 0x143   :  { %5993 = vst [vmem:[%s9534_s4 + $0x8] sm:$0xf] %v1111_v30  ;;  %3514 = vmatmul.mubr.bf16.vlgmr.msra.gmra.mrb[36].mxu0 %v6236_v37  ;;  %v7616_v30 = vld [vmem:[%s9530_s2] sm:$0xff]   ;;  %v7622_v37 = vld [vmem:[%s9530_s2 + $0x50] sm:$0xff]  }
 0x144   :  { %3657 = vmatmul.mubr.bf16.vlgmr.msra.gmra.mrb[36].mxu1 %v6254_v39  ;;  %6955 = vmatpush3.bf16.msra.mxu0 %v7580_v43  ;;  %v7624_v39 = vld [vmem:[%s9530_s2 + $0x10] sm:$0xff]   ;;  %v7628_v43 = vld [vmem:[%s9530_s2 + $0x18] sm:$0xff]  }
 0x145   :  { %6977 = vmatpush3.bf16.msra.mxu1 %v7581_v44  ;;  %6956 = vmatprep.subr.bf16.mxu0 %v7582_v45  ;;  %v7629_v44 = vld [vmem:[%s9531_s1 + $0x18] sm:$0xff]   ;;  %v7630_v45 = vld [vmem:[%s9530_s2 + $0x60] sm:$0xff]  }
 0x146   :  { %6978 = vmatprep.subr.bf16.mxu1 %v7583_v46  ;;  %3879 = vmatprep.mubr.bf16.mxu0 %v6277_v24  ;;  %v7631_v46 = vld [vmem:[%s9531_s1 + $0x60] sm:$0xff]   ;;  %v7657_v24 = vld [vmem:[%s9531_s1 + $0x8] sm:$0xff]  }
 0x147   :  { %4022 = vmatprep.mubr.bf16.mxu1 %v6295_v27  ;;  %v7660_v27 = vld [vmem:[%s9530_s2 + $0x10] sm:$0xff]  }
 0x148   :  { %6957 = vmatpush3.bf16.msra.mxu0 %v7584_v47 }
 0x149   :  { %6979 = vmatpush3.bf16.msra.mxu1 %v7585_v48  ;;  %6958 = vmatprep.subr.bf16.mxu0 %v7586_v49  ;;  %v7632_v48 = vld [vmem:[%s9530_s2 + $0x20] sm:$0xff]  }
 0x14a   :  { %6980 = vmatprep.subr.bf16.mxu1 %v7587_v50  ;;  %v7633_v50 = vld [vmem:[%s9531_s1 + $0x20] sm:$0xff]  }
 0x14c   :  { %6959 = vmatpush3.bf16.msra.mxu0 %v7588_v51 }
 0x14d   :  { %6981 = vmatpush3.bf16.msra.mxu1 %v7589_v52  ;;  %6960 = vmatprep.subr.bf16.mxu0 %v7590_v53  ;;  %v9025_v53 = vld [vmem:[%s9533_s3] ss:$0 sm:$0xff] }
 0x14e   :  { %6982 = vmatprep.subr.bf16.mxu1 %v7591_v54  ;;  %v7634_v54 = vld [vmem:[%s9530_s2 + $0x68] sm:$0xff]  }
 0x150   :  { %6961 = vmatpush3.bf16.msra.mxu0 %v7592_v55 }
 0x151   :  { %6983 = vmatpush3.bf16.msra.mxu1 %v7593_v56  ;;  %6962 = vmatprep.subr.bf16.mxu0 %v7594_v57  ;;  %v7635_v57 = vld [vmem:[%s9531_s1 + $0x68] sm:$0xff]  }
 0x152   :  { %6984 = vmatprep.subr.bf16.mxu1 %v7595_v58 }
 0x154   :  { %6963 = vmatpush3.bf16.msra.mxu0 %v7596_v60  ;;  %v7636_v60 = vld [vmem:[%s9530_s2 + $0x28] sm:$0xff]  }
 0x155   :  { %6985 = vmatpush3.bf16.msra.mxu1 %v7597_v62  ;;  %6964 = vmatprep.subr.bf16.mxu0 %v7598_v1  ;;  %v7637_v62 = vld [vmem:[%s9531_s1 + $0x28] sm:$0xff]   ;;  %v7638_v1 = vld [vmem:[%s9530_s2 + $0x70] sm:$0xff]  }
 0x156   :  { %v6662_v59 = vpop.f32.mrb[12].mxu0  ;;  %6986 = vmatprep.subr.bf16.mxu1 %v7599_v4 }
 0x157   :  { %v6684_v61 = vpop.f32.mrb[12].mxu1  ;;  %v6663_v63 = vpop.f32.mrb[13].mxu0 }
 0x158   :  { %v6685_v0 = vpop.f32.mrb[13].mxu1  ;;  %v6664_v2 = vadd.f32 %v6663_v63, %v6662_v59  ;;  %v6665_v5 = vpop.f32.mrb[14].mxu0  ;;  %6965 = vmatpush3.bf16.msra.mxu0 %v7600_v7 }
 0x159   :  { %v6686_v3 = vadd.f32 %v6685_v0, %v6684_v61  ;;  %v6687_v6 = vpop.f32.mrb[14].mxu1  ;;  %v6666_v10 = vpop.f32.mrb[15].mxu0  ;;  %6987 = vmatpush3.bf16.msra.mxu1 %v7601_v9  ;;  %6966 = vmatprep.subr.bf16.mxu0 %v7602_v12  ;;  %v7640_v5 = vld [vmem:[%s9530_s2 + $0x30] sm:$0xff]   ;;  %v7643_v9 = vld [vmem:[%s9531_s1 + $0x78] sm:$0xff]  }
 0x15a   :  { %v6688_v11 = vpop.f32.mrb[15].mxu1  ;;  %6988 = vmatprep.subr.bf16.mxu1 %v7603_v14  ;;  %v7641_v6 = vld [vmem:[%s9531_s1 + $0x30] sm:$0xff]   ;;  %v7644_v10 = vld [vmem:[%s9530_s2 + $0x38] sm:$0xff]  }
 0x15b   :  { %v1463_v8 = vadd.f32 %v6686_v3, %v6664_v2  ;;  %v7639_v3 = vld [vmem:[%s9531_s1 + $0x70] sm:$0xff]   ;;  %v7645_v11 = vld [vmem:[%s9531_s1 + $0x38] sm:$0xff]  }
 0x15c   :  { %6967 = vmatpush3.bf16.msra.mxu0 %v7604_v16  ;;  %v6315_v12 = vld [vmem:[%s9532_s0 + $0xb8] sm:$0xff] }
 0x15d   :  { %v1475_v13 = vadd.f32 %v8599_v36, %v1463_v8  ;;  %v7606_v36 = vld [vmem:[%s9530_s2 + $0x78] sm:$0xff]   ;;  %6989 = vmatpush3.bf16.msra.mxu1 %v7605_v17  ;;  %v6317_v14 = vcombine.high %v6315_v12, %v6315_v12 }
 0x15e   :  { %6968 = vmatprep.subr.bf16.mxu0 %v7606_v36  ;;  %6990 = vmatprep.subr.bf16.mxu1 %v7607_v19  ;;  %v7642_v8 = vld [vmem:[%s9530_s2 + $0x78] sm:$0xff]   ;;  %v7651_v36 = vld [vmem:[%s9531_s1 + $0x40] sm:$0xff]  }
 0x15f   :  { %v1476_v15 = vmax.f32 %v1475_v13, 0.0  ;;  %v6316_v13 = vcombine.low %v6315_v12, %v6315_v12  ;;  %v7652_v19 = vld [vmem:[%s9530_s2] sm:$0xff]   ;;  %v7691_v12 = vld [vmem:[%s9531_s1 + $0x48] sm:$0xff]  }
 0x160   :  { %6969 = vmatpush3.bf16.msra.mxu0 %v7608_v20  ;;  %v7653_v20 = vld [vmem:[%s9531_s1] sm:$0xff]  }
 0x161   :  { %v1477_v18 = vpack.c.bf16 %v1476_v15, %v1476_v15  ;;  %6991 = vmatpush3.bf16.msra.mxu1 %v7609_v21  ;;  %6998 = vmatprep.subr.bf16.mxu0 %v7614_v28  ;;  %v6314_v15 = vld [vmem:[%s9532_s0 + $0xb0] sm:$0xff]  ;;  %v7654_v21 = vld [vmem:[%s9530_s2 + $0x48] sm:$0xff]  }
 0x162   :  { %7020 = vmatprep.subr.bf16.mxu1 %v7615_v29  ;;  %v6334_v16 = vcombine.low %v6314_v15, %v6314_v15  ;;  %v6335_v17 = vcombine.high %v6314_v15, %v6314_v15  ;;  %v7661_v28 = vld [vmem:[%s9531_s1 + $0x10] sm:$0xff]   ;;  %v7662_v29 = vld [vmem:[%s9530_s2 + $0x58] sm:$0xff]  }
 0x163   :  { %6033 = vst [vmem:[%s9534_s4 + $0xc] sm:$0xf] %v1477_v18  ;;  %3880 = vmatmul.mubr.bf16.vlgmr.msra.gmra.mrb[40].mxu0 %v6276_v23  ;;  %v7650_v18 = vld [vmem:[%s9530_s2 + $0x40] sm:$0xff]   ;;  %v7656_v23 = vld [vmem:[%s9530_s2 + $0x8] sm:$0xff]   ;;  %v7694_v15 = vld [vmem:[%s9530_s2 + $0x50] sm:$0xff]  }
 0x164   :  { %4023 = vmatmul.mubr.bf16.vlgmr.msra.gmra.mrb[40].mxu1 %v6294_v26  ;;  %6999 = vmatpush3.bf16.msra.mxu0 %v7616_v30  ;;  %v7659_v26 = vld [vmem:[%s9531_s1 + $0x50] sm:$0xff]   ;;  %v7663_v30 = vld [vmem:[%s9531_s1 + $0x58] sm:$0xff]  }
 0x165   :  { %7021 = vmatpush3.bf16.msra.mxu1 %v7617_v31  ;;  %7000 = vmatprep.subr.bf16.mxu0 %v7618_v32  ;;  %v7664_v31 = vld [vmem:[%s9530_s2 + $0x18] sm:$0xff]  }
 0x166   :  { %7022 = vmatprep.subr.bf16.mxu1 %v7619_v33  ;;  %4245 = vmatprep.mubr.bf16.mxu0 %v6317_v14  ;;  %v7665_v32 = vld [vmem:[%s9531_s1 + $0x18] sm:$0xff]   ;;  %v7666_v33 = vld [vmem:[%s9530_s2 + $0x60] sm:$0xff]   ;;  %v7693_v14 = vld [vmem:[%s9531_s1 + $0x8] sm:$0xff]  }
 0x167   :  { %4388 = vmatprep.mubr.bf16.mxu1 %v6335_v17  ;;  %v7696_v17 = vld [vmem:[%s9530_s2 + $0x10] sm:$0xff]  }
 0x168   :  { %7001 = vmatpush3.bf16.msra.mxu0 %v7620_v34 }
 0x169   :  { %7023 = vmatpush3.bf16.msra.mxu1 %v7621_v35  ;;  %7002 = vmatprep.subr.bf16.mxu0 %v7622_v37  ;;  %v7667_v35 = vld [vmem:[%s9531_s1 + $0x60] sm:$0xff]  }
 0x16a   :  { %7024 = vmatprep.subr.bf16.mxu1 %v7623_v38  ;;  %v7668_v38 = vld [vmem:[%s9530_s2 + $0x20] sm:$0xff]  }
 0x16c   :  { %7003 = vmatpush3.bf16.msra.mxu0 %v7624_v39 }
 0x16d   :  { %7025 = vmatpush3.bf16.msra.mxu1 %v7625_v40  ;;  %7004 = vmatprep.subr.bf16.mxu0 %v7626_v41  ;;  %v7669_v40 = vld [vmem:[%s9531_s1 + $0x20] sm:$0xff]  }
 0x16e   :  { %7026 = vmatprep.subr.bf16.mxu1 %v7627_v42 }
 0x170   :  { %7005 = vmatpush3.bf16.msra.mxu0 %v7628_v43 }
 0x171   :  { %7027 = vmatpush3.bf16.msra.mxu1 %v7629_v44  ;;  %7006 = vmatprep.subr.bf16.mxu0 %v7630_v45  ;;  %v7670_v44 = vld [vmem:[%s9530_s2 + $0x68] sm:$0xff]  }
 0x172   :  { %7028 = vmatprep.subr.bf16.mxu1 %v7631_v46  ;;  %v7671_v46 = vld [vmem:[%s9531_s1 + $0x68] sm:$0xff]  }
 0x174   :  { %7007 = vmatpush3.bf16.msra.mxu0 %v7632_v48 }
 0x175   :  { %7029 = vmatpush3.bf16.msra.mxu1 %v7633_v50  ;;  %7008 = vmatprep.subr.bf16.mxu0 %v7634_v54 }
 0x176   :  { %v6706_v47 = vpop.f32.mrb[16].mxu0  ;;  %7030 = vmatprep.subr.bf16.mxu1 %v7635_v57 }
 0x177   :  { %v6728_v49 = vpop.f32.mrb[16].mxu1  ;;  %v6707_v51 = vpop.f32.mrb[17].mxu0 }
 0x178   :  { %v6729_v52 = vpop.f32.mrb[17].mxu1  ;;  %v6708_v55 = vadd.f32 %v6707_v51, %v6706_v47  ;;  %v6709_v58 = vpop.f32.mrb[18].mxu0  ;;  %7009 = vmatpush3.bf16.msra.mxu0 %v7636_v60  ;;  %v7673_v51 = vld [vmem:[%s9531_s1 + $0x28] sm:$0xff]  }
 0x179   :  { %v6730_v56 = vadd.f32 %v6729_v52, %v6728_v49  ;;  %v6731_v59 = vpop.f32.mrb[18].mxu1  ;;  %v6710_v63 = vpop.f32.mrb[19].mxu0  ;;  %7031 = vmatpush3.bf16.msra.mxu1 %v7637_v62  ;;  %7010 = vmatprep.subr.bf16.mxu0 %v7638_v1  ;;  %v7672_v49 = vld [vmem:[%s9530_s2 + $0x28] sm:$0xff]   ;;  %v7676_v58 = vld [vmem:[%s9530_s2 + $0x30] sm:$0xff]   ;;  %v7679_v62 = vld [vmem:[%s9531_s1 + $0x78] sm:$0xff]  }
 0x17a   :  { %v6732_v0 = vpop.f32.mrb[19].mxu1  ;;  %7032 = vmatprep.subr.bf16.mxu1 %v7639_v3  ;;  %v7677_v59 = vld [vmem:[%s9531_s1 + $0x30] sm:$0xff]   ;;  %v7680_v63 = vld [vmem:[%s9530_s2 + $0x38] sm:$0xff]   ;;  %v6355_v1 = vld [vmem:[%s9532_s0 + $0xc8] sm:$0xff] }
 0x17b   :  { %v1829_v61 = vadd.f32 %v6730_v56, %v6708_v55  ;;  %v7674_v55 = vld [vmem:[%s9530_s2 + $0x70] sm:$0xff]   ;;  %v7681_v0 = vld [vmem:[%s9531_s1 + $0x38] sm:$0xff]   ;;  %v6356_v3 = vcombine.low %v6355_v1, %v6355_v1 }
 0x17c   :  { %7011 = vmatpush3.bf16.msra.mxu0 %v7640_v5  ;;  %v7675_v56 = vld [vmem:[%s9531_s1 + $0x70] sm:$0xff]  }
 0x17d   :  { %v1841_v2 = vadd.f32 %v9025_v53, %v1829_v61  ;;  %7033 = vmatpush3.bf16.msra.mxu1 %v7641_v6  ;;  %7012 = vmatprep.subr.bf16.mxu0 %v7642_v8  ;;  %v7678_v61 = vld [vmem:[%s9530_s2 + $0x78] sm:$0xff]   ;;  %v7687_v8 = vld [vmem:[%s9531_s1 + $0x40] sm:$0xff]  }
 0x17e   :  { %7034 = vmatprep.subr.bf16.mxu1 %v7643_v9  ;;  %v7688_v9 = vld [vmem:[%s9530_s2] sm:$0xff]  }
 0x17f   :  { %v1842_v4 = vmax.f32 %v1841_v2, 0.0  ;;  %v6354_v2 = vld [vmem:[%s9532_s0 + $0xc0] sm:$0xff] }
 0x180   :  { %7013 = vmatpush3.bf16.msra.mxu0 %v7644_v10  ;;  %v6374_v5 = vcombine.low %v6354_v2, %v6354_v2  ;;  %v6375_v6 = vcombine.high %v6354_v2, %v6354_v2  ;;  %v7689_v10 = vld [vmem:[%s9531_s1] sm:$0xff]   ;;  %v7728_v2 = vld [vmem:[%s9530_s2 + $0x8] sm:$0xff]  }
 0x181   :  { %v1843_v7 = vpack.c.bf16 %v1842_v4, %v1842_v4  ;;  %7035 = vmatpush3.bf16.msra.mxu1 %v7645_v11  ;;  %7042 = vmatprep.subr.bf16.mxu0 %v7650_v18  ;;  %v6357_v4 = vcombine.high %v6355_v1, %v6355_v1  ;;  %v7690_v11 = vld [vmem:[%s9530_s2 + $0x48] sm:$0xff]   ;;  %v7697_v18 = vld [vmem:[%s9531_s1 + $0x10] sm:$0xff]  }
 0x182   :  { %7064 = vmatprep.subr.bf16.mxu1 %v7651_v36  ;;  %v7698_v36 = vld [vmem:[%s9530_s2 + $0x58] sm:$0xff]   ;;  %v7727_v1 = vld [vmem:[%s9531_s1 + $0x48] sm:$0xff]  }
 0x183   :  { %6073 = vst [vmem:[%s9534_s4 + $0x10] sm:$0xf] %v1843_v7  ;;  %4246 = vmatmul.mubr.bf16.vlgmr.msra.gmra.mrb[44].mxu0 %v6316_v13  ;;  %v7686_v7 = vld [vmem:[%s9530_s2 + $0x40] sm:$0xff]   ;;  %v7692_v13 = vld [vmem:[%s9530_s2 + $0x8] sm:$0xff]  }
 0x184   :  { %4389 = vmatmul.mubr.bf16.vlgmr.msra.gmra.mrb[44].mxu1 %v6334_v16  ;;  %7043 = vmatpush3.bf16.msra.mxu0 %v7652_v19  ;;  %v7695_v16 = vld [vmem:[%s9531_s1 + $0x50] sm:$0xff]   ;;  %v7699_v19 = vld [vmem:[%s9531_s1 + $0x58] sm:$0xff]  }
 0x185   :  { %7065 = vmatpush3.bf16.msra.mxu1 %v7653_v20  ;;  %7044 = vmatprep.subr.bf16.mxu0 %v7654_v21  ;;  %v7700_v20 = vld [vmem:[%s9530_s2 + $0x18] sm:$0xff]  }
 0x186   :  { %7066 = vmatprep.subr.bf16.mxu1 %v7655_v22  ;;  %4611 = vmatprep.mubr.bf16.mxu0 %v6357_v4  ;;  %v7701_v21 = vld [vmem:[%s9531_s1 + $0x18] sm:$0xff]   ;;  %v7702_v22 = vld [vmem:[%s9530_s2 + $0x60] sm:$0xff]   ;;  %v7730_v4 = vld [vmem:[%s9530_s2 + $0x50] sm:$0xff]  }
 0x187   :  { %4754 = vmatprep.mubr.bf16.mxu1 %v6375_v6  ;;  %v7732_v6 = vld [vmem:[%s9530_s2 + $0x10] sm:$0xff]  }
 0x188   :  { %7045 = vmatpush3.bf16.msra.mxu0 %v7656_v23  ;;  %v7703_v23 = vld [vmem:[%s9531_s1 + $0x60] sm:$0xff]  }
 0x189   :  { %7067 = vmatpush3.bf16.msra.mxu1 %v7657_v24  ;;  %7046 = vmatprep.subr.bf16.mxu0 %v7658_v25  ;;  %v7704_v25 = vld [vmem:[%s9530_s2 + $0x20] sm:$0xff]  }
 0x18a   :  { %7068 = vmatprep.subr.bf16.mxu1 %v7659_v26 }
 0x18c   :  { %7047 = vmatpush3.bf16.msra.mxu0 %v7660_v27  ;;  %v7705_v27 = vld [vmem:[%s9531_s1 + $0x20] sm:$0xff]  }
 0x18d   :  { %7069 = vmatpush3.bf16.msra.mxu1 %v7661_v28  ;;  %7048 = vmatprep.subr.bf16.mxu0 %v7662_v29 }
 0x18e   :  { %7070 = vmatprep.subr.bf16.mxu1 %v7663_v30 }
 0x190   :  { %7049 = vmatpush3.bf16.msra.mxu0 %v7664_v31  ;;  %v7706_v31 = vld [vmem:[%s9530_s2 + $0x68] sm:$0xff]  }
 0x191   :  { %7071 = vmatpush3.bf16.msra.mxu1 %v7665_v32  ;;  %7050 = vmatprep.subr.bf16.mxu0 %v7666_v33  ;;  %v7707_v33 = vld [vmem:[%s9531_s1 + $0x68] sm:$0xff]  }
 0x192   :  { %7072 = vmatprep.subr.bf16.mxu1 %v7667_v35 }
 0x194   :  { %7051 = vmatpush3.bf16.msra.mxu0 %v7668_v38 }
 0x195   :  { %7073 = vmatpush3.bf16.msra.mxu1 %v7669_v40  ;;  %7052 = vmatprep.subr.bf16.mxu0 %v7670_v44  ;;  %v7711_v44 = vld [vmem:[%s9531_s1 + $0x70] sm:$0xff]  }
 0x196   :  { %v6750_v34 = vpop.f32.mrb[20].mxu0  ;;  %7074 = vmatprep.subr.bf16.mxu1 %v7671_v46 }
 0x197   :  { %v6772_v37 = vpop.f32.mrb[20].mxu1  ;;  %v6751_v39 = vpop.f32.mrb[21].mxu0 }
 0x198   :  { %v6752_v41 = vadd.f32 %v6751_v39, %v6750_v34  ;;  %v6773_v42 = vpop.f32.mrb[21].mxu1  ;;  %v6753_v45 = vpop.f32.mrb[22].mxu0  ;;  %7053 = vmatpush3.bf16.msra.mxu0 %v7672_v49  ;;  %v7709_v39 = vld [vmem:[%s9531_s1 + $0x28] sm:$0xff]  }
 0x199   :  { %v6774_v43 = vadd.f32 %v6773_v42, %v6772_v37  ;;  %v6775_v47 = vpop.f32.mrb[22].mxu1  ;;  %v6754_v50 = vpop.f32.mrb[23].mxu0  ;;  %7075 = vmatpush3.bf16.msra.mxu1 %v7673_v51  ;;  %7054 = vmatprep.subr.bf16.mxu0 %v7674_v55  ;;  %v7708_v37 = vld [vmem:[%s9530_s2 + $0x28] sm:$0xff]   ;;  %v7710_v42 = vld [vmem:[%s9530_s2 + $0x70] sm:$0xff]   ;;  %v7716_v51 = vld [vmem:[%s9530_s2 + $0x38] sm:$0xff]  }
 0x19a   :  { %v6776_v52 = vpop.f32.mrb[23].mxu1  ;;  %7076 = vmatprep.subr.bf16.mxu1 %v7675_v56  ;;  %v7712_v45 = vld [vmem:[%s9530_s2 + $0x30] sm:$0xff]   ;;  %v7715_v50 = vld [vmem:[%s9531_s1 + $0x78] sm:$0xff]  }
 0x19b   :  { %v2195_v48 = vadd.f32 %v6774_v43, %v6752_v41  ;;  %v7713_v47 = vld [vmem:[%s9531_s1 + $0x30] sm:$0xff]   ;;  %v7717_v52 = vld [vmem:[%s9531_s1 + $0x38] sm:$0xff]  }
 0x19c   :  { %7055 = vmatpush3.bf16.msra.mxu0 %v7676_v58  ;;  %v6394_v55 = vld [vmem:[%s9532_s0 + $0xd0] sm:$0xff] }
 0x19d   :  { %v2207_v54 = vadd.f32 %v9025_v53, %v2195_v48  ;;  %7077 = vmatpush3.bf16.msra.mxu1 %v7677_v59  ;;  %7056 = vmatprep.subr.bf16.mxu0 %v7678_v61  ;;  %v7714_v48 = vld [vmem:[%s9530_s2 + $0x78] sm:$0xff]   ;;  %v6414_v58 = vcombine.low %v6394_v55, %v6394_v55  ;;  %v7722_v59 = vld [vmem:[%s9530_s2 + $0x40] sm:$0xff]  }
 0x19e   :  { %7078 = vmatprep.subr.bf16.mxu1 %v7679_v62  ;;  %v7723_v61 = vld [vmem:[%s9531_s1 + $0x40] sm:$0xff]  }
 0x19f   :  { %v2208_v57 = vmax.f32 %v2207_v54, 0.0  ;;  %v6395_v54 = vld [vmem:[%s9532_s0 + $0xd8] sm:$0xff]  ;;  %v7724_v62 = vld [vmem:[%s9530_s2] sm:$0xff]  }
 0x1a0   :  { %7057 = vmatpush3.bf16.msra.mxu0 %v7680_v63  ;;  %v6396_v56 = vcombine.low %v6395_v54, %v6395_v54  ;;  %v7725_v63 = vld [vmem:[%s9531_s1] sm:$0xff]  }
 0x1a1   :  { %v2209_v60 = vpack.c.bf16 %v2208_v57, %v2208_v57  ;;  %7079 = vmatpush3.bf16.msra.mxu1 %v7681_v0  ;;  %7086 = vmatprep.subr.bf16.mxu0 %v7686_v7  ;;  %v6397_v57 = vcombine.high %v6395_v54, %v6395_v54  ;;  %v7726_v0 = vld [vmem:[%s9530_s2 + $0x48] sm:$0xff]   ;;  %v7733_v7 = vld [vmem:[%s9531_s1 + $0x10] sm:$0xff]  }
 0x1a2   :  { %7108 = vmatprep.subr.bf16.mxu1 %v7687_v8  ;;  %v7734_v8 = vld [vmem:[%s9530_s2 + $0x58] sm:$0xff]   ;;  %v7764_v54 = vld [vmem:[%s9530_s2 + $0x8] sm:$0xff]  }
 0x1a3   :  { %6113 = vst [vmem:[%s9534_s4 + $0x14] sm:$0xf] %v2209_v60  ;;  %4612 = vmatmul.mubr.bf16.vlgmr.msra.gmra.mrb[48].mxu0 %v6356_v3  ;;  %v6415_v60 = vcombine.high %v6394_v55, %v6394_v55  ;;  %v7729_v3 = vld [vmem:[%s9531_s1 + $0x8] sm:$0xff]  }
 0x1a4   :  { %4755 = vmatmul.mubr.bf16.vlgmr.msra.gmra.mrb[48].mxu1 %v6374_v5  ;;  %7087 = vmatpush3.bf16.msra.mxu0 %v7688_v9  ;;  %v7731_v5 = vld [vmem:[%s9531_s1 + $0x50] sm:$0xff]   ;;  %v7735_v9 = vld [vmem:[%s9531_s1 + $0x58] sm:$0xff]   ;;  %v7765_v55 = vld [vmem:[%s9531_s1 + $0x8] sm:$0xff]  }
 0x1a5   :  { %7109 = vmatpush3.bf16.msra.mxu1 %v7689_v10  ;;  %7088 = vmatprep.subr.bf16.mxu0 %v7690_v11  ;;  %v7736_v10 = vld [vmem:[%s9530_s2 + $0x18] sm:$0xff]  }
 0x1a6   :  { %7110 = vmatprep.subr.bf16.mxu1 %v7691_v12  ;;  %4977 = vmatprep.mubr.bf16.mxu0 %v6397_v57  ;;  %v7737_v11 = vld [vmem:[%s9531_s1 + $0x18] sm:$0xff]   ;;  %v7738_v12 = vld [vmem:[%s9530_s2 + $0x60] sm:$0xff]   ;;  %v7767_v57 = vld [vmem:[%s9531_s1 + $0x50] sm:$0xff]  }
 0x1a7   :  { %5120 = vmatprep.mubr.bf16.mxu1 %v6415_v60  ;;  %v7770_v60 = vld [vmem:[%s9530_s2 + $0x58] sm:$0xff]  }
 0x1a8   :  { %7089 = vmatpush3.bf16.msra.mxu0 %v7692_v13  ;;  %v7739_v13 = vld [vmem:[%s9531_s1 + $0x60] sm:$0xff]  }
 0x1a9   :  { %7111 = vmatpush3.bf16.msra.mxu1 %v7693_v14  ;;  %7090 = vmatprep.subr.bf16.mxu0 %v7694_v15  ;;  %v7740_v15 = vld [vmem:[%s9530_s2 + $0x20] sm:$0xff]  }
 0x1aa   :  { %7112 = vmatprep.subr.bf16.mxu1 %v7695_v16 }
 0x1ac   :  { %7091 = vmatpush3.bf16.msra.mxu0 %v7696_v17  ;;  %v7741_v17 = vld [vmem:[%s9531_s1 + $0x20] sm:$0xff]  }
 0x1ad   :  { %7113 = vmatpush3.bf16.msra.mxu1 %v7697_v18  ;;  %7092 = vmatprep.subr.bf16.mxu0 %v7698_v36 }
 0x1ae   :  { %7114 = vmatprep.subr.bf16.mxu1 %v7699_v19  ;;  %v7742_v19 = vld [vmem:[%s9530_s2 + $0x68] sm:$0xff]  }
 0x1b0   :  { %7093 = vmatpush3.bf16.msra.mxu0 %v7700_v20 }
 0x1b1   :  { %7115 = vmatpush3.bf16.msra.mxu1 %v7701_v21  ;;  %7094 = vmatprep.subr.bf16.mxu0 %v7702_v22  ;;  %v7743_v22 = vld [vmem:[%s9531_s1 + $0x68] sm:$0xff]  }
 0x1b2   :  { %7116 = vmatprep.subr.bf16.mxu1 %v7703_v23 }
 0x1b4   :  { %7095 = vmatpush3.bf16.msra.mxu0 %v7704_v25  ;;  %v7744_v25 = vld [vmem:[%s9530_s2 + $0x28] sm:$0xff]  }
 0x1b5   :  { %7117 = vmatpush3.bf16.msra.mxu1 %v7705_v27  ;;  %7096 = vmatprep.subr.bf16.mxu0 %v7706_v31  ;;  %v7745_v27 = vld [vmem:[%s9531_s1 + $0x28] sm:$0xff]  }
 0x1b6   :  { %v6794_v24 = vpop.f32.mrb[24].mxu0  ;;  %7118 = vmatprep.subr.bf16.mxu1 %v7707_v33 }
 0x1b7   :  { %v6816_v26 = vpop.f32.mrb[24].mxu1  ;;  %v6795_v28 = vpop.f32.mrb[25].mxu0 }
 0x1b8   :  { %v6796_v29 = vadd.f32 %v6795_v28, %v6794_v24  ;;  %v6817_v30 = vpop.f32.mrb[25].mxu1  ;;  %v6797_v34 = vpop.f32.mrb[26].mxu0  ;;  %7097 = vmatpush3.bf16.msra.mxu0 %v7708_v37 }
 0x1b9   :  { %v6818_v32 = vadd.f32 %v6817_v30, %v6816_v26  ;;  %v6819_v35 = vpop.f32.mrb[26].mxu1  ;;  %v6798_v40 = vpop.f32.mrb[27].mxu0  ;;  %7119 = vmatpush3.bf16.msra.mxu1 %v7709_v39  ;;  %7098 = vmatprep.subr.bf16.mxu0 %v7710_v42  ;;  %v7746_v30 = vld [vmem:[%s9530_s2 + $0x70] sm:$0xff]   ;;  %v7752_v39 = vld [vmem:[%s9530_s2 + $0x38] sm:$0xff]  }
 0x1ba   :  { %v6820_v41 = vpop.f32.mrb[27].mxu1  ;;  %7120 = vmatprep.subr.bf16.mxu1 %v7711_v44  ;;  %v7748_v34 = vld [vmem:[%s9530_s2 + $0x30] sm:$0xff]   ;;  %v7753_v40 = vld [vmem:[%s9531_s1 + $0x38] sm:$0xff]   ;;  %v6434_v44 = vld [vmem:[%s9532_s0 + $0xe0] sm:$0xff] }
 0x1bb   :  { %v2561_v38 = vadd.f32 %v6818_v32, %v6796_v29  ;;  %v7747_v32 = vld [vmem:[%s9531_s1 + $0x70] sm:$0xff]   ;;  %v6435_v41 = vld [vmem:[%s9532_s0 + $0xe8] sm:$0xff] }
 0x1bc   :  { %7099 = vmatpush3.bf16.msra.mxu0 %v7712_v45  ;;  %v7749_v35 = vld [vmem:[%s9531_s1 + $0x30] sm:$0xff]   ;;  %v6436_v42 = vcombine.low %v6435_v41, %v6435_v41  ;;  %v6454_v45 = vcombine.low %v6434_v44, %v6434_v44 }
 0x1bd   :  { %v2573_v43 = vadd.f32 %v9025_v53, %v2561_v38  ;;  %7121 = vmatpush3.bf16.msra.mxu1 %v7713_v47  ;;  %7100 = vmatprep.subr.bf16.mxu0 %v7714_v48  ;;  %v7751_v38 = vld [vmem:[%s9531_s1 + $0x78] sm:$0xff]   ;;  %v7758_v47 = vld [vmem:[%s9530_s2 + $0x40] sm:$0xff]  }
 0x1be   :  { %7122 = vmatprep.subr.bf16.mxu1 %v7715_v50  ;;  %v7759_v48 = vld [vmem:[%s9531_s1 + $0x40] sm:$0xff]  }
 0x1bf   :  { %v2574_v46 = vmax.f32 %v2573_v43, 0.0  ;;  %v6437_v43 = vcombine.high %v6435_v41, %v6435_v41  ;;  %v7761_v50 = vld [vmem:[%s9531_s1] sm:$0xff]  }
 0x1c0   :  { %7101 = vmatpush3.bf16.msra.mxu0 %v7716_v51  ;;  %v7762_v51 = vld [vmem:[%s9530_s2 + $0x48] sm:$0xff]  }
 0x1c1   :  { %v2575_v49 = vpack.c.bf16 %v2574_v46, %v2574_v46  ;;  %7123 = vmatpush3.bf16.msra.mxu1 %v7717_v52  ;;  %7130 = vmatprep.subr.bf16.mxu0 %v7722_v59  ;;  %v6455_v46 = vcombine.high %v6434_v44, %v6434_v44  ;;  %v7763_v52 = vld [vmem:[%s9531_s1 + $0x48] sm:$0xff]   ;;  %v7769_v59 = vld [vmem:[%s9531_s1 + $0x10] sm:$0xff]  }
 0x1c2   :  { %7152 = vmatprep.subr.bf16.mxu1 %v7723_v61  ;;  %v7771_v61 = vld [vmem:[%s9531_s1 + $0x58] sm:$0xff]  }
 0x1c3   :  { %6153 = vst [vmem:[%s9534_s4 + $0x18] sm:$0xf] %v2575_v49  ;;  %4978 = vmatmul.mubr.bf16.vlgmr.msra.gmra.mrb[52].mxu0 %v6396_v56  ;;  %v7760_v49 = vld [vmem:[%s9530_s2] sm:$0xff]   ;;  %v7766_v56 = vld [vmem:[%s9530_s2 + $0x50] sm:$0xff]  }
 0x1c4   :  { %5121 = vmatmul.mubr.bf16.vlgmr.msra.gmra.mrb[52].mxu1 %v6414_v58  ;;  %7131 = vmatpush3.bf16.msra.mxu0 %v7724_v62  ;;  %v7768_v58 = vld [vmem:[%s9530_s2 + $0x10] sm:$0xff]   ;;  %v7772_v62 = vld [vmem:[%s9530_s2 + $0x18] sm:$0xff]  }
 0x1c5   :  { %7153 = vmatpush3.bf16.msra.mxu1 %v7725_v63  ;;  %7132 = vmatprep.subr.bf16.mxu0 %v7726_v0  ;;  %v7773_v63 = vld [vmem:[%s9531_s1 + $0x18] sm:$0xff]   ;;  %v7774_v0 = vld [vmem:[%s9530_s2 + $0x60] sm:$0xff]  }
 0x1c6   :  { %7154 = vmatprep.subr.bf16.mxu1 %v7727_v1  ;;  %5343 = vmatprep.mubr.bf16.mxu0 %v6437_v43  ;;  %v7775_v1 = vld [vmem:[%s9531_s1 + $0x60] sm:$0xff]  }
 0x1c7   :  { %5486 = vmatprep.mubr.bf16.mxu1 %v6455_v46 }
 0x1c8   :  { %7133 = vmatpush3.bf16.msra.mxu0 %v7728_v2 }
 0x1c9   :  { %7155 = vmatpush3.bf16.msra.mxu1 %v7729_v3  ;;  %7134 = vmatprep.subr.bf16.mxu0 %v7730_v4  ;;  %v7776_v3 = vld [vmem:[%s9530_s2 + $0x20] sm:$0xff]  }
 0x1ca   :  { %7156 = vmatprep.subr.bf16.mxu1 %v7731_v5  ;;  %v7777_v5 = vld [vmem:[%s9531_s1 + $0x20] sm:$0xff]  }
 0x1cc   :  { %7135 = vmatpush3.bf16.msra.mxu0 %v7732_v6 }
 0x1cd   :  { %7157 = vmatpush3.bf16.msra.mxu1 %v7733_v7  ;;  %7136 = vmatprep.subr.bf16.mxu0 %v7734_v8  ;;  %v9454_v8 = vld [vmem:[%s9533_s3] ss:$0 sm:$0xff] }
 0x1ce   :  { %7158 = vmatprep.subr.bf16.mxu1 %v7735_v9  ;;  %v7778_v9 = vld [vmem:[%s9530_s2 + $0x68] sm:$0xff]  }
 0x1d0   :  { %7137 = vmatpush3.bf16.msra.mxu0 %v7736_v10 }
 0x1d1   :  { %7159 = vmatpush3.bf16.msra.mxu1 %v7737_v11  ;;  %7138 = vmatprep.subr.bf16.mxu0 %v7738_v12  ;;  %v7779_v12 = vld [vmem:[%s9531_s1 + $0x68] sm:$0xff]  }
 0x1d2   :  { %7160 = vmatprep.subr.bf16.mxu1 %v7739_v13 }
 0x1d4   :  { %7139 = vmatpush3.bf16.msra.mxu0 %v7740_v15  ;;  %v7780_v15 = vld [vmem:[%s9530_s2 + $0x28] sm:$0xff]  }
 0x1d5   :  { %7161 = vmatpush3.bf16.msra.mxu1 %v7741_v17  ;;  %7140 = vmatprep.subr.bf16.mxu0 %v7742_v19  ;;  %v7781_v17 = vld [vmem:[%s9531_s1 + $0x28] sm:$0xff]   ;;  %v7782_v19 = vld [vmem:[%s9530_s2 + $0x70] sm:$0xff]  }
 0x1d6   :  { %v6838_v14 = vpop.f32.mrb[28].mxu0  ;;  %7162 = vmatprep.subr.bf16.mxu1 %v7743_v22 }
 0x1d7   :  { %v6860_v16 = vpop.f32.mrb[28].mxu1  ;;  %v6839_v18 = vpop.f32.mrb[29].mxu0 }
 0x1d8   :  { %v6861_v36 = vpop.f32.mrb[29].mxu1  ;;  %v6840_v20 = vadd.f32 %v6839_v18, %v6838_v14  ;;  %v6841_v23 = vpop.f32.mrb[30].mxu0  ;;  %7141 = vmatpush3.bf16.msra.mxu0 %v7744_v25 }
 0x1d9   :  { %v6862_v21 = vadd.f32 %v6861_v36, %v6860_v16  ;;  %v6863_v24 = vpop.f32.mrb[30].mxu1  ;;  %v6842_v28 = vpop.f32.mrb[31].mxu0  ;;  %7163 = vmatpush3.bf16.msra.mxu1 %v7745_v27  ;;  %7142 = vmatprep.subr.bf16.mxu0 %v7746_v30  ;;  %v7784_v23 = vld [vmem:[%s9530_s2 + $0x30] sm:$0xff]   ;;  %v7787_v27 = vld [vmem:[%s9531_s1 + $0x78] sm:$0xff]  }
 0x1da   :  { %v6864_v29 = vpop.f32.mrb[31].mxu1  ;;  %7164 = vmatprep.subr.bf16.mxu1 %v7747_v32  ;;  %v7785_v24 = vld [vmem:[%s9531_s1 + $0x30] sm:$0xff]   ;;  %v7788_v28 = vld [vmem:[%s9530_s2 + $0x38] sm:$0xff]  }
 0x1db   :  { %v2927_v26 = vadd.f32 %v6862_v21, %v6840_v20  ;;  %v7783_v21 = vld [vmem:[%s9531_s1 + $0x70] sm:$0xff]   ;;  %v7789_v29 = vld [vmem:[%s9531_s1 + $0x38] sm:$0xff]  }
 0x1dc   :  { %7143 = vmatpush3.bf16.msra.mxu0 %v7748_v34  ;;  %v6475_v30 = vld [vmem:[%s9532_s0 + $0xf8] sm:$0xff] }
 0x1dd   :  { %v2939_v31 = vadd.f32 %v9025_v53, %v2927_v26  ;;  %v7750_v53 = vld [vmem:[%s9530_s2 + $0x78] sm:$0xff]   ;;  %7165 = vmatpush3.bf16.msra.mxu1 %v7749_v35  ;;  %v6477_v32 = vcombine.high %v6475_v30, %v6475_v30 }
 0x1de   :  { %7144 = vmatprep.subr.bf16.mxu0 %v7750_v53  ;;  %7166 = vmatprep.subr.bf16.mxu1 %v7751_v38  ;;  %v7786_v26 = vld [vmem:[%s9530_s2 + $0x78] sm:$0xff]  }
 0x1df   :  { %v2940_v33 = vmax.f32 %v2939_v31, 0.0  ;;  %v6476_v31 = vcombine.low %v6475_v30, %v6475_v30 }
 0x1e0   :  { %7145 = vmatpush3.bf16.msra.mxu0 %v7752_v39 }
 0x1e1   :  { %v2941_v37 = vpack.c.bf16 %v2940_v33, %v2940_v33  ;;  %7167 = vmatpush3.bf16.msra.mxu1 %v7753_v40  ;;  %7174 = vmatprep.subr.bf16.mxu0 %v7758_v47  ;;  %v6474_v33 = vld [vmem:[%s9532_s0 + $0xf0] sm:$0xff] }
 0x1e2   :  { %7196 = vmatprep.subr.bf16.mxu1 %v7759_v48  ;;  %v6494_v34 = vcombine.low %v6474_v33, %v6474_v33  ;;  %v6495_v35 = vcombine.high %v6474_v33, %v6474_v33 }
 0x1e3   :  { %6193 = vst [vmem:[%s9534_s4 + $0x1c] sm:$0xf] %v2941_v37  ;;  %5344 = vmatmul.mubr.bf16.vlgmr.msra.gmra.mrb[56].mxu0 %v6436_v42 }
 0x1e4   :  { %5487 = vmatmul.mubr.bf16.vlgmr.msra.gmra.mrb[56].mxu1 %v6454_v45  ;;  %7175 = vmatpush3.bf16.msra.mxu0 %v7760_v49 }
 0x1e5   :  { %7197 = vmatpush3.bf16.msra.mxu1 %v7761_v50  ;;  %7176 = vmatprep.subr.bf16.mxu0 %v7762_v51 }
 0x1e6   :  { %7198 = vmatprep.subr.bf16.mxu1 %v7763_v52  ;;  %5709 = vmatprep.mubr.bf16.mxu0 %v6477_v32 }
 0x1e7   :  { %5852 = vmatprep.mubr.bf16.mxu1 %v6495_v35 }
 0x1e8   :  { %7177 = vmatpush3.bf16.msra.mxu0 %v7764_v54 }
 0x1e9   :  { %7199 = vmatpush3.bf16.msra.mxu1 %v7765_v55  ;;  %7178 = vmatprep.subr.bf16.mxu0 %v7766_v56 }
 0x1ea   :  { %7200 = vmatprep.subr.bf16.mxu1 %v7767_v57 }
 0x1ec   :  { %7179 = vmatpush3.bf16.msra.mxu0 %v7768_v58 }
 0x1ed   :  { %7201 = vmatpush3.bf16.msra.mxu1 %v7769_v59  ;;  %7180 = vmatprep.subr.bf16.mxu0 %v7770_v60 }
 0x1ee   :  { %7202 = vmatprep.subr.bf16.mxu1 %v7771_v61 }
 0x1f0   :  { %7181 = vmatpush3.bf16.msra.mxu0 %v7772_v62 }
 0x1f1   :  { %7203 = vmatpush3.bf16.msra.mxu1 %v7773_v63  ;;  %7182 = vmatprep.subr.bf16.mxu0 %v7774_v0 }
 0x1f2   :  { %7204 = vmatprep.subr.bf16.mxu1 %v7775_v1 }
 0x1f4   :  { %7183 = vmatpush3.bf16.msra.mxu0 %v7776_v3 }
 0x1f5   :  { %7205 = vmatpush3.bf16.msra.mxu1 %v7777_v5  ;;  %7184 = vmatprep.subr.bf16.mxu0 %v7778_v9 }
 0x1f6   :  { %v6882_v2 = vpop.f32.mrb[32].mxu0  ;;  %7206 = vmatprep.subr.bf16.mxu1 %v7779_v12 }
 0x1f7   :  { %v6904_v4 = vpop.f32.mrb[32].mxu1  ;;  %v6883_v6 = vpop.f32.mrb[33].mxu0 }
 0x1f8   :  { %v6905_v7 = vpop.f32.mrb[33].mxu1  ;;  %v6884_v10 = vadd.f32 %v6883_v6, %v6882_v2  ;;  %v6885_v13 = vpop.f32.mrb[34].mxu0  ;;  %7185 = vmatpush3.bf16.msra.mxu0 %v7780_v15 }
 0x1f9   :  { %v6906_v11 = vadd.f32 %v6905_v7, %v6904_v4  ;;  %v6907_v14 = vpop.f32.mrb[34].mxu1  ;;  %v6886_v18 = vpop.f32.mrb[35].mxu0  ;;  %7207 = vmatpush3.bf16.msra.mxu1 %v7781_v17  ;;  %7186 = vmatprep.subr.bf16.mxu0 %v7782_v19 }
 0x1fa   :  { %v6908_v36 = vpop.f32.mrb[35].mxu1  ;;  %7208 = vmatprep.subr.bf16.mxu1 %v7783_v21 }
 0x1fb   :  { %v3293_v16 = vadd.f32 %v6906_v11, %v6884_v10 }
 0x1fc   :  { %7187 = vmatpush3.bf16.msra.mxu0 %v7784_v23 }
 0x1fd   :  { %v3305_v20 = vadd.f32 %v9454_v8, %v3293_v16  ;;  %7209 = vmatpush3.bf16.msra.mxu1 %v7785_v24  ;;  %7188 = vmatprep.subr.bf16.mxu0 %v7786_v26 }
 0x1fe   :  { %7210 = vmatprep.subr.bf16.mxu1 %v7787_v27 }
 0x1ff   :  { %v3306_v22 = vmax.f32 %v3305_v20, 0.0 }
 0x200   :  { %7189 = vmatpush3.bf16.msra.mxu0 %v7788_v28 }
 0x201   :  { %v3307_v25 = vpack.c.bf16 %v3306_v22, %v3306_v22  ;;  %7211 = vmatpush3.bf16.msra.mxu1 %v7789_v29 }
 0x203   :  { %6233 = vst [vmem:[%s9534_s4 + $0x20] sm:$0xf] %v3307_v25  ;;  %5710 = vmatmul.mubr.bf16.vlgmr.msra.gmra.mrb[60].mxu0 %v6476_v31 }
 0x204   :  { %5853 = vmatmul.mubr.bf16.vlgmr.msra.gmra.mrb[60].mxu1 %v6494_v34 }
 0x216   :  { %v6926_v37 = vpop.f32.mrb[36].mxu0 }
 0x217   :  { %v6948_v53 = vpop.f32.mrb[36].mxu1  ;;  %v6927_v38 = vpop.f32.mrb[37].mxu0 }
 0x218   :  { %v6928_v39 = vadd.f32 %v6927_v38, %v6926_v37  ;;  %v6949_v40 = vpop.f32.mrb[37].mxu1  ;;  %v6929_v41 = vpop.f32.mrb[38].mxu0 }
 0x219   :  { %v6950_v42 = vadd.f32 %v6949_v40, %v6948_v53  ;;  %v6951_v43 = vpop.f32.mrb[38].mxu1  ;;  %v6930_v44 = vpop.f32.mrb[39].mxu0 }
 0x21a   :  { %v6952_v45 = vpop.f32.mrb[39].mxu1 }
 0x21b   :  { %v3659_v46 = vadd.f32 %v6950_v42, %v6928_v39 }
 0x21d   :  { %v3671_v47 = vadd.f32 %v9454_v8, %v3659_v46 }
 0x21f   :  { %v3672_v48 = vmax.f32 %v3671_v47, 0.0 }
 0x221   :  { %v3673_v49 = vpack.c.bf16 %v3672_v48, %v3672_v48 }
 0x223   :  { %6273 = vst [vmem:[%s9534_s4 + $0x24] sm:$0xf] %v3673_v49 }
 0x236   :  { %v6970_v50 = vpop.f32.mrb[40].mxu0 }
 0x237   :  { %v6992_v51 = vpop.f32.mrb[40].mxu1  ;;  %v6971_v52 = vpop.f32.mrb[41].mxu0 }
 0x238   :  { %v6993_v54 = vpop.f32.mrb[41].mxu1  ;;  %v6972_v55 = vadd.f32 %v6971_v52, %v6970_v50  ;;  %v6973_v57 = vpop.f32.mrb[42].mxu0 }
 0x239   :  { %v6994_v56 = vadd.f32 %v6993_v54, %v6992_v51  ;;  %v6995_v58 = vpop.f32.mrb[42].mxu1  ;;  %v6974_v59 = vpop.f32.mrb[43].mxu0 }
 0x23a   :  { %v6996_v60 = vpop.f32.mrb[43].mxu1 }
 0x23b   :  { %v4025_v61 = vadd.f32 %v6994_v56, %v6972_v55 }
 0x23d   :  { %v4037_v62 = vadd.f32 %v9454_v8, %v4025_v61 }
 0x23f   :  { %v4038_v63 = vmax.f32 %v4037_v62, 0.0 }
 0x241   :  { %v4039_v0 = vpack.c.bf16 %v4038_v63, %v4038_v63 }
 0x243   :  { %6313 = vst [vmem:[%s9534_s4 + $0x28] sm:$0xf] %v4039_v0 }
 0x256   :  { %v7014_v1 = vpop.f32.mrb[44].mxu0 }
 0x257   :  { %v7036_v2 = vpop.f32.mrb[44].mxu1  ;;  %v7015_v3 = vpop.f32.mrb[45].mxu0 }
 0x258   :  { %v7016_v4 = vadd.f32 %v7015_v3, %v7014_v1  ;;  %v7037_v5 = vpop.f32.mrb[45].mxu1  ;;  %v7017_v6 = vpop.f32.mrb[46].mxu0 }
 0x259   :  { %v7038_v7 = vadd.f32 %v7037_v5, %v7036_v2  ;;  %v7039_v9 = vpop.f32.mrb[46].mxu1  ;;  %v7018_v10 = vpop.f32.mrb[47].mxu0 }
 0x25a   :  { %v7040_v11 = vpop.f32.mrb[47].mxu1 }
 0x25b   :  { %v4391_v12 = vadd.f32 %v7038_v7, %v7016_v4 }
 0x25d   :  { %v4403_v13 = vadd.f32 %v9454_v8, %v4391_v12 }
 0x25f   :  { %v4404_v14 = vmax.f32 %v4403_v13, 0.0 }
 0x261   :  { %v4405_v15 = vpack.c.bf16 %v4404_v14, %v4404_v14 }
 0x263   :  { %6353 = vst [vmem:[%s9534_s4 + $0x2c] sm:$0xf] %v4405_v15 }
 0x276   :  { %v7058_v16 = vpop.f32.mrb[48].mxu0 }
 0x277   :  { %v7080_v17 = vpop.f32.mrb[48].mxu1  ;;  %v7059_v18 = vpop.f32.mrb[49].mxu0 }
 0x278   :  { %v7060_v36 = vadd.f32 %v7059_v18, %v7058_v16  ;;  %v7081_v19 = vpop.f32.mrb[49].mxu1  ;;  %v7061_v20 = vpop.f32.mrb[50].mxu0 }
 0x279   :  { %v7082_v21 = vadd.f32 %v7081_v19, %v7080_v17  ;;  %v7083_v22 = vpop.f32.mrb[50].mxu1  ;;  %v7062_v23 = vpop.f32.mrb[51].mxu0 }
 0x27a   :  { %v7084_v24 = vpop.f32.mrb[51].mxu1 }
 0x27b   :  { %v4757_v25 = vadd.f32 %v7082_v21, %v7060_v36 }
 0x27d   :  { %v4769_v26 = vadd.f32 %v9454_v8, %v4757_v25 }
 0x27f   :  { %v4770_v27 = vmax.f32 %v4769_v26, 0.0 }
 0x281   :  { %v4771_v28 = vpack.c.bf16 %v4770_v27, %v4770_v27 }
 0x283   :  { %6393 = vst [vmem:[%s9534_s4 + $0x30] sm:$0xf] %v4771_v28 }
 0x296   :  { %v7102_v29 = vpop.f32.mrb[52].mxu0 }
 0x297   :  { %v7124_v30 = vpop.f32.mrb[52].mxu1  ;;  %v7103_v31 = vpop.f32.mrb[53].mxu0 }
 0x298   :  { %v7104_v32 = vadd.f32 %v7103_v31, %v7102_v29  ;;  %v7125_v33 = vpop.f32.mrb[53].mxu1  ;;  %v7105_v34 = vpop.f32.mrb[54].mxu0 }
 0x299   :  { %v7126_v35 = vadd.f32 %v7125_v33, %v7124_v30  ;;  %v7127_v37 = vpop.f32.mrb[54].mxu1  ;;  %v7106_v53 = vpop.f32.mrb[55].mxu0 }
 0x29a   :  { %v7128_v38 = vpop.f32.mrb[55].mxu1 }
 0x29b   :  { %v5123_v39 = vadd.f32 %v7126_v35, %v7104_v32 }
 0x29d   :  { %v5135_v40 = vadd.f32 %v9454_v8, %v5123_v39 }
 0x29f   :  { %v5136_v41 = vmax.f32 %v5135_v40, 0.0 }
 0x2a1   :  { %v5137_v42 = vpack.c.bf16 %v5136_v41, %v5136_v41 }
 0x2a3   :  { %6433 = vst [vmem:[%s9534_s4 + $0x34] sm:$0xf] %v5137_v42 }
 0x2b6   :  { %v7146_v43 = vpop.f32.mrb[56].mxu0 }
 0x2b7   :  { %v7168_v44 = vpop.f32.mrb[56].mxu1  ;;  %v7147_v45 = vpop.f32.mrb[57].mxu0 }
 0x2b8   :  { %v7169_v46 = vpop.f32.mrb[57].mxu1  ;;  %v7148_v47 = vadd.f32 %v7147_v45, %v7146_v43  ;;  %v7149_v49 = vpop.f32.mrb[58].mxu0 }
 0x2b9   :  { %v7170_v48 = vadd.f32 %v7169_v46, %v7168_v44  ;;  %v7171_v50 = vpop.f32.mrb[58].mxu1  ;;  %v7150_v51 = vpop.f32.mrb[59].mxu0 }
 0x2ba   :  { %v7172_v52 = vpop.f32.mrb[59].mxu1 }
 0x2bb   :  { %v5489_v54 = vadd.f32 %v7170_v48, %v7148_v47 }
 0x2bd   :  { %v5501_v55 = vadd.f32 %v9454_v8, %v5489_v54 }
 0x2bf   :  { %v5502_v56 = vmax.f32 %v5501_v55, 0.0 }
 0x2c1   :  { %v5503_v57 = vpack.c.bf16 %v5502_v56, %v5502_v56 }
 0x2c3   :  { %6473 = vst [vmem:[%s9534_s4 + $0x38] sm:$0xf] %v5503_v57 }
 0x2d6   :  { %v7190_v58 = vpop.f32.mrb[60].mxu0 }
 0x2d7   :  { %v7212_v59 = vpop.f32.mrb[60].mxu1  ;;  %v7191_v60 = vpop.f32.mrb[61].mxu0 }
 0x2d8   :  { %v7192_v61 = vadd.f32 %v7191_v60, %v7190_v58  ;;  %v7213_v62 = vpop.f32.mrb[61].mxu1  ;;  %v7193_v63 = vpop.f32.mrb[62].mxu0 }
 0x2d9   :  { %v7214_v0 = vadd.f32 %v7213_v62, %v7212_v59  ;;  %v7215_v1 = vpop.f32.mrb[62].mxu1  ;;  %v7194_v2 = vpop.f32.mrb[63].mxu0 }
 0x2da   :  { %v7216_v3 = vpop.f32.mrb[63].mxu1 }
 0x2db   :  { %v5855_v4 = vadd.f32 %v7214_v0, %v7192_v61 }
 0x2dd   :  { %v5867_v5 = vadd.f32 %v9454_v8, %v5855_v4 }
 0x2df   :  { %v5868_v6 = vmax.f32 %v5867_v5, 0.0 }
 0x2e1   :  { %v5869_v7 = vpack.c.bf16 %v5868_v6, %v5868_v6 }
 0x2e3   :  { %6513 = vst [vmem:[%s9534_s4 + $0x3c] sm:$0xf] %v5869_v7 }

</bundles_post_ra>
